<compile_context>
chip_gen: v7x
topology: tpu7x:2x2x1
jax: 0.10.0
libtpu: 0.0.40
codegen_flags: <defaults>
</compile_context>

<pallas_src>
import functools

import jax
import jax.numpy as jnp
from jax.experimental import pallas as pl
from jax.experimental.pallas import tpu as pltpu


# ----------------------------------------------------------------------------
# Fused Pallas kernel
# ----------------------------------------------------------------------------
def _fused_kernel(*refs, masked):
    """Fused projections + mem-kv attention + output projection.

    Per grid step (TB (b, y)-rows at a time):
      xqk:(TB,X,d_qk) xv:(TB,X,d_v)
      wqk:(d_qk,2*H*D)  [w_q*scale | w_k fused]   wv:(d_v,H*D)
      wo:(H*D,d_v)  bo:(1,d_v)
      memk:(H,D,M) (pre-transposed)  memv:(H,M,D)   [VMEM-resident]
      bias:(TB,X) additive key mask (0 keep / -1e30 drop), only if masked
      out:(TB,X,d_v)
    """
    if masked:
        (xqk_ref, xv_ref, wqk_ref, wv_ref, wo_ref, bo_ref,
         memk_ref, memv_ref, bias_ref, o_ref) = refs
    else:
        (xqk_ref, xv_ref, wqk_ref, wv_ref, wo_ref, bo_ref,
         memk_ref, memv_ref, o_ref) = refs
        bias_ref = None

    TB, X, d_qk = xqk_ref.shape
    d_v = xv_ref.shape[2]
    H, D, M = memk_ref.shape          # memk pre-transposed to (H, D, M)
    HD = H * D
    R = TB * X                        # all (b, y, x) query rows in this block
    bf16, f32 = jnp.bfloat16, jnp.float32

    # Activations: flatten every (b, y, x) position into one big row dimension
    # so the projections become single 2D MXU matmuls.  (Reshape keeps the
    # minor / lane dim unchanged -> no relayout risk.)
    xqk = xqk_ref[...].astype(bf16).reshape(R, d_qk)
    xv = xv_ref[...].astype(bf16).reshape(R, d_v)

    # All-heads 1x1 projections: one matmul feeds q AND k (fused weight, scale
    # pre-folded into the q columns), one matmul produces v for all heads.
    qkb = jnp.dot(xqk, wqk_ref[...].astype(bf16),
                  preferred_element_type=f32).astype(bf16)      # (R, 2*H*D)
    vb = jnp.dot(xv, wv_ref[...].astype(bf16),
                 preferred_element_type=f32).astype(bf16)       # (R, H*D)

    # Weights / mem-kv: cast once, hoisted out of the head loop.
    memk = memk_ref[...].astype(bf16)      # (H, D, M)
    memv = memv_ref[...].astype(bf16)      # (H, M, D)
    wo = wo_ref[...].astype(bf16)          # (H*D, d_v)
    bias = bias_ref[...][:, None, :] if masked else None        # (TB, 1, X) f32

    # Output accumulator seeded with the to_out bias.
    acc = jnp.broadcast_to(bo_ref[...].astype(f32), (TB, X, d_v))

    # H is small; the score / PV matmuls are inherently per-(b, y) batched.
    for h in range(H):
        lo, hi = h * D, (h + 1) * D
        qh = qkb[:, lo:hi]                                       # (R, D)
        kh = qkb[:, HD + lo:HD + hi].reshape(TB, X, D)
        vh = vb[:, lo:hi].reshape(TB, X, D)

        # mem-kv scores: one 2D matmul across every row of the block.
        s_mem = jnp.dot(qh, memk[h],
                        preferred_element_type=f32).reshape(TB, X, M)
        # spatial scores: batched over the TB (b, y) rows.
        s_kv = jnp.einsum('txd,tyd->txy', qh.reshape(TB, X, D), kh,
                          preferred_element_type=f32)            # (TB, X, X)
        if masked:
            s_kv = s_kv + bias       # -1e30 on masked keys (mem keys never masked)

        # f32 softmax over the concatenated [mem | kv] key axis, without concat.
        m = jnp.maximum(jnp.max(s_mem, axis=-1, keepdims=True),
                        jnp.max(s_kv, axis=-1, keepdims=True))
        p_mem = jnp.exp(s_mem - m)
        p_kv = jnp.exp(s_kv - m)
        denom = (jnp.sum(p_mem, axis=-1, keepdims=True) +
                 jnp.sum(p_kv, axis=-1, keepdims=True))

        o_h = (jnp.dot(p_mem.reshape(R, M).astype(bf16), memv[h],
                       preferred_element_type=f32).reshape(TB, X, D) +
               jnp.einsum('txy,tyd->txd', p_kv.astype(bf16), vh,
                          preferred_element_type=f32))
        # Normalize once; EUP approx reciprocal (~1e-3 rel err, below bf16 noise).
        o_h = o_h * pl.reciprocal(denom, approx=True)

        # Per-head strip of the to_out 1x1 conv: (R, D) @ (D, d_v), 2D on MXU.
        acc = acc + jnp.dot(o_h.reshape(R, D).astype(bf16), wo[lo:hi, :],
                            preferred_element_type=f32).reshape(TB, X, d_v)

    # Attention dropout is identity (module default dropout=0.0 / eval mode).
    o_ref[...] = acc.astype(o_ref.dtype)


# ----------------------------------------------------------------------------
# Block sizing helpers (VMEM-budget + chip-aware grid policy)
# ----------------------------------------------------------------------------
def _is_two_core_chip():
    """True on chips with 2 TensorCores per device (v7x); megacore sharding
    via dimension_semantics=('parallel',) only helps there."""
    try:
        kind = jax.devices()[0].device_kind.lower()
    except Exception:
        return False
    return ("v7" in kind) or ("7x" in kind)


def _estimate_row_bytes(X, d_qk, d_v, H, D, M):
    """Rough per-(b,y)-row VMEM footprint of one grid step (lane padding and
    the statically-unrolled head loop included), used to cap TB."""
    lane = lambda n: max(n, 128)               # minor-dim vreg / VMEM padding
    io = (2 * X * lane(d_qk)                   # xqk block (double-buffered)
          + 2 * X * lane(d_v)                  # xv block
          + 2 * X * lane(d_v)                  # output block
          + 2 * lane(X)) * 4                   # mask-bias block
    proj = X * 3 * H * D * (4 + 2)             # q|k and v projections (f32 + bf16)
    attn = H * X * (3 * (X + lane(M)) + 3 * D) * 4   # scores / probs / per-head out
    return io + proj + attn


def _pick_block(by, row_bytes, *, vmem_budget_bytes=8 << 20, two_cores=False):
    """Largest multiple-of-8 (or full-extent) divisor of `by` whose block fits
    the VMEM budget.  On 2-TC chips keep >= 2 grid steps and an even count so
    both TensorCores get equal work; on 1-TC chips a single step is best."""
    cap = max(1, min(by, vmem_budget_bytes // max(row_bytes, 1)))
    if two_cores and by >= 2:
        cap = min(cap, max(1, by // 2))
    for tb in range(cap, 0, -1):
        if by % tb:
            continue
        if tb != by and tb % 8:
            continue                           # keep blocks sublane-tile aligned
        if two_cores and by % 2 == 0 and (by // tb) % 2:
            continue                           # even #steps for 2 TCs
        return tb
    return by                                  # fallback: single full-extent step


# ----------------------------------------------------------------------------
# CrossAttention forward (wrapper: layout plumbing only, compute in Pallas)
# ----------------------------------------------------------------------------
def cross_attention_forward(params, qk, v, mask=None, *, heads, dim_head,
                            num_mem_kv):
    B, d_qk, X, Y = qk.shape
    Bv, d_v, Xv, Yv = v.shape
    assert B == Bv and X == Xv and Y == Yv
    H, D, M = heads, dim_head, num_mem_kv
    hidden = H * D
    BY = B * Y
    scale = float(dim_head) ** (-0.5)

    # 'b c x y -> (b y) x c'.
    # TODO(synk): these HBM->HBM transposes could be folded into the kernel's
    # input DMA (grid over y in native layout / allow_input_fusion); kept
    # outside the kernel for lowering safety.
    xqk = jnp.transpose(qk, (0, 3, 2, 1)).reshape(BY, X, d_qk)
    xv = jnp.transpose(v, (0, 3, 2, 1)).reshape(BY, X, d_v)

    # Fused q|k weight (attention scale folded into the q half) + v / out.
    wqk = jnp.concatenate([params['w_q'] * scale, params['w_k']], axis=1)
    wv = params['w_v']                                     # (d_v, hidden)
    wo = params['w_out']                                   # (hidden, d_v)
    bo = params['b_out'].reshape(1, d_v)
    memk_t = jnp.transpose(params['mem_kv'][0], (0, 2, 1))  # (H, D, M)
    memv = params['mem_kv'][1]                              # (H, M, D)

    row_bytes = _estimate_row_bytes(X, d_qk, d_v, H, D, M)
    TB = _pick_block(BY, row_bytes, two_cores=_is_two_core_chip())
    grid = (BY // TB,)
    masked = mask is not None

    row3 = lambda i: (i, 0, 0)
    const2 = lambda i: (0, 0)
    const3 = lambda i: (0, 0, 0)

    in_specs = [
        pl.BlockSpec((TB, X, d_qk), row3),           # xqk block
        pl.BlockSpec((TB, X, d_v), row3),            # xv block
        pl.BlockSpec((d_qk, 2 * hidden), const2),    # fused q|k weight (resident)
        pl.BlockSpec((d_v, hidden), const2),         # v weight (resident)
        pl.BlockSpec((hidden, d_v), const2),         # out weight (resident)
        pl.BlockSpec((1, d_v), const2),              # out bias (resident)
        pl.BlockSpec((H, D, M), const3),             # mem_k^T (resident)
        pl.BlockSpec((H, M, D), const3),             # mem_v (resident)
    ]
    args = [xqk, xv, wqk, wv, wo, bo, memk_t, memv]
    if masked:
        assert mask.shape == (B, 1, X, Y)
        # 'b 1 x y -> (b y) x' key mask as a compact additive bias.
        mrow = jnp.transpose(mask[:, 0], (0, 2, 1)).reshape(BY, X)
        bias = jnp.where(mrow, 0.0, -1e30).astype(jnp.float32)
        in_specs.append(pl.BlockSpec((TB, X), lambda i: (i, 0)))
        args.append(bias)

    out = pl.pallas_call(
        functools.partial(_fused_kernel, masked=masked),
        out_shape=jax.ShapeDtypeStruct((BY, X, d_v), qk.dtype),
        grid=grid,
        in_specs=in_specs,
        out_specs=pl.BlockSpec((TB, X, d_v), row3),
        compiler_params=pltpu.CompilerParams(
            dimension_semantics=("parallel",)),
    )(*args)

    # '(b y) x c -> b c x y'
    return jnp.transpose(out.reshape(B, Y, X, d_v), (0, 3, 2, 1))


# ----------------------------------------------------------------------------
# Pure-JAX f32 reference (same math, no Pallas) for verification
# ----------------------------------------------------------------------------
def cross_attention_reference(params, qk, v, mask=None, *, heads, dim_head,
                              num_mem_kv):
    B, d_qk, X, Y = qk.shape
    d_v = v.shape[1]
    hidden = heads * dim_head

    def conv1x1(x, w, b=None):
        y = jnp.einsum('bcxy,cd->bxyd', x, w)
        if b is not None:
            y = y + b
        return y

    qh = conv1x1(qk, params['w_q'])
    kh = conv1x1(qk, params['w_k'])
    vh = conv1x1(v, params['w_v'])

    def to_bhxd(t):
        t = t.reshape(B, X, Y, heads, dim_head)
        return jnp.transpose(t, (0, 2, 3, 1, 4)).reshape(B * Y, heads, X, dim_head)

    qh, kh, vh = map(to_bhxd, (qh, kh, vh))
    memk = jnp.broadcast_to(params['mem_kv'][0][None],
                            (B * Y, heads, num_mem_kv, dim_head))
    memv = jnp.broadcast_to(params['mem_kv'][1][None],
                            (B * Y, heads, num_mem_kv, dim_head))
    kh = jnp.concatenate([memk, kh], axis=2)
    vh = jnp.concatenate([memv, vh], axis=2)

    scale = float(dim_head) ** (-0.5)
    sim = jnp.einsum('bhid,bhjd->bhij', qh, kh) * scale
    if mask is not None:
        m2 = jnp.transpose(mask[:, 0], (0, 2, 1)).reshape(B * Y, 1, 1, X)
        mm = jnp.ones((B * Y, 1, 1, num_mem_kv), bool)
        m = jnp.concatenate([mm, m2.astype(bool)], axis=-1)
        sim = jnp.where(m, sim, -jnp.inf)
    attn = jax.nn.softmax(sim, axis=-1)
    out = jnp.einsum('bhij,bhjd->bhid', attn, vh)

    out = out.reshape(B, Y, heads, X, dim_head)
    out = jnp.transpose(out, (0, 3, 1, 2, 4)).reshape(B, X, Y, hidden)
    o = jnp.einsum('bxyh,hd->bxyd', out, params['w_out']) + params['b_out']
    return jnp.transpose(o, (0, 3, 1, 2))


# ----------------------------------------------------------------------------
if __name__ == "__main__":
    # module config (small, TPU-friendly)
    B, d_qk, d_v, X, Y = 2, 4, 8, 16, 8
    heads, dim_head, num_mem_kv = 2, 16, 4
    hidden = heads * dim_head

    key = jax.random.PRNGKey(0)
    ks = jax.random.split(key, 8)

    params = {
        'w_q': jax.random.normal(ks[0], (d_qk, hidden), jnp.float32) * 0.1,
        'w_k': jax.random.normal(ks[1], (d_qk, hidden), jnp.float32) * 0.1,
        'w_v': jax.random.normal(ks[2], (d_v, hidden), jnp.float32) * 0.1,
        'w_out': jax.random.normal(ks[3], (hidden, d_v), jnp.float32) * 0.1,
        'b_out': jax.random.normal(ks[4], (d_v,), jnp.float32) * 0.1,
        'mem_kv': jax.random.normal(ks[5], (2, heads, num_mem_kv, dim_head),
                                    jnp.float32),
    }

    qk = jax.random.normal(ks[6], (B, d_qk, X, Y), jnp.float32)
    v = jax.random.normal(ks[7], (B, d_v, X, Y), jnp.float32)
    mask = (jax.random.uniform(jax.random.PRNGKey(42), (B, 1, X, Y)) > 0.3)

    fwd = jax.jit(functools.partial(cross_attention_forward, heads=heads,
                                    dim_head=dim_head, num_mem_kv=num_mem_kv))
    ref = jax.jit(functools.partial(cross_attention_reference, heads=heads,
                                    dim_head=dim_head, num_mem_kv=num_mem_kv))

    # bf16 MXU matmuls (f32 accumulation) vs f32 reference -> loosen tolerance.
    TOL = dict(rtol=2e-2, atol=2e-2)

    # mask=None path (specialized kernel variant, no mask input)
    out = jax.block_until_ready(fwd(params, qk, v))
    out_ref = jax.block_until_ready(ref(params, qk, v))
    assert out.shape == (B, d_v, X, Y)
    assert jnp.allclose(out, out_ref, **TOL), \
        f"unmasked mismatch: {jnp.max(jnp.abs(out - out_ref))}"

    # masked path
    out_m = jax.block_until_ready(fwd(params, qk, v, mask))
    out_m_ref = jax.block_until_ready(ref(params, qk, v, mask))
    assert jnp.allclose(out_m, out_m_ref, **TOL), \
        f"masked mismatch: {jnp.max(jnp.abs(out_m - out_m_ref))}"

    print("KERNEL_OK")
</pallas_src>

<mosaic_0001>
module attributes {stable_mosaic.version = 11 : i64} {
  func.func @_fused_kernel(%arg0: i32, %arg1: memref<16x16x4xf32, #tpu.memory_space<vmem>>, %arg2: memref<16x16x8xf32, #tpu.memory_space<vmem>>, %arg3: memref<4x64xf32, #tpu.memory_space<vmem>>, %arg4: memref<8x32xf32, #tpu.memory_space<vmem>>, %arg5: memref<32x8xf32, #tpu.memory_space<vmem>>, %arg6: memref<1x8xf32, #tpu.memory_space<vmem>>, %arg7: memref<2x16x4xf32, #tpu.memory_space<vmem>>, %arg8: memref<2x4x16xf32, #tpu.memory_space<vmem>>, %arg9: memref<16x16x8xf32, #tpu.memory_space<vmem>>) attributes {dimension_semantics = [#tpu.dimension_semantics<parallel>], iteration_bounds = array<i64: 1>, scalar_prefetch = 0 : i64, scratch_operands = 0 : i64, tpu.core_type = #tpu.core_type<tc>, window_params = [{transform_indices = @transform_0, window_bounds = array<i64: 16, 16, 4>}, {transform_indices = @transform_1, window_bounds = array<i64: 16, 16, 8>}, {pipeline_mode = #tpu.pipeline_mode<synchronous>, transform_indices = @transform_2, window_bounds = array<i64: 4, 64>}, {pipeline_mode = #tpu.pipeline_mode<synchronous>, transform_indices = @transform_3, window_bounds = array<i64: 8, 32>}, {pipeline_mode = #tpu.pipeline_mode<synchronous>, transform_indices = @transform_4, window_bounds = array<i64: 32, 8>}, {pipeline_mode = #tpu.pipeline_mode<synchronous>, transform_indices = @transform_5, window_bounds = array<i64: 1, 8>}, {pipeline_mode = #tpu.pipeline_mode<synchronous>, transform_indices = @transform_6, window_bounds = array<i64: 2, 16, 4>}, {pipeline_mode = #tpu.pipeline_mode<synchronous>, transform_indices = @transform_7, window_bounds = array<i64: 2, 4, 16>}, {transform_indices = @transform_8, window_bounds = array<i64: 16, 16, 8>}]} {
    %c0 = arith.constant 0 : index
    %c0_0 = arith.constant 0 : index
    %c0_1 = arith.constant 0 : index
    %0 = vector.load %arg1[%c0, %c0_0, %c0_1] : memref<16x16x4xf32, #tpu.memory_space<vmem>>, vector<16x16x4xf32>
    %1 = arith.truncf %0 : vector<16x16x4xf32> to vector<16x16x4xbf16>
    %2 = vector.shape_cast %1 : vector<16x16x4xbf16> to vector<256x4xbf16>
    %c0_2 = arith.constant 0 : index
    %c0_3 = arith.constant 0 : index
    %c0_4 = arith.constant 0 : index
    %3 = vector.load %arg2[%c0_2, %c0_3, %c0_4] : memref<16x16x8xf32, #tpu.memory_space<vmem>>, vector<16x16x8xf32>
    %4 = arith.truncf %3 : vector<16x16x8xf32> to vector<16x16x8xbf16>
    %5 = vector.shape_cast %4 : vector<16x16x8xbf16> to vector<256x8xbf16>
    %c0_5 = arith.constant 0 : index
    %c0_6 = arith.constant 0 : index
    %6 = vector.load %arg3[%c0_5, %c0_6] : memref<4x64xf32, #tpu.memory_space<vmem>>, vector<4x64xf32>
    %7 = arith.truncf %6 : vector<4x64xf32> to vector<4x64xbf16>
    %cst = arith.constant dense<0.000000e+00> : vector<256x64xf32>
    %8 = tpu.matmul %2, %7, %cst {dimension_numbers = #tpu.dot_dimension_numbers<[1], [0], [0], [1], [0, 0, 1, 1], [], []>} : vector<256x4xbf16>, vector<4x64xbf16>, vector<256x64xf32> -> vector<256x64xf32>
    %9 = arith.truncf %8 : vector<256x64xf32> to vector<256x64xbf16>
    %c0_7 = arith.constant 0 : index
    %c0_8 = arith.constant 0 : index
    %10 = vector.load %arg4[%c0_7, %c0_8] : memref<8x32xf32, #tpu.memory_space<vmem>>, vector<8x32xf32>
    %11 = arith.truncf %10 : vector<8x32xf32> to vector<8x32xbf16>
    %cst_9 = arith.constant dense<0.000000e+00> : vector<256x32xf32>
    %12 = tpu.matmul %5, %11, %cst_9 {dimension_numbers = #tpu.dot_dimension_numbers<[1], [0], [0], [1], [0, 0, 1, 1], [], []>} : vector<256x8xbf16>, vector<8x32xbf16>, vector<256x32xf32> -> vector<256x32xf32>
    %13 = arith.truncf %12 : vector<256x32xf32> to vector<256x32xbf16>
    %c0_10 = arith.constant 0 : index
    %c0_11 = arith.constant 0 : index
    %c0_12 = arith.constant 0 : index
    %14 = vector.load %arg7[%c0_10, %c0_11, %c0_12] : memref<2x16x4xf32, #tpu.memory_space<vmem>>, vector<2x16x4xf32>
    %15 = arith.truncf %14 : vector<2x16x4xf32> to vector<2x16x4xbf16>
    %c0_13 = arith.constant 0 : index
    %c0_14 = arith.constant 0 : index
    %c0_15 = arith.constant 0 : index
    %16 = vector.load %arg8[%c0_13, %c0_14, %c0_15] : memref<2x4x16xf32, #tpu.memory_space<vmem>>, vector<2x4x16xf32>
    %17 = arith.truncf %16 : vector<2x4x16xf32> to vector<2x4x16xbf16>
    %c0_16 = arith.constant 0 : index
    %c0_17 = arith.constant 0 : index
    %18 = vector.load %arg5[%c0_16, %c0_17] : memref<32x8xf32, #tpu.memory_space<vmem>>, vector<32x8xf32>
    %19 = arith.truncf %18 : vector<32x8xf32> to vector<32x8xbf16>
    %c0_18 = arith.constant 0 : index
    %c0_19 = arith.constant 0 : index
    %20 = vector.load %arg6[%c0_18, %c0_19] : memref<1x8xf32, #tpu.memory_space<vmem>>, vector<1x8xf32>
    %21 = vector.shape_cast %20 : vector<1x8xf32> to vector<1x1x8xf32>
    %22 = vector.broadcast %21 : vector<1x1x8xf32> to vector<16x16x8xf32>
    %23 = vector.extract_strided_slice %9 {offsets = [0, 0], sizes = [256, 16], strides = [1, 1]} : vector<256x64xbf16> to vector<256x16xbf16>
    %24 = vector.extract_strided_slice %9 {offsets = [0, 32], sizes = [256, 16], strides = [1, 1]} : vector<256x64xbf16> to vector<256x16xbf16>
    %25 = vector.shape_cast %24 : vector<256x16xbf16> to vector<16x16x16xbf16>
    %26 = vector.extract_strided_slice %13 {offsets = [0, 0], sizes = [256, 16], strides = [1, 1]} : vector<256x32xbf16> to vector<256x16xbf16>
    %27 = vector.shape_cast %26 : vector<256x16xbf16> to vector<16x16x16xbf16>
    %28 = vector.extract_strided_slice %15 {offsets = [0, 0, 0], sizes = [1, 16, 4], strides = [1, 1, 1]} : vector<2x16x4xbf16> to vector<1x16x4xbf16>
    %29 = vector.shape_cast %28 : vector<1x16x4xbf16> to vector<16x4xbf16>
    %cst_20 = arith.constant dense<0.000000e+00> : vector<256x4xf32>
    %30 = tpu.matmul %23, %29, %cst_20 {dimension_numbers = #tpu.dot_dimension_numbers<[1], [0], [0], [1], [0, 0, 1, 1], [], []>} : vector<256x16xbf16>, vector<16x4xbf16>, vector<256x4xf32> -> vector<256x4xf32>
    %31 = vector.shape_cast %30 : vector<256x4xf32> to vector<16x16x4xf32>
    %32 = vector.shape_cast %23 : vector<256x16xbf16> to vector<16x16x16xbf16>
    "tpu.trace_start"() <{level = 10 : i32, message = "txd,tyd->txy"}> : () -> ()
    %cst_21 = arith.constant dense<0.000000e+00> : vector<16x16x16xf32>
    %33 = tpu.matmul %32, %25, %cst_21 {dimension_numbers = #tpu.dot_dimension_numbers<[2], [2], [1], [1], [0, 0, 0, 1, 1, 1], [0], [0]>} : vector<16x16x16xbf16>, vector<16x16x16xbf16>, vector<16x16x16xf32> -> vector<16x16x16xf32>
    "tpu.trace_stop"() : () -> ()
    %cst_22 = arith.constant dense<0xFF800000> : vector<16x16xf32>
    %34 = vector.multi_reduction <maximumf>, %31, %cst_22 [2] : vector<16x16x4xf32> to vector<16x16xf32>
    %35 = vector.shape_cast %34 : vector<16x16xf32> to vector<16x16x1xf32>
    %cst_23 = arith.constant dense<0xFF800000> : vector<16x16xf32>
    %36 = vector.multi_reduction <maximumf>, %33, %cst_23 [2] : vector<16x16x16xf32> to vector<16x16xf32>
    %37 = vector.shape_cast %36 : vector<16x16xf32> to vector<16x16x1xf32>
    %38 = arith.maximumf %35, %37 : vector<16x16x1xf32>
    %39 = vector.broadcast %38 : vector<16x16x1xf32> to vector<16x16x4xf32>
    %40 = arith.subf %31, %39 : vector<16x16x4xf32>
    %41 = math.exp %40 : vector<16x16x4xf32>
    %42 = vector.broadcast %38 : vector<16x16x1xf32> to vector<16x16x16xf32>
    %43 = arith.subf %33, %42 : vector<16x16x16xf32>
    %44 = math.exp %43 : vector<16x16x16xf32>
    %cst_24 = arith.constant dense<0.000000e+00> : vector<16x16xf32>
    %45 = vector.multi_reduction <add>, %41, %cst_24 [2] : vector<16x16x4xf32> to vector<16x16xf32>
    %46 = vector.shape_cast %45 : vector<16x16xf32> to vector<16x16x1xf32>
    %cst_25 = arith.constant dense<0.000000e+00> : vector<16x16xf32>
    %47 = vector.multi_reduction <add>, %44, %cst_25 [2] : vector<16x16x16xf32> to vector<16x16xf32>
    %48 = vector.shape_cast %47 : vector<16x16xf32> to vector<16x16x1xf32>
    %49 = arith.addf %46, %48 : vector<16x16x1xf32>
    %50 = vector.shape_cast %41 : vector<16x16x4xf32> to vector<256x4xf32>
    %51 = arith.truncf %50 : vector<256x4xf32> to vector<256x4xbf16>
    %52 = vector.extract_strided_slice %17 {offsets = [0, 0, 0], sizes = [1, 4, 16], strides = [1, 1, 1]} : vector<2x4x16xbf16> to vector<1x4x16xbf16>
    %53 = vector.shape_cast %52 : vector<1x4x16xbf16> to vector<4x16xbf16>
    %cst_26 = arith.constant dense<0.000000e+00> : vector<256x16xf32>
    %54 = tpu.matmul %51, %53, %cst_26 {dimension_numbers = #tpu.dot_dimension_numbers<[1], [0], [0], [1], [0, 0, 1, 1], [], []>} : vector<256x4xbf16>, vector<4x16xbf16>, vector<256x16xf32> -> vector<256x16xf32>
    %55 = vector.shape_cast %54 : vector<256x16xf32> to vector<16x16x16xf32>
    %56 = arith.truncf %44 : vector<16x16x16xf32> to vector<16x16x16xbf16>
    "tpu.trace_start"() <{level = 10 : i32, message = "txy,tyd->txd"}> : () -> ()
    %cst_27 = arith.constant dense<0.000000e+00> : vector<16x16x16xf32>
    %57 = tpu.matmul %56, %27, %cst_27 {dimension_numbers = #tpu.dot_dimension_numbers<[2], [1], [1], [2], [0, 0, 0, 1, 1, 2], [0], [0]>} : vector<16x16x16xbf16>, vector<16x16x16xbf16>, vector<16x16x16xf32> -> vector<16x16x16xf32>
    "tpu.trace_stop"() : () -> ()
    %58 = arith.addf %55, %57 : vector<16x16x16xf32>
    %59 = tpu.reciprocal %49 {approx = true} : vector<16x16x1xf32> -> vector<16x16x1xf32>
    %60 = vector.broadcast %59 : vector<16x16x1xf32> to vector<16x16x16xf32>
    %61 = arith.mulf %58, %60 : vector<16x16x16xf32>
    %62 = vector.shape_cast %61 : vector<16x16x16xf32> to vector<256x16xf32>
    %63 = arith.truncf %62 : vector<256x16xf32> to vector<256x16xbf16>
    %64 = vector.extract_strided_slice %19 {offsets = [0, 0], sizes = [16, 8], strides = [1, 1]} : vector<32x8xbf16> to vector<16x8xbf16>
    %cst_28 = arith.constant dense<0.000000e+00> : vector<256x8xf32>
    %65 = tpu.matmul %63, %64, %cst_28 {dimension_numbers = #tpu.dot_dimension_numbers<[1], [0], [0], [1], [0, 0, 1, 1], [], []>} : vector<256x16xbf16>, vector<16x8xbf16>, vector<256x8xf32> -> vector<256x8xf32>
    %66 = vector.shape_cast %65 : vector<256x8xf32> to vector<16x16x8xf32>
    %67 = arith.addf %22, %66 : vector<16x16x8xf32>
    %68 = vector.extract_strided_slice %9 {offsets = [0, 16], sizes = [256, 16], strides = [1, 1]} : vector<256x64xbf16> to vector<256x16xbf16>
    %69 = vector.extract_strided_slice %9 {offsets = [0, 48], sizes = [256, 16], strides = [1, 1]} : vector<256x64xbf16> to vector<256x16xbf16>
    %70 = vector.shape_cast %69 : vector<256x16xbf16> to vector<16x16x16xbf16>
    %71 = vector.extract_strided_slice %13 {offsets = [0, 16], sizes = [256, 16], strides = [1, 1]} : vector<256x32xbf16> to vector<256x16xbf16>
    %72 = vector.shape_cast %71 : vector<256x16xbf16> to vector<16x16x16xbf16>
    %73 = vector.extract_strided_slice %15 {offsets = [1, 0, 0], sizes = [1, 16, 4], strides = [1, 1, 1]} : vector<2x16x4xbf16> to vector<1x16x4xbf16>
    %74 = vector.shape_cast %73 : vector<1x16x4xbf16> to vector<16x4xbf16>
    %cst_29 = arith.constant dense<0.000000e+00> : vector<256x4xf32>
    %75 = tpu.matmul %68, %74, %cst_29 {dimension_numbers = #tpu.dot_dimension_numbers<[1], [0], [0], [1], [0, 0, 1, 1], [], []>} : vector<256x16xbf16>, vector<16x4xbf16>, vector<256x4xf32> -> vector<256x4xf32>
    %76 = vector.shape_cast %75 : vector<256x4xf32> to vector<16x16x4xf32>
    %77 = vector.shape_cast %68 : vector<256x16xbf16> to vector<16x16x16xbf16>
    "tpu.trace_start"() <{level = 10 : i32, message = "txd,tyd->txy"}> : () -> ()
    %cst_30 = arith.constant dense<0.000000e+00> : vector<16x16x16xf32>
    %78 = tpu.matmul %77, %70, %cst_30 {dimension_numbers = #tpu.dot_dimension_numbers<[2], [2], [1], [1], [0, 0, 0, 1, 1, 1], [0], [0]>} : vector<16x16x16xbf16>, vector<16x16x16xbf16>, vector<16x16x16xf32> -> vector<16x16x16xf32>
    "tpu.trace_stop"() : () -> ()
    %cst_31 = arith.constant dense<0xFF800000> : vector<16x16xf32>
    %79 = vector.multi_reduction <maximumf>, %76, %cst_31 [2] : vector<16x16x4xf32> to vector<16x16xf32>
    %80 = vector.shape_cast %79 : vector<16x16xf32> to vector<16x16x1xf32>
    %cst_32 = arith.constant dense<0xFF800000> : vector<16x16xf32>
    %81 = vector.multi_reduction <maximumf>, %78, %cst_32 [2] : vector<16x16x16xf32> to vector<16x16xf32>
    %82 = vector.shape_cast %81 : vector<16x16xf32> to vector<16x16x1xf32>
    %83 = arith.maximumf %80, %82 : vector<16x16x1xf32>
    %84 = vector.broadcast %83 : vector<16x16x1xf32> to vector<16x16x4xf32>
    %85 = arith.subf %76, %84 : vector<16x16x4xf32>
    %86 = math.exp %85 : vector<16x16x4xf32>
    %87 = vector.broadcast %83 : vector<16x16x1xf32> to vector<16x16x16xf32>
    %88 = arith.subf %78, %87 : vector<16x16x16xf32>
    %89 = math.exp %88 : vector<16x16x16xf32>
    %cst_33 = arith.constant dense<0.000000e+00> : vector<16x16xf32>
    %90 = vector.multi_reduction <add>, %86, %cst_33 [2] : vector<16x16x4xf32> to vector<16x16xf32>
    %91 = vector.shape_cast %90 : vector<16x16xf32> to vector<16x16x1xf32>
    %cst_34 = arith.constant dense<0.000000e+00> : vector<16x16xf32>
    %92 = vector.multi_reduction <add>, %89, %cst_34 [2] : vector<16x16x16xf32> to vector<16x16xf32>
    %93 = vector.shape_cast %92 : vector<16x16xf32> to vector<16x16x1xf32>
    %94 = arith.addf %91, %93 : vector<16x16x1xf32>
    %95 = vector.shape_cast %86 : vector<16x16x4xf32> to vector<256x4xf32>
    %96 = arith.truncf %95 : vector<256x4xf32> to vector<256x4xbf16>
    %97 = vector.extract_strided_slice %17 {offsets = [1, 0, 0], sizes = [1, 4, 16], strides = [1, 1, 1]} : vector<2x4x16xbf16> to vector<1x4x16xbf16>
    %98 = vector.shape_cast %97 : vector<1x4x16xbf16> to vector<4x16xbf16>
    %cst_35 = arith.constant dense<0.000000e+00> : vector<256x16xf32>
    %99 = tpu.matmul %96, %98, %cst_35 {dimension_numbers = #tpu.dot_dimension_numbers<[1], [0], [0], [1], [0, 0, 1, 1], [], []>} : vector<256x4xbf16>, vector<4x16xbf16>, vector<256x16xf32> -> vector<256x16xf32>
    %100 = vector.shape_cast %99 : vector<256x16xf32> to vector<16x16x16xf32>
    %101 = arith.truncf %89 : vector<16x16x16xf32> to vector<16x16x16xbf16>
    "tpu.trace_start"() <{level = 10 : i32, message = "txy,tyd->txd"}> : () -> ()
    %cst_36 = arith.constant dense<0.000000e+00> : vector<16x16x16xf32>
    %102 = tpu.matmul %101, %72, %cst_36 {dimension_numbers = #tpu.dot_dimension_numbers<[2], [1], [1], [2], [0, 0, 0, 1, 1, 2], [0], [0]>} : vector<16x16x16xbf16>, vector<16x16x16xbf16>, vector<16x16x16xf32> -> vector<16x16x16xf32>
    "tpu.trace_stop"() : () -> ()
    %103 = arith.addf %100, %102 : vector<16x16x16xf32>
    %104 = tpu.reciprocal %94 {approx = true} : vector<16x16x1xf32> -> vector<16x16x1xf32>
    %105 = vector.broadcast %104 : vector<16x16x1xf32> to vector<16x16x16xf32>
    %106 = arith.mulf %103, %105 : vector<16x16x16xf32>
    %107 = vector.shape_cast %106 : vector<16x16x16xf32> to vector<256x16xf32>
    %108 = arith.truncf %107 : vector<256x16xf32> to vector<256x16xbf16>
    %109 = vector.extract_strided_slice %19 {offsets = [16, 0], sizes = [16, 8], strides = [1, 1]} : vector<32x8xbf16> to vector<16x8xbf16>
    %cst_37 = arith.constant dense<0.000000e+00> : vector<256x8xf32>
    %110 = tpu.matmul %108, %109, %cst_37 {dimension_numbers = #tpu.dot_dimension_numbers<[1], [0], [0], [1], [0, 0, 1, 1], [], []>} : vector<256x16xbf16>, vector<16x8xbf16>, vector<256x8xf32> -> vector<256x8xf32>
    %111 = vector.shape_cast %110 : vector<256x8xf32> to vector<16x16x8xf32>
    %112 = arith.addf %67, %111 : vector<16x16x8xf32>
    %c0_38 = arith.constant 0 : index
    %c0_39 = arith.constant 0 : index
    %c0_40 = arith.constant 0 : index
    %113 = vector.load %arg9[%c0_38, %c0_39, %c0_40] : memref<16x16x8xf32, #tpu.memory_space<vmem>>, vector<16x16x8xf32>
    tpu.vector_store %arg9[%c0_38, %c0_39, %c0_40], %112 {strides = array<i32>} : memref<16x16x8xf32, #tpu.memory_space<vmem>>, vector<16x16x8xf32>,
    return
  }
  func.func @transform_0(%arg0: i32) -> (i32, i32, i32) {
    %c0_i32 = arith.constant 0 : i32
    %c0_i32_0 = arith.constant 0 : i32
    %c0_i32_1 = arith.constant 0 : i32
    return %arg0, %c0_i32, %c0_i32_0 : i32, i32, i32
  }
  func.func @transform_1(%arg0: i32) -> (i32, i32, i32) {
    %c0_i32 = arith.constant 0 : i32
    %c0_i32_0 = arith.constant 0 : i32
    %c0_i32_1 = arith.constant 0 : i32
    return %arg0, %c0_i32, %c0_i32_0 : i32, i32, i32
  }
  func.func @transform_2(%arg0: i32) -> (i32, i32) {
    %c0_i32 = arith.constant 0 : i32
    %c0_i32_0 = arith.constant 0 : i32
    %c0_i32_1 = arith.constant 0 : i32
    return %c0_i32, %c0_i32_0 : i32, i32
  }
  func.func @transform_3(%arg0: i32) -> (i32, i32) {
    %c0_i32 = arith.constant 0 : i32
    %c0_i32_0 = arith.constant 0 : i32
    %c0_i32_1 = arith.constant 0 : i32
    return %c0_i32, %c0_i32_0 : i32, i32
  }
  func.func @transform_4(%arg0: i32) -> (i32, i32) {
    %c0_i32 = arith.constant 0 : i32
    %c0_i32_0 = arith.constant 0 : i32
    %c0_i32_1 = arith.constant 0 : i32
    return %c0_i32, %c0_i32_0 : i32, i32
  }
  func.func @transform_5(%arg0: i32) -> (i32, i32) {
    %c0_i32 = arith.constant 0 : i32
    %c0_i32_0 = arith.constant 0 : i32
    %c0_i32_1 = arith.constant 0 : i32
    return %c0_i32, %c0_i32_0 : i32, i32
  }
  func.func @transform_6(%arg0: i32) -> (i32, i32, i32) {
    %c0_i32 = arith.constant 0 : i32
    %c0_i32_0 = arith.constant 0 : i32
    %c0_i32_1 = arith.constant 0 : i32
    %c0_i32_2 = arith.constant 0 : i32
    return %c0_i32, %c0_i32_0, %c0_i32_1 : i32, i32, i32
  }
  func.func @transform_7(%arg0: i32) -> (i32, i32, i32) {
    %c0_i32 = arith.constant 0 : i32
    %c0_i32_0 = arith.constant 0 : i32
    %c0_i32_1 = arith.constant 0 : i32
    %c0_i32_2 = arith.constant 0 : i32
    return %c0_i32, %c0_i32_0, %c0_i32_1 : i32, i32, i32
  }
  func.func @transform_8(%arg0: i32) -> (i32, i32, i32) {
    %c0_i32 = arith.constant 0 : i32
    %c0_i32_0 = arith.constant 0 : i32
    %c0_i32_1 = arith.constant 0 : i32
    return %arg0, %c0_i32, %c0_i32_0 : i32, i32, i32
  }
}

</mosaic_0001>

<bundles_post_ra>
// kernel: cross_attention_forward.1
= control target key start
LH: loop header
LB: loop body
LE: loop exit
PB: predicated region body
PF: predicated region fallthrough
CT: control target
= control target key end

     0   :  { %vm177_vm0 = vcmask 1041408   ;;  %vm128_vm1 = vcmask 31744   ;;  %vm409_vm2 = vcmask 1043456   ;;  %vm360_vm3 = vcmask 64512   ;;  %s8110_s21 = smov 112   ;;  %s8111_s29 = smov 80   ;;  %s11104_s2 = inlined_call_operand.vmem [shape: f32[4,64], index: 2, kind: input, shape index: {}]   ;;  %s11105_s0 = inlined_call_operand.vmem [shape: f32[16,16,4], index: 0, kind: input, shape index: {}]   ;;  %s11106_s6 = inlined_call_operand.vmem [shape: f32[2,16,4], index: 6, kind: input, shape index: {}]   ;;  %s11107_s3 = inlined_call_operand.vmem [shape: f32[8,32], index: 3, kind: input, shape index: {}]   ;;  %s11108_s1 = inlined_call_operand.vmem [shape: f32[16,16,8], index: 1, kind: input, shape index: {}]   ;;  %s11109_s7 = inlined_call_operand.vmem [shape: f32[2,4,16], index: 7, kind: input, shape index: {}]   ;;  %s11110_s4 = inlined_call_operand.vmem [shape: f32[32,8], index: 4, kind: input, shape index: {}]   ;;  %s11111_s5 = inlined_call_operand.vmem [shape: f32[1,8], index: 5, kind: input, shape index: {}]   ;;  %s11112_s8 = inlined_call_operand.vmem [shape: f32[16,16,8], index: 8, kind: output, shape index: {}]  }
   0x1   :  { %v126_v0 = vld [vmem:[%s11104_s2] sm:$0xf]  ;;  %v31_v2 = vld [vmem:[%s11105_s0 + $0x8] sm:$0xff]  ;;  %v32_v5 = vld [vmem:[%s11105_s0 + $0x10] sm:$0xff]  ;;  %vm8108_vm4 = vmmov 0   ;;  %vm613_vm5 = vcmask 130048  }
   0x2   :  { %v30_v1 = vld [vmem:[%s11105_s0] sm:$0xff]  ;;  %v127_v3 = vpack.c.bf16 %v126_v0, %v126_v0  ;;  %v33_v6 = vld [vmem:[%s11105_s0 + $0x18] sm:$0xff]  ;;  %v35_v8 = vld [vmem:[%s11105_s0 + $0x28] sm:$0xff] }
   0x3   :  { %v62_v4 = vpack.c.bf16 %v31_v2, %v30_v1  ;;  %v34_v7 = vld [vmem:[%s11105_s0 + $0x20] sm:$0xff]  ;;  %v63_v10 = vpack.c.bf16 %v33_v6, %v32_v5  ;;  %v47_v13 = vld [vmem:[%s11105_s0 + $0x88] sm:$0xff]  ;;  %v48_v14 = vld [vmem:[%s11105_s0 + $0x90] sm:$0xff] }
   0x4   :  { %7713 = vmatprep.subr.msk.bf16.mxu0 %vm177_vm0, %v127_v3  ;;  %v179_v9 = vsel %vm177_vm0, %v127_v3, 0  ;;  %v64_v11 = vpack.c.bf16 %v35_v8, %v34_v7  ;;  %7714 = vmatprep.subr.msk.bf16.mxu1 %vm177_vm0, %v127_v3  ;;  %v46_v12 = vld [vmem:[%s11105_s0 + $0x80] sm:$0xff]  ;;  %v49_v15 = vld [vmem:[%s11105_s0 + $0x98] sm:$0xff]  ;;  %v51_v19 = vld [vmem:[%s11105_s0 + $0xa8] sm:$0xff] }
   0x5   :  { %6993 = vmatprep.mubr.msk.bf16.mxu0 %vm128_vm1, %v62_v4  ;;  %6992 = vmatpush3.bf16.msra.mxu0 %v179_v9  ;;  %v70_v16 = vpack.c.bf16 %v47_v13, %v46_v12  ;;  %v71_v17 = vpack.c.bf16 %v49_v15, %v48_v14  ;;  %v50_v18 = vld [vmem:[%s11105_s0 + $0xa0] sm:$0xff]  ;;  %v36_v20 = vld [vmem:[%s11105_s0 + $0x30] sm:$0xff]  ;;  %v37_v21 = vld [vmem:[%s11105_s0 + $0x38] sm:$0xff] }
   0x6   :  { %7648 = vmatpush3.bf16.msra.mxu1 %v179_v9  ;;  %v72_v22 = vpack.c.bf16 %v51_v19, %v50_v18  ;;  %v38_v23 = vld [vmem:[%s11105_s0 + $0x40] sm:$0xff]  ;;  %v39_v24 = vld [vmem:[%s11105_s0 + $0x48] sm:$0xff]  ;;  %v65_v25 = vpack.c.bf16 %v37_v21, %v36_v20  ;;  %v52_v26 = vld [vmem:[%s11105_s0 + $0xb0] sm:$0xff] }
   0x7   :  { %7009 = vmatprep.mubr.msk.bf16.mxu1 %vm128_vm1, %v70_v16  ;;  %v53_v27 = vld [vmem:[%s11105_s0 + $0xb8] sm:$0xff]  ;;  %v66_v28 = vpack.c.bf16 %v39_v24, %v38_v23  ;;  %v54_v29 = vld [vmem:[%s11105_s0 + $0xc0] sm:$0xff]  ;;  %v55_v30 = vld [vmem:[%s11105_s0 + $0xc8] sm:$0xff] }
   0x8   :  { %6994 = vmatmul.mubr.msk.bf16.vlgmr.msra.gmra.mrb[0].mxu0 %vm128_vm1, %v63_v10  ;;  %v73_v31 = vpack.c.bf16 %v53_v27, %v52_v26  ;;  %v74_v32 = vpack.c.bf16 %v55_v30, %v54_v29  ;;  %v40_v33 = vld [vmem:[%s11105_s0 + $0x50] sm:$0xff]  ;;  %v41_v34 = vld [vmem:[%s11105_s0 + $0x58] sm:$0xff]  ;;  %v42_v35 = vld [vmem:[%s11105_s0 + $0x60] sm:$0xff] }
   0x9   :  { %6997 = vmatprep.mubr.msk.bf16.mxu0 %vm128_vm1, %v64_v11  ;;  %7010 = vmatmul.mubr.msk.bf16.vlgmr.msra.gmra.mrb[0].mxu1 %vm128_vm1, %v71_v17  ;;  %v43_v36 = vld [vmem:[%s11105_s0 + $0x68] sm:$0xff]  ;;  %v67_v37 = vpack.c.bf16 %v41_v34, %v40_v33  ;;  %v56_v38 = vld [vmem:[%s11105_s0 + $0xd0] sm:$0xff]  ;;  %v57_v39 = vld [vmem:[%s11105_s0 + $0xd8] sm:$0xff] }
   0xa   :  { %7013 = vmatprep.mubr.msk.bf16.mxu1 %vm128_vm1, %v72_v22  ;;  %v68_v40 = vpack.c.bf16 %v43_v36, %v42_v35  ;;  %v58_v41 = vld [vmem:[%s11105_s0 + $0xe0] sm:$0xff]  ;;  %v59_v42 = vld [vmem:[%s11105_s0 + $0xe8] sm:$0xff]  ;;  %v75_v43 = vpack.c.bf16 %v57_v39, %v56_v38  ;;  %v44_v45 = vld [vmem:[%s11105_s0 + $0x70] sm:$0xff] }
   0xb   :  { %v76_v44 = vpack.c.bf16 %v59_v42, %v58_v41  ;;  %v45_v46 = vld [vmem:[%s11105_s0 + $0x78] sm:$0xff]  ;;  %v60_v48 = vld [vmem:[%s11105_s0 + $0xf0] sm:$0xff]  ;;  %v590_v51 = vld [vmem:[%s11106_s6] sm:$0xff]  ;;  %v11113_v41 = vmov 0.0  }
   0xc   :  { %v69_v47 = vpack.c.bf16 %v45_v46, %v44_v45  ;;  %v61_v49 = vld [vmem:[%s11105_s0 + $0xf8] sm:$0xff]  ;;  %v591_v52 = vld [vmem:[%s11106_s6 + $0x8] sm:$0xff]  ;;  %v358_v54 = vld [vmem:[%s11107_s3] sm:$0xff] }
   0xd   :  { %v77_v50 = vpack.c.bf16 %v61_v49, %v60_v48  ;;  %v594_v53 = vpack.c.bf16 %v591_v52, %v590_v51  ;;  %v78_v55 = vld [vmem:[%s11108_s1] sm:$0xff]  ;;  %v79_v56 = vld [vmem:[%s11108_s1 + $0x8] sm:$0xff]  ;;  %v359_v57 = vpack.c.bf16 %v358_v54, %v358_v54  ;;  %v80_v59 = vld [vmem:[%s11108_s1 + $0x10] sm:$0xff] }
   0xe   :  { %v110_v58 = vpack.c.bf16 %v79_v56, %v78_v55  ;;  %v81_v60 = vld [vmem:[%s11108_s1 + $0x18] sm:$0xff]  ;;  %v82_v61 = vld [vmem:[%s11108_s1 + $0x20] sm:$0xff]  ;;  %v83_v62 = vld [vmem:[%s11108_s1 + $0x28] sm:$0xff] }
   0xf   :  { %7059 = vmatprep.subr.bf16.mxu0 %v594_v53  ;;  %7715 = vmatprep.subr.msk.bf16.mxu1 %vm409_vm2, %v359_v57  ;;  %v411_v63 = vsel %vm409_vm2, %v359_v57, 0  ;;  %v111_v0 = vpack.c.bf16 %v81_v60, %v80_v59  ;;  %v112_v1 = vpack.c.bf16 %v83_v62, %v82_v61  ;;  %v84_v2 = vld [vmem:[%s11108_s1 + $0x30] sm:$0xff]  ;;  %v85_v3 = vld [vmem:[%s11108_s1 + $0x38] sm:$0xff]  ;;  %v86_v4 = vld [vmem:[%s11108_s1 + $0x40] sm:$0xff] }
  0x10   :  { %6998 = vmatmul.mubr.msk.bf16.gmra.mrb[4].mxu0 %vm128_vm1, %v65_v25  ;;  %7026 = vmatpush3.bf16.msra.mxu1 %v411_v63  ;;  %v87_v5 = vld [vmem:[%s11108_s1 + $0x48] sm:$0xff]  ;;  %v113_v6 = vpack.c.bf16 %v85_v3, %v84_v2  ;;  %v88_v8 = vld [vmem:[%s11108_s1 + $0x50] sm:$0xff]  ;;  %v89_v9 = vld [vmem:[%s11108_s1 + $0x58] sm:$0xff] }
  0x11   :  { %7001 = vmatprep.mubr.msk.bf16.mxu0 %vm128_vm1, %v66_v28  ;;  %7014 = vmatmul.mubr.msk.bf16.gmra.mrb[4].mxu1 %vm128_vm1, %v73_v31  ;;  %v114_v7 = vpack.c.bf16 %v87_v5, %v86_v4  ;;  %v90_v10 = vld [vmem:[%s11108_s1 + $0x60] sm:$0xff]  ;;  %v91_v11 = vld [vmem:[%s11108_s1 + $0x68] sm:$0xff]  ;;  %v115_v12 = vpack.c.bf16 %v89_v9, %v88_v8  ;;  %v92_v14 = vld [vmem:[%s11108_s1 + $0x70] sm:$0xff] }
  0x12   :  { %7017 = vmatprep.mubr.msk.bf16.mxu1 %vm128_vm1, %v74_v32  ;;  %7060 = vmatpush3.bf16.msra.mxu0 %v594_v53  ;;  %v116_v13 = vpack.c.bf16 %v91_v11, %v90_v10  ;;  %v93_v15 = vld [vmem:[%s11108_s1 + $0x78] sm:$0xff]  ;;  %v94_v16 = vld [vmem:[%s11108_s1 + $0x80] sm:$0xff]  ;;  %v95_v17 = vld [vmem:[%s11108_s1 + $0x88] sm:$0xff] }
  0x13   :  { %v117_v18 = vpack.c.bf16 %v93_v15, %v92_v14  ;;  %v118_v19 = vpack.c.bf16 %v95_v17, %v94_v16  ;;  %v96_v20 = vld [vmem:[%s11108_s1 + $0x90] sm:$0xff]  ;;  %v97_v21 = vld [vmem:[%s11108_s1 + $0x98] sm:$0xff]  ;;  %v98_v22 = vld [vmem:[%s11108_s1 + $0xa0] sm:$0xff]  ;;  %7093 = vmatprep.subr.bf16.mxu1 %v11113_v41  ;;  %7141 = vmatprep.subr.bf16.mxu0 %v11113_v41 }
  0x14   :  { %v99_v23 = vld [vmem:[%s11108_s1 + $0xa8] sm:$0xff]  ;;  %v119_v24 = vpack.c.bf16 %v97_v21, %v96_v20  ;;  %v100_v26 = vld [vmem:[%s11108_s1 + $0xb0] sm:$0xff]  ;;  %v101_v27 = vld [vmem:[%s11108_s1 + $0xb8] sm:$0xff] }
  0x15   :  { %v120_v25 = vpack.c.bf16 %v99_v23, %v98_v22  ;;  %v102_v28 = vld [vmem:[%s11108_s1 + $0xc0] sm:$0xff]  ;;  %v103_v29 = vld [vmem:[%s11108_s1 + $0xc8] sm:$0xff]  ;;  %v121_v30 = vpack.c.bf16 %v101_v27, %v100_v26  ;;  %v104_v32 = vld [vmem:[%s11108_s1 + $0xd0] sm:$0xff] }
  0x16   :  { %v122_v31 = vpack.c.bf16 %v103_v29, %v102_v28  ;;  %v105_v33 = vld [vmem:[%s11108_s1 + $0xd8] sm:$0xff]  ;;  %v106_v34 = vld [vmem:[%s11108_s1 + $0xe0] sm:$0xff]  ;;  %v107_v35 = vld [vmem:[%s11108_s1 + $0xe8] sm:$0xff] }
  0x17   :  { %v123_v36 = vpack.c.bf16 %v105_v33, %v104_v32  ;;  %v108_v38 = vld [vmem:[%s11108_s1 + $0xf0] sm:$0xff]  ;;  %v109_v39 = vld [vmem:[%s11108_s1 + $0xf8] sm:$0xff]  ;;  %s8109_s1 = smov 96  }
  0x18   :  { %7002 = vmatmul.mubr.msk.bf16.gmra.mrb[8].mxu0 %vm128_vm1, %v67_v37  ;;  %v124_v37 = vpack.c.bf16 %v107_v35, %v106_v34 }
  0x19   :  { %7005 = vmatprep.mubr.msk.bf16.mxu0 %vm128_vm1, %v68_v40  ;;  %7018 = vmatmul.mubr.msk.bf16.gmra.mrb[8].mxu1 %vm128_vm1, %v75_v43  ;;  %v125_v40 = vpack.c.bf16 %v109_v39, %v108_v38 }
  0x1a   :  { %7021 = vmatprep.mubr.msk.bf16.mxu1 %vm128_vm1, %v76_v44 }
  0x20   :  { %7006 = vmatmul.mubr.msk.bf16.gmra.mrb[12].mxu0 %vm128_vm1, %v69_v47 }
  0x21   :  { %7022 = vmatmul.mubr.msk.bf16.gmra.mrb[12].mxu1 %vm128_vm1, %v77_v50 }
  0x22   :  { %7027 = vmatprep.mubr.msk.bf16.mxu1 %vm360_vm3, %v110_v58 }
  0x29   :  { %7028 = vmatmul.mubr.msk.bf16.vlgmr.msra.gmra.mrb[16].mxu1 %vm360_vm3, %v111_v0 }
  0x2a   :  { %7031 = vmatprep.mubr.msk.bf16.mxu1 %vm360_vm3, %v112_v1 }
  0x31   :  { %7032 = vmatmul.mubr.msk.bf16.gmra.mrb[20].mxu1 %vm360_vm3, %v113_v6 }
  0x32   :  { %7035 = vmatprep.mubr.msk.bf16.mxu1 %vm360_vm3, %v114_v7 }
  0x39   :  { %7036 = vmatmul.mubr.msk.bf16.gmra.mrb[24].mxu1 %vm360_vm3, %v115_v12 }
  0x3a   :  { %7039 = vmatprep.mubr.msk.bf16.mxu1 %vm360_vm3, %v116_v13 }
  0x41   :  { %7040 = vmatmul.mubr.msk.bf16.gmra.mrb[28].mxu1 %vm360_vm3, %v117_v18 }
  0x42   :  { %7043 = vmatprep.mubr.msk.bf16.mxu1 %vm360_vm3, %v118_v19 }
  0x49   :  { %7044 = vmatmul.mubr.msk.bf16.gmra.mrb[32].mxu1 %vm360_vm3, %v119_v24 }
  0x4a   :  { %7047 = vmatprep.mubr.msk.bf16.mxu1 %vm360_vm3, %v120_v25 }
  0x51   :  { %7048 = vmatmul.mubr.msk.bf16.gmra.mrb[36].mxu1 %vm360_vm3, %v121_v30 }
  0x52   :  { %7051 = vmatprep.mubr.msk.bf16.mxu1 %vm360_vm3, %v122_v31 }
  0x59   :  { %7052 = vmatmul.mubr.msk.bf16.gmra.mrb[40].mxu1 %vm360_vm3, %v123_v36 }
  0x5a   :  { %7055 = vmatprep.mubr.msk.bf16.mxu1 %vm360_vm3, %v124_v37 }
  0x61   :  { %7056 = vmatmul.mubr.msk.bf16.gmra.mrb[44].mxu1 %vm360_vm3, %v125_v40 }
  0x62   :  { %7095 = vmatprep.mubr.msk.bf16.mxu1 %vm8108_vm4, %v11113_v41 }
  0xdb   :  { %v6995_v42 = vpop.f32.mrb[0].mxu0 }
  0xdc   :  { %v215_v43 = vpop.f32.mrb[1].mxu0  ;;  %v7011_v47 = vpop.f32.mrb[0].mxu1 }
  0xdd   :  { %v6996_v44 = vpop.f32.mrb[2].mxu0  ;;  %v279_v49 = vpop.f32.mrb[1].mxu1 }
  0xde   :  { %v8400_v45 = vpack.c.bf16 %v6996_v44, %v6995_v42  ;;  %v218_v46 = vpop.f32.mrb[3].mxu0  ;;  %v7012_v50 = vpop.f32.mrb[2].mxu1 }
  0xdf   :  { %v8402_v48 = vpack.c.bf16 %v218_v46, %v215_v43  ;;  %v8408_v51 = vpack.c.bf16 %v7012_v50, %v7011_v47  ;;  %v282_v52 = vpop.f32.mrb[3].mxu1 }
  0xe0   :  { %11226 = vst [vmem:[#allocation2_spill] sm:$0xff] %v8400_v45  ;;  %v8412_v53 = vpack.c.bf16 %v282_v52, %v279_v49 }
  0xe1   :  { %11227 = vst [vmem:[#allocation3_spill] sm:$0xff] %v8402_v48  ;;  %824 = vrot.lane.b32.xlu0 %v8402_v48, %s8109_s1  ;;  %7061 = vmatprep.mubr.msk.bf16.mxu0 %vm613_vm5, %v8402_v48  ;;  %11228 = vst [vmem:[#allocation4_spill] sm:$0xff] %v8408_v51 }
  0xe2   :  { %7062 = vmatmul.mubr.msk.bf16.vlgmr.msra.gmra.mrb[16].mxu0 %vm613_vm5, %v8400_v45  ;;  %11229 = vst [vmem:[#allocation5_spill] sm:$0xff] %v8412_v53 }
  0xe3   :  { %v6999_v54 = vpop.f32.mrb[4].mxu0 }
  0xe4   :  { %v231_v55 = vpop.f32.mrb[5].mxu0  ;;  %v7015_v59 = vpop.f32.mrb[4].mxu1 }
  0xe5   :  { %871 = vrot.lane.b32.xlu0 %v8400_v45, %s8109_s1  ;;  %v7000_v56 = vpop.f32.mrb[6].mxu0  ;;  %v295_v61 = vpop.f32.mrb[5].mxu1 }
  0xe6   :  { %v8416_v57 = vpack.c.bf16 %v7000_v56, %v6999_v54  ;;  %v234_v58 = vpop.f32.mrb[7].mxu0  ;;  %v7016_v62 = vpop.f32.mrb[6].mxu1 }
  0xe7   :  { %v8418_v60 = vpack.c.bf16 %v234_v58, %v231_v55  ;;  %v8424_v63 = vpack.c.bf16 %v7016_v62, %v7015_v59  ;;  %v298_v0 = vpop.f32.mrb[7].mxu1 }
  0xe8   :  { %11230 = vst [vmem:[#allocation6_spill] sm:$0xff] %v8416_v57  ;;  %v8428_v1 = vpack.c.bf16 %v298_v0, %v295_v61 }
  0xe9   :  { %11231 = vst [vmem:[#allocation7_spill] sm:$0xff] %v8418_v60  ;;  %918 = vrot.lane.b32.xlu1 %v8418_v60, %s8109_s1  ;;  %7065 = vmatprep.mubr.msk.bf16.mxu0 %vm613_vm5, %v8418_v60  ;;  %11232 = vst [vmem:[#allocation8_spill] sm:$0xff] %v8424_v63 }
  0xea   :  { %7066 = vmatmul.mubr.msk.bf16.gmra.mrb[20].mxu0 %vm613_vm5, %v8416_v57  ;;  %11233 = vst [vmem:[#allocation9_spill] sm:$0xff] %v8428_v1 }
  0xeb   :  { %v7003_v2 = vpop.f32.mrb[8].mxu0 }
  0xec   :  { %v247_v3 = vpop.f32.mrb[9].mxu0  ;;  %v7019_v7 = vpop.f32.mrb[8].mxu1 }
  0xed   :  { %965 = vrot.lane.b32.xlu1 %v8416_v57, %s8109_s1  ;;  %v7004_v4 = vpop.f32.mrb[10].mxu0  ;;  %v311_v9 = vpop.f32.mrb[9].mxu1 }
  0xee   :  { %v8432_v5 = vpack.c.bf16 %v7004_v4, %v7003_v2  ;;  %v250_v6 = vpop.f32.mrb[11].mxu0  ;;  %v7020_v10 = vpop.f32.mrb[10].mxu1 }
  0xef   :  { %v8434_v8 = vpack.c.bf16 %v250_v6, %v247_v3  ;;  %v8440_v11 = vpack.c.bf16 %v7020_v10, %v7019_v7  ;;  %v314_v12 = vpop.f32.mrb[11].mxu1 }
  0xf0   :  { %11234 = vst [vmem:[#allocation10_spill] sm:$0xff] %v8432_v5  ;;  %v8444_v13 = vpack.c.bf16 %v314_v12, %v311_v9 }
  0xf1   :  { %11235 = vst [vmem:[#allocation11_spill] sm:$0xff] %v8434_v8  ;;  %1059 = vrot.lane.b32.xlu1 %v8432_v5, %s8109_s1  ;;  %1012 = vrot.lane.b32.xlu0 %v8434_v8, %s8109_s1  ;;  %11236 = vst [vmem:[#allocation12_spill] sm:$0xff] %v8440_v11 }
  0xf2   :  { %7069 = vmatprep.mubr.msk.bf16.mxu0 %vm613_vm5, %v8434_v8  ;;  %11237 = vst [vmem:[#allocation13_spill] sm:$0xff] %v8444_v13 }
  0xf3   :  { %7070 = vmatmul.mubr.msk.bf16.gmra.mrb[24].mxu0 %vm613_vm5, %v8432_v5  ;;  %v7007_v14 = vpop.f32.mrb[12].mxu0 }
  0xf4   :  { %v263_v15 = vpop.f32.mrb[13].mxu0  ;;  %v7023_v19 = vpop.f32.mrb[12].mxu1 }
  0xf5   :  { %v7008_v16 = vpop.f32.mrb[14].mxu0  ;;  %v327_v21 = vpop.f32.mrb[13].mxu1 }
  0xf6   :  { %v8448_v17 = vpack.c.bf16 %v7008_v16, %v7007_v14  ;;  %v266_v18 = vpop.f32.mrb[15].mxu0  ;;  %v7024_v22 = vpop.f32.mrb[14].mxu1 }
  0xf7   :  { %v8450_v20 = vpack.c.bf16 %v266_v18, %v263_v15  ;;  %v8458_v23 = vpack.c.bf16 %v7024_v22, %v7023_v19  ;;  %v330_v24 = vpop.f32.mrb[15].mxu1 }
  0xf8   :  { %11238 = vst [vmem:[#allocation14_spill] sm:$0xff] %v8448_v17  ;;  %1153 = vrot.lane.b32.xlu1 %v8448_v17, %s8109_s1  ;;  %v8460_v25 = vpack.c.bf16 %v330_v24, %v327_v21 }
  0xf9   :  { %11239 = vst [vmem:[#allocation15_spill] sm:$0xff] %v8450_v20  ;;  %1106 = vrot.lane.b32.xlu0 %v8450_v20, %s8109_s1  ;;  %7073 = vmatprep.mubr.msk.bf16.mxu0 %vm613_vm5, %v8450_v20  ;;  %11240 = vst [vmem:[#allocation16_spill] sm:$0xff] %v8458_v23 }
  0xfa   :  { %11241 = vst [vmem:[#allocation17_spill] sm:$0xff] %v8460_v25 }
  0xfb   :  { %7074 = vmatmul.mubr.msk.bf16.gmra.mrb[28].mxu0 %vm613_vm5, %v8448_v17 }
  0xfc   :  { %7077 = vmatprep.mubr.msk.bf16.mxu0 %vm613_vm5, %v8412_v53  ;;  %1247 = vrot.lane.b32.xlu1 %v8408_v51, %s8109_s1  ;;  %v7029_v36 = vpop.f32.mrb[16].mxu1 }
  0xfd   :  { %1200 = vrot.lane.b32.xlu0 %v8412_v53, %s8109_s1  ;;  %v447_v38 = vpop.f32.mrb[17].mxu1 }
  0xfe   :  { %v7030_v40 = vpop.f32.mrb[18].mxu1 }
  0xff   :  { %v8519_v42 = vpack.c.bf16 %v7030_v40, %v7029_v36  ;;  %v450_v43 = vpop.f32.mrb[19].mxu1 }
 0x100   :  { %1341 = vrot.lane.b32.xlu1 %v8424_v63, %s8109_s1  ;;  %v8522_v44 = vpack.c.bf16 %v450_v43, %v447_v38 }
 0x101   :  { %1294 = vrot.lane.b32.xlu0 %v8428_v1, %s8109_s1 }
 0x102   :  { %11242 = vst [vmem:[#allocation18_spill] sm:$0xff] %v8522_v44 }
 0x103   :  { %7078 = vmatmul.mubr.msk.bf16.gmra.mrb[32].mxu0 %vm613_vm5, %v8408_v51 }
 0x104   :  { %7081 = vmatprep.mubr.msk.bf16.mxu0 %vm613_vm5, %v8428_v1  ;;  %1435 = vrot.lane.b32.xlu1 %v8440_v11, %s8109_s1  ;;  %v7033_v49 = vpop.f32.mrb[20].mxu1 }
 0x105   :  { %1388 = vrot.lane.b32.xlu0 %v8444_v13, %s8109_s1  ;;  %v463_v50 = vpop.f32.mrb[21].mxu1 }
 0x106   :  { %v7034_v54 = vpop.f32.mrb[22].mxu1 }
 0x107   :  { %v8535_v56 = vpack.c.bf16 %v7034_v54, %v7033_v49  ;;  %v466_v58 = vpop.f32.mrb[23].mxu1 }
 0x108   :  { %1529 = vrot.lane.b32.xlu1 %v8458_v23, %s8109_s1  ;;  %v8538_v59 = vpack.c.bf16 %v466_v58, %v463_v50 }
 0x109   :  { %1482 = vrot.lane.b32.xlu0 %v8460_v25, %s8109_s1  ;;  %11243 = vst [vmem:[#allocation19_spill] sm:$0xff] %v8535_v56 }
 0x10b   :  { %7082 = vmatmul.mubr.msk.bf16.gmra.mrb[36].mxu0 %vm613_vm5, %v8424_v63 }
 0x10c   :  { %7085 = vmatprep.mubr.msk.bf16.mxu0 %vm613_vm5, %v8444_v13  ;;  %v7037_v0 = vpop.f32.mrb[24].mxu1 }
 0x10d   :  { %v479_v2 = vpop.f32.mrb[25].mxu1 }
 0x10e   :  { %v7038_v4 = vpop.f32.mrb[26].mxu1 }
 0x10f   :  { %v8551_v6 = vpack.c.bf16 %v7038_v4, %v7037_v0  ;;  %v482_v7 = vpop.f32.mrb[27].mxu1 }
 0x110   :  { %v8554_v9 = vpack.c.bf16 %v482_v7, %v479_v2 }
 0x111   :  { %11244 = vst [vmem:[#allocation20_spill] sm:$0xff] %v8551_v6 }
 0x112   :  { %11245 = vst [vmem:[#allocation21_spill] sm:$0xff] %v8554_v9 }
 0x113   :  { %7086 = vmatmul.mubr.msk.bf16.gmra.mrb[40].mxu0 %vm613_vm5, %v8440_v11 }
 0x114   :  { %7089 = vmatprep.mubr.msk.bf16.mxu0 %vm613_vm5, %v8460_v25  ;;  %v7041_v15 = vpop.f32.mrb[28].mxu1 }
 0x115   :  { %v495_v16 = vpop.f32.mrb[29].mxu1 }
 0x116   :  { %v7042_v18 = vpop.f32.mrb[30].mxu1 }
 0x117   :  { %v8567_v21 = vpack.c.bf16 %v7042_v18, %v7041_v15  ;;  %v498_v22 = vpop.f32.mrb[31].mxu1 }
 0x118   :  { %v8569_v24 = vpack.c.bf16 %v498_v22, %v495_v16 }
 0x119   :  { %11246 = vst [vmem:[#allocation22_spill] sm:$0xff] %v8567_v21 }
 0x11a   :  { %11247 = vst [vmem:[#allocation23_spill] sm:$0xff] %v8569_v24 }
 0x11b   :  { %7090 = vmatmul.mubr.msk.bf16.gmra.mrb[44].mxu0 %vm613_vm5, %v8458_v23 }
 0x11c   :  { %7143 = vmatprep.mubr.msk.bf16.mxu0 %vm8108_vm4, %v11113_v41 }
 0x153   :  { %v825_v26 = vpop.permute.xlu0 %824 }
 0x154   :  { %v827_v27 = vsel %vm613_vm5, %v825_v26, 0 }
 0x155   :  { %7094 = vmatpush3.bf16.xpose.msra.mxu1 %v827_v27  ;;  %v7045_v27 = vpop.f32.mrb[32].mxu1 }
 0x156   :  { %7099 = vmatprep.subr.bf16.mxu1 %v11113_v41 }
 0x157   :  { %v872_v28 = vpop.permute.xlu0 %871 }
 0x158   :  { %v874_v29 = vsel %vm613_vm5, %v872_v28, 0  ;;  %v511_v28 = vpop.f32.mrb[33].mxu1 }
 0x15b   :  { %v919_v30 = vpop.permute.xlu1 %918 }
 0x15c   :  { %7096 = vmatmul.mubr.msk.bf16.vlgmr.msra.gmra.mrb[48].mxu1 %vm613_vm5, %v8402_v48  ;;  %v921_v31 = vsel %vm613_vm5, %v919_v30, 0 }
 0x15d   :  { %7100 = vmatpush3.bf16.xpose.msra.mxu1 %v874_v29  ;;  %7101 = vmatprep.mubr.msk.bf16.mxu1 %vm8108_vm4, %v11113_v41  ;;  %v7046_v29 = vpop.f32.mrb[34].mxu1 }
 0x15e   :  { %7105 = vmatprep.subr.bf16.mxu1 %v11113_v41 }
 0x15f   :  { %v966_v33 = vpop.permute.xlu1 %965 }
 0x160   :  { %v968_v35 = vsel %vm613_vm5, %v966_v33, 0 }
 0x163   :  { %v1013_v32 = vpop.permute.xlu0 %1012  ;;  %v1060_v55 = vpop.permute.xlu1 %1059 }
 0x164   :  { %7102 = vmatmul.mubr.msk.bf16.vlgmr.msra.gmra.mrb[52].mxu1 %vm613_vm5, %v8400_v45  ;;  %v1015_v46 = vsel %vm613_vm5, %v1013_v32, 0  ;;  %v1062_v61 = vsel %vm613_vm5, %v1060_v55, 0  ;;  %v514_v32 = vpop.f32.mrb[35].mxu1 }
 0x165   :  { %7106 = vmatpush3.bf16.xpose.msra.mxu1 %v921_v31  ;;  %7107 = vmatprep.mubr.msk.bf16.mxu1 %vm8108_vm4, %v11113_v41  ;;  %v8579_v31 = vpack.c.bf16 %v7046_v29, %v7045_v27  ;;  %v8581_v33 = vpack.c.bf16 %v514_v32, %v511_v28 }
 0x166   :  { %7111 = vmatprep.subr.bf16.mxu1 %v11113_v41 }
 0x167   :  { %11248 = vst [vmem:[#allocation24_spill] sm:$0xff] %v8579_v31  ;;  %11249 = vst [vmem:[#allocation25_spill] sm:$0xff] %v8581_v33 }
 0x16a   :  { %v1154_v19 = vpop.permute.xlu1 %1153 }
 0x16b   :  { %v1107_v34 = vpop.permute.xlu0 %1106  ;;  %v1156_v26 = vsel %vm613_vm5, %v1154_v19, 0 }
 0x16c   :  { %7108 = vmatmul.mubr.msk.bf16.vlgmr.msra.gmra.mrb[56].mxu1 %vm613_vm5, %v8418_v60  ;;  %v1109_v12 = vsel %vm613_vm5, %v1107_v34, 0 }
 0x16d   :  { %7112 = vmatpush3.bf16.xpose.msra.mxu1 %v968_v35  ;;  %7113 = vmatprep.mubr.msk.bf16.mxu1 %vm8108_vm4, %v11113_v41  ;;  %v7049_v35 = vpop.f32.mrb[36].mxu1 }
 0x16e   :  { %7117 = vmatprep.subr.bf16.mxu1 %v11113_v41  ;;  %v1248_v30 = vpop.permute.xlu1 %1247  ;;  %v527_v36 = vpop.f32.mrb[37].mxu1 }
 0x16f   :  { %v1201_v37 = vpop.permute.xlu0 %1200  ;;  %v1250_v34 = vsel %vm613_vm5, %v1248_v30, 0 }
 0x170   :  { %v1203_v39 = vsel %vm613_vm5, %v1201_v37, 0  ;;  %v7050_v37 = vpop.f32.mrb[38].mxu1 }
 0x171   :  { %7142 = vmatpush3.bf16.xpose.msra.mxu0 %v1203_v39  ;;  %v8589_v39 = vpack.c.bf16 %v7050_v37, %v7049_v35  ;;  %v530_v40 = vpop.f32.mrb[39].mxu1 }
 0x172   :  { %7153 = vmatprep.subr.bf16.mxu0 %v11113_v41  ;;  %v1342_v38 = vpop.permute.xlu1 %1341  ;;  %v8591_v43 = vpack.c.bf16 %v530_v40, %v527_v36 }
 0x173   :  { %v1295_v47 = vpop.permute.xlu0 %1294  ;;  %11250 = vst [vmem:[#allocation26_spill] sm:$0xff] %v8589_v39 }
 0x174   :  { %7114 = vmatmul.mubr.msk.bf16.vlgmr.msra.gmra.mrb[60].mxu1 %vm613_vm5, %v8416_v57  ;;  %v1297_v52 = vsel %vm613_vm5, %v1295_v47, 0  ;;  %11251 = vst [vmem:[#allocation27_spill] sm:$0xff] %v8591_v43  ;;  %v7053_v47 = vpop.f32.mrb[40].mxu1 }
 0x175   :  { %7118 = vmatpush3.bf16.xpose.msra.mxu1 %v1015_v46  ;;  %7119 = vmatprep.mubr.msk.bf16.mxu1 %vm8108_vm4, %v11113_v41  ;;  %v1344_v46 = vsel %vm613_vm5, %v1342_v38, 0  ;;  %v543_v49 = vpop.f32.mrb[41].mxu1 }
 0x176   :  { %7123 = vmatprep.subr.bf16.mxu1 %v11113_v41  ;;  %v7054_v50 = vpop.f32.mrb[42].mxu1 }
 0x177   :  { %v1389_v62 = vpop.permute.xlu0 %1388  ;;  %v8599_v54 = vpack.c.bf16 %v7054_v50, %v7053_v47  ;;  %v546_v55 = vpop.f32.mrb[43].mxu1 }
 0x178   :  { %7144 = vmatmul.mubr.msk.bf16.vlgmr.msra.gmra.mrb[48].mxu0 %vm613_vm5, %v8412_v53  ;;  %v1391_v3 = vsel %vm613_vm5, %v1389_v62, 0  ;;  %v8601_v58 = vpack.c.bf16 %v546_v55, %v543_v49  ;;  %v7057_v62 = vpop.f32.mrb[44].mxu1 }
 0x179   :  { %7154 = vmatpush3.bf16.xpose.msra.mxu0 %v1297_v52  ;;  %7155 = vmatprep.mubr.msk.bf16.mxu0 %vm8108_vm4, %v11113_v41  ;;  %v1436_v52 = vpop.permute.xlu1 %1435  ;;  %11252 = vst [vmem:[#allocation28_spill] sm:$0xff] %v8599_v54  ;;  %v559_v2 = vpop.f32.mrb[45].mxu1 }
 0x17a   :  { %7165 = vmatprep.subr.bf16.mxu0 %v11113_v41  ;;  %11253 = vst [vmem:[#allocation29_spill] sm:$0xff] %v8601_v58 }
 0x17b   :  { %v1483_v10 = vpop.permute.xlu0 %1482 }
 0x17c   :  { %7120 = vmatmul.mubr.msk.bf16.vlgmr.msra.gmra.mrb[64].mxu1 %vm613_vm5, %v8434_v8  ;;  %v1485_v14 = vsel %vm613_vm5, %v1483_v10, 0 }
 0x17d   :  { %7124 = vmatpush3.bf16.xpose.msra.mxu1 %v1062_v61  ;;  %7125 = vmatprep.mubr.msk.bf16.mxu1 %vm8108_vm4, %v11113_v41  ;;  %v1438_v61 = vsel %vm613_vm5, %v1436_v52, 0  ;;  %v1530_v0 = vpop.permute.xlu1 %1529 }
 0x17e   :  { %7129 = vmatprep.subr.bf16.mxu1 %v11113_v41  ;;  %v1532_v10 = vsel %vm613_vm5, %v1530_v0, 0 }
 0x180   :  { %7156 = vmatmul.mubr.msk.bf16.vlgmr.msra.gmra.mrb[52].mxu0 %vm613_vm5, %v8428_v1 }
 0x181   :  { %7166 = vmatpush3.bf16.xpose.msra.mxu0 %v1391_v3  ;;  %7167 = vmatprep.mubr.msk.bf16.mxu0 %vm8108_vm4, %v11113_v41  ;;  %v7058_v3 = vpop.f32.mrb[46].mxu1 }
 0x182   :  { %7177 = vmatprep.subr.bf16.mxu0 %v11113_v41  ;;  %v8609_v4 = vpack.c.bf16 %v7058_v3, %v7057_v62  ;;  %v562_v7 = vpop.f32.mrb[47].mxu1 }
 0x184   :  { %7126 = vmatmul.mubr.msk.bf16.vlgmr.msra.gmra.mrb[68].mxu1 %vm613_vm5, %v8432_v5  ;;  %11254 = vst [vmem:[#allocation30_spill] sm:$0xff] %v8609_v4 }
 0x185   :  { %7130 = vmatpush3.bf16.xpose.msra.mxu1 %v1109_v12  ;;  %7131 = vmatprep.mubr.msk.bf16.mxu1 %vm8108_vm4, %v11113_v41  ;;  %v8614_v12 = vpack.c.bf16 %v562_v7, %v559_v2 }
 0x186   :  { %7135 = vmatprep.subr.bf16.mxu1 %v11113_v41 }
 0x187   :  { %11255 = vst [vmem:[#allocation31_spill] sm:$0xff] %v8614_v12 }
 0x188   :  { %7168 = vmatmul.mubr.msk.bf16.vlgmr.msra.gmra.mrb[56].mxu0 %vm613_vm5, %v8444_v13 }
 0x189   :  { %7178 = vmatpush3.bf16.xpose.msra.mxu0 %v1485_v14  ;;  %7179 = vmatprep.mubr.msk.bf16.mxu0 %vm8108_vm4, %v11113_v41 }
 0x18c   :  { %7132 = vmatmul.mubr.msk.bf16.vlgmr.msra.gmra.mrb[72].mxu1 %vm613_vm5, %v8450_v20 }
 0x18d   :  { %7136 = vmatpush3.bf16.xpose.msra.mxu1 %v1156_v26  ;;  %7137 = vmatprep.mubr.msk.bf16.mxu1 %vm8108_vm4, %v11113_v41 }
 0x18e   :  { %7147 = vmatprep.subr.bf16.mxu1 %v11113_v41 }
 0x190   :  { %7180 = vmatmul.mubr.msk.bf16.vlgmr.msra.gmra.mrb[60].mxu0 %vm613_vm5, %v8460_v25 }
 0x194   :  { %7138 = vmatmul.mubr.msk.bf16.vlgmr.msra.gmra.mrb[76].mxu1 %vm613_vm5, %v8448_v17 }
 0x195   :  { %7148 = vmatpush3.bf16.xpose.msra.mxu1 %v1250_v34  ;;  %7149 = vmatprep.mubr.msk.bf16.mxu1 %vm8108_vm4, %v11113_v41 }
 0x196   :  { %7159 = vmatprep.subr.bf16.mxu1 %v11113_v41 }
 0x19c   :  { %7150 = vmatmul.mubr.msk.bf16.vlgmr.msra.gmra.mrb[80].mxu1 %vm613_vm5, %v8408_v51 }
 0x19d   :  { %7160 = vmatpush3.bf16.xpose.msra.mxu1 %v1344_v46  ;;  %7161 = vmatprep.mubr.msk.bf16.mxu1 %vm8108_vm4, %v11113_v41 }
 0x19e   :  { %7171 = vmatprep.subr.bf16.mxu1 %v11113_v41 }
 0x1a4   :  { %7162 = vmatmul.mubr.msk.bf16.vlgmr.msra.gmra.mrb[84].mxu1 %vm613_vm5, %v8424_v63 }
 0x1a5   :  { %7172 = vmatpush3.bf16.xpose.msra.mxu1 %v1438_v61  ;;  %7173 = vmatprep.mubr.msk.bf16.mxu1 %vm8108_vm4, %v11113_v41 }
 0x1a6   :  { %7183 = vmatprep.subr.bf16.mxu1 %v11113_v41 }
 0x1ac   :  { %7174 = vmatmul.mubr.msk.bf16.vlgmr.msra.gmra.mrb[88].mxu1 %vm613_vm5, %v8440_v11 }
 0x1ad   :  { %7184 = vmatpush3.bf16.xpose.msra.mxu1 %v1532_v10  ;;  %7185 = vmatprep.mubr.msk.bf16.mxu1 %vm8108_vm4, %v11113_v41 }
 0x1ae   :  { %7223 = vmatprep.subr.bf16.mxu1 %v11113_v41 }
 0x1b4   :  { %7186 = vmatmul.mubr.msk.bf16.vlgmr.msra.gmra.mrb[92].mxu1 %vm613_vm5, %v8458_v23 }
 0x1b5   :  { %v8621_v14 = vpop.f32.mrb[16].mxu0  ;;  %7224 = vmatpush3.bf16.msra.mxu1 %v8522_v44  ;;  %7225 = vmatprep.mubr.msk.bf16.mxu1 %vm8108_vm4, %v11113_v41 }
 0x1b6   :  { %v8626_v15 = vpop.f32.mrb[17].mxu0  ;;  %v1581_v16 = vsel %vm128_vm1, %v8621_v14, -inf  ;;  %7229 = vmatprep.subr.bf16.mxu1 %v11113_v41 }
 0x1b7   :  { %1582 = vmax.xlane.f32.xlu1 %v1581_v16  ;;  %v8631_v18 = vpop.f32.mrb[18].mxu0  ;;  %v1575_v19 = vsel %vm128_vm1, %v8626_v15, -inf }
 0x1b8   :  { %v8635_v22 = vpop.f32.mrb[19].mxu0  ;;  %1576 = vmax.xlane.f32.xlu0 %v1575_v19  ;;  %v1584_v27 = vsel %vm128_vm1, %v8631_v18, -inf }
 0x1b9   :  { %v1578_v26 = vsel %vm128_vm1, %v8635_v22, -inf }
 0x1bb   :  { %1579 = vmax.xlane.f32.xlu1 %v1578_v26 }
 0x1bc   :  { %1585 = vmax.xlane.f32.xlu0 %v1584_v27 }
 0x1bd   :  { %v8641_v28 = vpop.f32.mrb[20].mxu0 }
 0x1be   :  { %v8643_v29 = vpop.f32.mrb[21].mxu0  ;;  %v1593_v30 = vsel %vm128_vm1, %v8641_v28, -inf }
 0x1bf   :  { %1594 = vmax.xlane.f32.xlu1 %v1593_v30  ;;  %v8647_v32 = vpop.f32.mrb[22].mxu0  ;;  %v1587_v36 = vsel %vm128_vm1, %v8643_v29, -inf }
 0x1c0   :  { %v8649_v34 = vpop.f32.mrb[23].mxu0  ;;  %v1596_v35 = vsel %vm128_vm1, %v8647_v32, -inf }
 0x1c1   :  { %1597 = vmax.xlane.f32.xlu0 %v1596_v35  ;;  %v1590_v37 = vsel %vm128_vm1, %v8649_v34, -inf }
 0x1c3   :  { %1588 = vmax.xlane.f32.xlu1 %v1587_v36 }
 0x1c5   :  { %1591 = vmax.xlane.f32.xlu0 %v1590_v37 }
 0x1c6   :  { %v8657_v38 = vpop.f32.mrb[24].mxu0 }
 0x1c7   :  { %11256 = vst [vmem:[#allocation32_spill] sm:$0xff] %v8657_v38  ;;  %v8659_v40 = vpop.f32.mrb[25].mxu0  ;;  %v1605_v46 = vsel %vm128_vm1, %v8657_v38, -inf }
 0x1c8   :  { %1606 = vmax.xlane.f32.xlu1 %v1605_v46  ;;  %v8663_v47 = vpop.f32.mrb[26].mxu0  ;;  %v1599_v52 = vsel %vm128_vm1, %v8659_v40, -inf }
 0x1c9   :  { %11257 = vst [vmem:[#allocation33_spill] sm:$0xff] %v8663_v47  ;;  %v8665_v49 = vpop.f32.mrb[27].mxu0  ;;  %v1608_v50 = vsel %vm128_vm1, %v8663_v47, -inf }
 0x1ca   :  { %1609 = vmax.xlane.f32.xlu0 %v1608_v50  ;;  %v1602_v55 = vsel %vm128_vm1, %v8665_v49, -inf }
 0x1cc   :  { %1600 = vmax.xlane.f32.xlu1 %v1599_v52 }
 0x1ce   :  { %1603 = vmax.xlane.f32.xlu0 %v1602_v55  ;;  %v8673_v61 = vpop.f32.mrb[28].mxu0 }
 0x1cf   :  { %11258 = vst [vmem:[#allocation34_spill] sm:$0xff] %v8673_v61  ;;  %v8675_v62 = vpop.f32.mrb[29].mxu0  ;;  %v1617_v0 = vsel %vm128_vm1, %v8673_v61, -inf }
 0x1d0   :  { %11259 = vst [vmem:[#allocation35_spill] sm:$0xff] %v8675_v62  ;;  %1618 = vmax.xlane.f32.xlu1 %v1617_v0  ;;  %v8679_v2 = vpop.f32.mrb[30].mxu0  ;;  %v1611_v10 = vsel %vm128_vm1, %v8675_v62, -inf }
 0x1d1   :  { %11260 = vst [vmem:[#allocation36_spill] sm:$0xff] %v8679_v2  ;;  %v8681_v3 = vpop.f32.mrb[31].mxu0  ;;  %v1620_v7 = vsel %vm128_vm1, %v8679_v2, -inf }
 0x1d2   :  { %11261 = vst [vmem:[#allocation37_spill] sm:$0xff] %v8681_v3  ;;  %1621 = vmax.xlane.f32.xlu0 %v1620_v7  ;;  %v1614_v16 = vsel %vm128_vm1, %v8681_v3, -inf }
 0x1d4   :  { %1612 = vmax.xlane.f32.xlu1 %v1611_v10 }
 0x1d6   :  { %1615 = vmax.xlane.f32.xlu0 %v1614_v16  ;;  %v8689_v19 = vpop.f32.mrb[32].mxu0 }
 0x1d7   :  { %11262 = vst [vmem:[#allocation38_spill] sm:$0xff] %v8689_v19  ;;  %v8691_v26 = vpop.f32.mrb[33].mxu0  ;;  %v1629_v27 = vsel %vm128_vm1, %v8689_v19, -inf }
 0x1d8   :  { %1630 = vmax.xlane.f32.xlu1 %v1629_v27  ;;  %v8695_v30 = vpop.f32.mrb[34].mxu0  ;;  %v1623_v37 = vsel %vm128_vm1, %v8691_v26, -inf }
 0x1d9   :  { %11263 = vst [vmem:[#allocation39_spill] sm:$0xff] %v8695_v30  ;;  %v8697_v35 = vpop.f32.mrb[35].mxu0  ;;  %v1632_v36 = vsel %vm128_vm1, %v8695_v30, -inf }
 0x1da   :  { %1633 = vmax.xlane.f32.xlu0 %v1632_v36  ;;  %v1626_v46 = vsel %vm128_vm1, %v8697_v35, -inf }
 0x1dc   :  { %1624 = vmax.xlane.f32.xlu1 %v1623_v37 }
 0x1de   :  { %1627 = vmax.xlane.f32.xlu0 %v1626_v46  ;;  %v8705_v50 = vpop.f32.mrb[36].mxu0 }
 0x1df   :  { %11264 = vst [vmem:[#allocation40_spill] sm:$0xff] %v8705_v50  ;;  %v8707_v52 = vpop.f32.mrb[37].mxu0  ;;  %v1641_v55 = vsel %vm128_vm1, %v8705_v50, -inf }
 0x1e0   :  { %1642 = vmax.xlane.f32.xlu1 %v1641_v55  ;;  %v8711_v0 = vpop.f32.mrb[38].mxu0  ;;  %v1635_v16 = vsel %vm128_vm1, %v8707_v52, -inf }
 0x1e1   :  { %11265 = vst [vmem:[#allocation41_spill] sm:$0xff] %v8711_v0  ;;  %v8713_v7 = vpop.f32.mrb[39].mxu0  ;;  %v1644_v10 = vsel %vm128_vm1, %v8711_v0, -inf }
 0x1e2   :  { %1645 = vmax.xlane.f32.xlu0 %v1644_v10  ;;  %v1638_v27 = vsel %vm128_vm1, %v8713_v7, -inf }
 0x1e4   :  { %1636 = vmax.xlane.f32.xlu1 %v1635_v16 }
 0x1e6   :  { %1639 = vmax.xlane.f32.xlu0 %v1638_v27  ;;  %v8721_v36 = vpop.f32.mrb[40].mxu0 }
 0x1e7   :  { %11266 = vst [vmem:[#allocation42_spill] sm:$0xff] %v8721_v36  ;;  %v8723_v37 = vpop.f32.mrb[41].mxu0  ;;  %v1653_v46 = vsel %vm128_vm1, %v8721_v36, -inf }
 0x1e8   :  { %1654 = vmax.xlane.f32.xlu1 %v1653_v46  ;;  %v8727_v55 = vpop.f32.mrb[42].mxu0  ;;  %v1647_v16 = vsel %vm128_vm1, %v8723_v37, -inf }
 0x1e9   :  { %11267 = vst [vmem:[#allocation43_spill] sm:$0xff] %v8727_v55  ;;  %v8729_v41 = vpop.f32.mrb[43].mxu0 }
 0x1ea   :  { %v1650_v10 = vsel %vm128_vm1, %v8729_v41, -inf }
 0x1eb   :  { %1651 = vmax.xlane.f32.xlu0 %v1650_v10 }
 0x1ec   :  { %1648 = vmax.xlane.f32.xlu1 %v1647_v16 }
 0x1ee   :  { %v8735_v27 = vpop.f32.mrb[44].mxu0 }
 0x1ef   :  { %11268 = vst [vmem:[#allocation44_spill] sm:$0xff] %v8735_v27  ;;  %v8737_v44 = vpop.f32.mrb[45].mxu0 }
 0x1f0   :  { %11269 = vst [vmem:[#allocation45_spill] sm:$0xff] %v8737_v44  ;;  %v8739_v23 = vpop.f32.mrb[46].mxu0 }
 0x1f1   :  { %11270 = vst [vmem:[#allocation46_spill] sm:$0xff] %v8739_v23  ;;  %v8741_v25 = vpop.f32.mrb[47].mxu0 }
 0x1f2   :  { %11271 = vst [vmem:[#allocation47_spill] sm:$0xff] %v8741_v25 }
 0x22f   :  { %v8743_v46 = vpop.f32.mrb[48].mxu1 }
 0x230   :  { %v7097_v53 = vpop.f32.mrb[49].mxu1  ;;  %v1671_v11 = vsel %vm613_vm5, %v8743_v46, -inf }
 0x231   :  { %v8747_v13 = vpop.f32.mrb[50].mxu1  ;;  %1672 = vmax.xlane.f32.xlu0 %v1671_v11 }
 0x232   :  { %v7098_v10 = vpop.f32.mrb[51].mxu1  ;;  %v1674_v16 = vsel %vm613_vm5, %v8747_v13, -inf }
 0x235   :  { %1675 = vmax.xlane.f32.xlu0 %v1674_v16 }
 0x237   :  { %v8751_v63 = vpop.f32.mrb[52].mxu1 }
 0x238   :  { %v7103_v1 = vpop.f32.mrb[53].mxu1 }
 0x239   :  { %v8753_v51 = vpop.f32.mrb[54].mxu1 }
 0x23a   :  { %v7104_v12 = vpop.f32.mrb[55].mxu1 }
 0x23f   :  { %v8755_v58 = vpop.f32.mrb[56].mxu1 }
 0x240   :  { %v7109_v53 = vpop.f32.mrb[57].mxu1 }
 0x241   :  { %v8757_v4 = vpop.f32.mrb[58].mxu1 }
 0x242   :  { %v7110_v43 = vpop.f32.mrb[59].mxu1 }
 0x247   :  { %v8759_v54 = vpop.f32.mrb[60].mxu1 }
 0x248   :  { %v7115_v11 = vpop.f32.mrb[61].mxu1 }
 0x249   :  { %v8761_v10 = vpop.f32.mrb[62].mxu1 }
 0x24a   :  { %v7116_v39 = vpop.f32.mrb[63].mxu1 }
 0x24b   :  { %v8763_v31 = vpop.f32.mrb[48].mxu0  ;;  %v1677_v39 = vsel %vm613_vm5, %v8751_v63, -inf }
 0x24c   :  { %v7145_v16 = vpop.f32.mrb[49].mxu0  ;;  %v1719_v1 = vsel %vm613_vm5, %v8763_v31, -inf }
 0x24d   :  { %1720 = vmax.xlane.f32.xlu1 %v1719_v1  ;;  %v8767_v12 = vpop.f32.mrb[50].mxu0  ;;  %v1680_v1 = vsel %vm613_vm5, %v8753_v51, -inf }
 0x24e   :  { %v7146_v21 = vpop.f32.mrb[51].mxu0  ;;  %v1722_v53 = vsel %vm613_vm5, %v8767_v12, -inf }
 0x24f   :  { %v8771_v43 = vpop.f32.mrb[64].mxu1  ;;  %1723 = vmax.xlane.f32.xlu0 %v1722_v53 }
 0x250   :  { %v7121_v11 = vpop.f32.mrb[65].mxu1  ;;  %v1695_v56 = vsel %vm613_vm5, %v8771_v43, -inf }
 0x251   :  { %v8775_v24 = vpop.f32.mrb[66].mxu1  ;;  %1678 = vmax.xlane.f32.xlu1 %v1677_v39 }
 0x252   :  { %v7122_v16 = vpop.f32.mrb[67].mxu1  ;;  %v1698_v3 = vsel %vm613_vm5, %v8775_v24, -inf }
 0x253   :  { %1681 = vmax.xlane.f32.xlu0 %v1680_v1  ;;  %v8779_v36 = vpop.f32.mrb[52].mxu0  ;;  %v1683_v16 = vsel %vm613_vm5, %v8755_v58, -inf }
 0x254   :  { %v7157_v21 = vpop.f32.mrb[53].mxu0  ;;  %v1731_v0 = vsel %vm613_vm5, %v8779_v36, -inf }
 0x255   :  { %1732 = vmax.xlane.f32.xlu1 %v1731_v0  ;;  %v8783_v53 = vpop.f32.mrb[54].mxu0  ;;  %v1686_v0 = vsel %vm613_vm5, %v8757_v4, -inf }
 0x256   :  { %v7158_v11 = vpop.f32.mrb[55].mxu0  ;;  %v1734_v6 = vsel %vm613_vm5, %v8783_v53, -inf }
 0x257   :  { %v8787_v50 = vpop.f32.mrb[68].mxu1  ;;  %1735 = vmax.xlane.f32.xlu0 %v1734_v6 }
 0x258   :  { %11272 = vst [vmem:[#allocation48_spill] sm:$0xff] %v8787_v50  ;;  %v7127_v39 = vpop.f32.mrb[69].mxu1 }
 0x259   :  { %v8791_v1 = vpop.f32.mrb[70].mxu1  ;;  %1684 = vmax.xlane.f32.xlu1 %v1683_v16 }
 0x25a   :  { %11273 = vst [vmem:[#allocation49_spill] sm:$0xff] %v8791_v1  ;;  %v7128_v21 = vpop.f32.mrb[71].mxu1 }
 0x25b   :  { %1687 = vmax.xlane.f32.xlu0 %v1686_v0  ;;  %v8795_v30 = vpop.f32.mrb[56].mxu0  ;;  %v1689_v21 = vsel %vm613_vm5, %v8759_v54, -inf }
 0x25c   :  { %v7169_v11 = vpop.f32.mrb[57].mxu0  ;;  %v1743_v9 = vsel %vm613_vm5, %v8795_v30, -inf }
 0x25d   :  { %1744 = vmax.xlane.f32.xlu1 %v1743_v9  ;;  %v8799_v6 = vpop.f32.mrb[58].mxu0  ;;  %v1692_v9 = vsel %vm613_vm5, %v8761_v10, -inf }
 0x25e   :  { %v7170_v39 = vpop.f32.mrb[59].mxu0  ;;  %v1746_v19 = vsel %vm613_vm5, %v8799_v6, -inf }
 0x25f   :  { %v8803_v2 = vpop.f32.mrb[72].mxu1  ;;  %1747 = vmax.xlane.f32.xlu0 %v1746_v19 }
 0x260   :  { %11274 = vst [vmem:[#allocation50_spill] sm:$0xff] %v8803_v2  ;;  %v7133_v16 = vpop.f32.mrb[73].mxu1 }
 0x261   :  { %v8807_v0 = vpop.f32.mrb[74].mxu1  ;;  %1690 = vmax.xlane.f32.xlu1 %v1689_v21 }
 0x262   :  { %11275 = vst [vmem:[#allocation51_spill] sm:$0xff] %v8807_v0  ;;  %v7134_v11 = vpop.f32.mrb[75].mxu1  ;;  %v1710_v47 = vsel %vm613_vm5, %v8807_v0, -inf }
 0x263   :  { %1693 = vmax.xlane.f32.xlu0 %v1692_v9  ;;  %v8811_v61 = vpop.f32.mrb[60].mxu0  ;;  %v1701_v11 = vsel %vm613_vm5, %v8787_v50, -inf }
 0x264   :  { %11276 = vst [vmem:[#allocation52_spill] sm:$0xff] %v8811_v61  ;;  %v7181_v39 = vpop.f32.mrb[61].mxu0 }
 0x265   :  { %1696 = vmax.xlane.f32.xlu1 %v1695_v56  ;;  %v8815_v19 = vpop.f32.mrb[62].mxu0  ;;  %v1704_v56 = vsel %vm613_vm5, %v8791_v1, -inf }
 0x266   :  { %11277 = vst [vmem:[#allocation53_spill] sm:$0xff] %v8815_v19  ;;  %v7182_v16 = vpop.f32.mrb[63].mxu0 }
 0x267   :  { %v8819_v62 = vpop.f32.mrb[76].mxu1  ;;  %1699 = vmax.xlane.f32.xlu0 %v1698_v3  ;;  %v1707_v16 = vsel %vm613_vm5, %v8803_v2, -inf  ;;  %v596_v3 = vld [vmem:[%s11109_s7] sm:$0xf] }
 0x268   :  { %11278 = vst [vmem:[#allocation54_spill] sm:$0xff] %v8819_v62  ;;  %v7139_v21 = vpop.f32.mrb[77].mxu1  ;;  %v1713_v1 = vsel %vm613_vm5, %v8819_v62, -inf }
 0x269   :  { %v8823_v9 = vpop.f32.mrb[78].mxu1  ;;  %1702 = vmax.xlane.f32.xlu1 %v1701_v11  ;;  %v598_v11 = vpack.c.bf16 %v596_v3, %v596_v3  ;;  %v11282_v3 = vmov 0.0  }
 0x26a   :  { %11279 = vst [vmem:[#allocation55_spill] sm:$0xff] %v8823_v9  ;;  %v7140_v39 = vpop.f32.mrb[79].mxu1  ;;  %v1716_v2 = vsel %vm613_vm5, %v8823_v9, -inf }
 0x26b   :  { %1705 = vmax.xlane.f32.xlu0 %v1704_v56  ;;  %7716 = vmatprep.subr.msk.bf16.mxu0 %vm177_vm0, %v598_v11  ;;  %v2280_v50 = vsel %vm177_vm0, %v598_v11, 0 }
 0x26c   :  { %7190 = vmatpush3.bf16.msra.mxu0 %v2280_v50 }
 0x26d   :  { %1708 = vmax.xlane.f32.xlu1 %v1707_v16  ;;  %v8841_v16 = vpop.xlane.xlu0 %1576  ;;  %7271 = vmatprep.subr.bf16.mxu0 %v11282_v3 }
 0x26f   :  { %v8834_v21 = vpop.f32.mrb[80].mxu1  ;;  %1711 = vmax.xlane.f32.xlu0 %v1710_v47  ;;  %v1659_v47 = vsel %vm128_vm1, %v8737_v44, -inf }
 0x270   :  { %11280 = vst [vmem:[#allocation56_spill] sm:$0xff] %v8834_v21  ;;  %v7151_v39 = vpop.f32.mrb[81].mxu1  ;;  %v1725_v11 = vsel %vm613_vm5, %v8834_v21, -inf }
 0x271   :  { %v8838_v56 = vpop.f32.mrb[82].mxu1  ;;  %1714 = vmax.xlane.f32.xlu1 %v1713_v1  ;;  %v1656_v1 = vsel %vm128_vm1, %v8727_v55, -inf }
 0x272   :  { %11281 = vst [vmem:[#allocation57_spill] sm:$0xff] %v8838_v56  ;;  %v7152_v0 = vpop.f32.mrb[83].mxu1  ;;  %v1728_v44 = vsel %vm613_vm5, %v8838_v56, -inf }
 0x273   :  { %1717 = vmax.xlane.f32.xlu0 %v1716_v2  ;;  %v8853_v0 = vpop.xlane.xlu0 %1585 }
 0x275   :  { %1660 = vmax.xlane.f32.xlu1 %v1659_v47  ;;  %v1755_v47 = vsel %vm613_vm5, %v8811_v61, -inf }
 0x277   :  { %v8851_v39 = vpop.f32.mrb[84].mxu1  ;;  %1657 = vmax.xlane.f32.xlu0 %v1656_v1  ;;  %v8863_v55 = vpop.xlane.xlu0 %1597 }
 0x278   :  { %11283 = vst [vmem:[#allocation58_spill] sm:$0xff] %v8851_v39  ;;  %v7163_v62 = vpop.f32.mrb[85].mxu1 }
 0x279   :  { %v8857_v2 = vpop.f32.mrb[86].mxu1  ;;  %1726 = vmax.xlane.f32.xlu1 %v1725_v11  ;;  %v1662_v62 = vsel %vm128_vm1, %v8741_v25, -inf  ;;  %v1737_v11 = vsel %vm613_vm5, %v8851_v39, -inf  ;;  %v1665_v25 = vsel %vm128_vm1, %v8735_v27, -inf  ;;  %v8883_v39 = vpop.xlane.xlu1 %1582 }
 0x27a   :  { %11284 = vst [vmem:[#allocation59_spill] sm:$0xff] %v8857_v2  ;;  %v7164_v50 = vpop.f32.mrb[87].mxu1  ;;  %v1740_v61 = vsel %vm613_vm5, %v8857_v2, -inf }
 0x27b   :  { %1729 = vmax.xlane.f32.xlu0 %v1728_v44 }
 0x27d   :  { %1756 = vmax.xlane.f32.xlu1 %v1755_v47  ;;  %v8875_v47 = vpop.xlane.xlu0 %1591 }
 0x27f   :  { %v8867_v1 = vpop.f32.mrb[88].mxu1  ;;  %1663 = vmax.xlane.f32.xlu0 %v1662_v62 }
 0x280   :  { %11285 = vst [vmem:[#allocation60_spill] sm:$0xff] %v8867_v1  ;;  %v7175_v21 = vpop.f32.mrb[89].mxu1 }
 0x281   :  { %v8871_v50 = vpop.f32.mrb[90].mxu1  ;;  %1738 = vmax.xlane.f32.xlu1 %v1737_v11  ;;  %v1758_v21 = vsel %vm613_vm5, %v8815_v19, -inf }
 0x282   :  { %11286 = vst [vmem:[#allocation61_spill] sm:$0xff] %v8871_v50  ;;  %v7176_v44 = vpop.f32.mrb[91].mxu1 }
 0x283   :  { %1741 = vmax.xlane.f32.xlu0 %v1740_v61  ;;  %v1749_v44 = vsel %vm613_vm5, %v8867_v1, -inf  ;;  %v8889_v61 = vpop.xlane.xlu0 %1609 }
 0x284   :  { %11289 = vst [vmem:[#allocation64_spill] sm:$0xff] %v8889_v61 }
 0x285   :  { %1666 = vmax.xlane.f32.xlu1 %v1665_v25  ;;  %v1752_v25 = vsel %vm613_vm5, %v8871_v50, -inf }
 0x287   :  { %v8881_v62 = vpop.f32.mrb[92].mxu1  ;;  %1759 = vmax.xlane.f32.xlu0 %v1758_v21  ;;  %v1580_v21 = vpop.xlane.xlu1 %1579 }
 0x288   :  { %11287 = vst [vmem:[#allocation62_spill] sm:$0xff] %v8881_v62  ;;  %v7187_v11 = vpop.f32.mrb[93].mxu1  ;;  %v1761_v27 = vsel %vm613_vm5, %v8881_v62, -inf  ;;  %v8897_v1 = vpop.xlane.xlu0 %1603 }
 0x289   :  { %v8887_v2 = vpop.f32.mrb[94].mxu1  ;;  %1750 = vmax.xlane.f32.xlu1 %v1749_v44  ;;  %v1668_v11 = vsel %vm128_vm1, %v8739_v23, -inf }
 0x28a   :  { %11288 = vst [vmem:[#allocation63_spill] sm:$0xff] %v8887_v2  ;;  %v7188_v56 = vpop.f32.mrb[95].mxu1  ;;  %v1764_v44 = vsel %vm613_vm5, %v8887_v2, -inf }
 0x28b   :  { %1753 = vmax.xlane.f32.xlu0 %v1752_v25  ;;  %v8901_v56 = vpop.xlane.xlu1 %1594 }
 0x28c   :  { %v8903_v19 = vpop.xlane.xlu0 %1621 }
 0x28d   :  { %1762 = vmax.xlane.f32.xlu1 %v1761_v27  ;;  %11290 = vst [vmem:[#allocation65_spill] sm:$0xff] %v8903_v19 }
 0x28f   :  { %1669 = vmax.xlane.f32.xlu0 %v1668_v11  ;;  %v8905_v25 = vpop.xlane.xlu1 %1588 }
 0x290   :  { %v8907_v50 = vpop.xlane.xlu0 %1615 }
 0x291   :  { %11291 = vst [vmem:[#allocation66_spill] sm:$0xff] %v8907_v50 }
 0x293   :  { %1765 = vmax.xlane.f32.xlu0 %v1764_v44  ;;  %v8911_v27 = vpop.xlane.xlu1 %1606 }
 0x294   :  { %v8913_v11 = vpop.xlane.xlu0 %1633 }
 0x295   :  { %11292 = vst [vmem:[#allocation67_spill] sm:$0xff] %v8913_v11 }
 0x297   :  { %v8917_v44 = vpop.xlane.xlu1 %1600 }
 0x298   :  { %v1628_v2 = vpop.xlane.xlu0 %1627 }
 0x29c   :  { %v8929_v23 = vpop.xlane.xlu0 %1645 }
 0x29d   :  { %11294 = vst [vmem:[#allocation69_spill] sm:$0xff] %v8929_v23 }
 0x29e   :  { %3516 = vrot.lane.b32.xlu1 %v8402_v48, %s8110_s21  ;;  %v8925_v48 = vpop.xlane.xlu1 %1618 }
 0x29f   :  { %11293 = vst [vmem:[#allocation68_spill] sm:$0xff] %v8925_v48 }
 0x2a2   :  { %3518 = vrot.lane.b32.xlu1 %v8400_v45, %s8110_s21  ;;  %v8937_v45 = vpop.xlane.xlu0 %1639 }
 0x2a6   :  { %3522 = vrot.lane.b32.xlu1 %v8416_v57, %s8110_s21  ;;  %v8935_v57 = vpop.xlane.xlu1 %1612 }
 0x2a7   :  { %11295 = vst [vmem:[#allocation70_spill] sm:$0xff] %v8935_v57 }
 0x2a9   :  { %3520 = vrot.lane.b32.xlu0 %v8418_v60, %s8110_s21 }
 0x2aa   :  { %3526 = vrot.lane.b32.xlu1 %v8432_v5, %s8110_s21  ;;  %v8939_v60 = vpop.xlane.xlu1 %1630  ;;  %v8941_v5 = vpop.xlane.xlu0 %1651 }
 0x2ab   :  { %11296 = vst [vmem:[#allocation71_spill] sm:$0xff] %v8939_v60 }
 0x2ad   :  { %3524 = vrot.lane.b32.xlu0 %v8434_v8, %s8110_s21 }
 0x2ae   :  { %3530 = vrot.lane.b32.xlu1 %v8448_v17, %s8110_s21  ;;  %v1625_v62 = vpop.xlane.xlu1 %1624 }
 0x2b1   :  { %3528 = vrot.lane.b32.xlu0 %v8450_v20, %s8110_s21 }
 0x2b2   :  { %v8946_v20 = vpop.xlane.xlu1 %1642 }
 0x2be   :  { %v1673_v11 = vpop.xlane.xlu0 %1672 }
 0x2bf   :  { %v1767_v8 = vmax.f32 %v8841_v16, %v1673_v11  ;;  %v1637_v16 = vpop.xlane.xlu1 %1636 }
 0x2c1   :  { %v1799_v23 = vsub.f32 %v8626_v15, %v1767_v8  ;;  %v1895_v9 = vsub.f32 %v8743_v46, %v1767_v8 }
 0x2c2   :  { %v1676_v17 = vpop.xlane.xlu0 %1675 }
 0x2c3   :  { %v1831_v19 = vmul.f32 1.442695, %v1799_v23  ;;  %v1768_v48 = vmax.f32 %v1580_v21, %v1676_v17  ;;  %v1927_v50 = vmul.f32 1.442695, %v1895_v9  ;;  %v8950_v11 = vpop.xlane.xlu1 %1654 }
 0x2c5   :  { %7723 = vpow2.f32 %v1831_v19  ;;  %v1800_v57 = vsub.f32 %v8635_v22, %v1768_v48  ;;  %v1896_v60 = vsub.f32 %v8747_v13, %v1768_v48 }
 0x2c6   :  { %7725 = vpow2.f32 %v1927_v50 }
 0x2c7   :  { %v1833_v38 = vmul.f32 1.442695, %v1800_v57  ;;  %v1929_v61 = vmul.f32 1.442695, %v1896_v60  ;;  %v8955_v60 = vpop.xlane.xlu1 %1648 }
 0x2c9   :  { %7727 = vpow2.f32 %v1833_v38 }
 0x2ca   :  { %7729 = vpow2.f32 %v1929_v61 }
 0x2cf   :  { %v7724_v15 = vpop.eup %7723 }
 0x2d0   :  { %v1991_v8 = vsel %vm128_vm1, %v7724_v15, 0.0  ;;  %v7726_v17 = vpop.eup %7725 }
 0x2d1   :  { %v2087_v57 = vsel %vm613_vm5, %v7726_v17, 0.0 }
 0x2d2   :  { %1992 = vadd.xlane.f32.xlu1 %v1991_v8 }
 0x2d3   :  { %v7728_v23 = vpop.eup %7727 }
 0x2d4   :  { %v7730_v46 = vpop.eup %7729  ;;  %v1994_v19 = vsel %vm128_vm1, %v7728_v23, 0.0  ;;  %v2215_v22 = vpack.c.bf16 %v7728_v23, %v7724_v15 }
 0x2d5   :  { %1995 = vadd.xlane.f32.xlu0 %v1994_v19  ;;  %v2443_v48 = vpack.c.bf16 %v7730_v46, %v7726_v17  ;;  %v2090_v13 = vsel %vm613_vm5, %v7730_v46, 0.0 }
 0x2d6   :  { %7191 = vmatprep.mubr.msk.bf16.mxu0 %vm128_vm1, %v2215_v22  ;;  %2088 = vadd.xlane.f32.xlu1 %v2087_v57 }
 0x2d7   :  { %7226 = vmatmul.mubr.msk.bf16.vlgmr.msra.gmra.mrb[96].mxu1 %vm613_vm5, %v2443_v48 }
 0x2d8   :  { %7230 = vmatpush3.bf16.msra.mxu1 %v8519_v42  ;;  %7231 = vmatprep.mubr.msk.bf16.mxu1 %vm8108_vm4, %v11282_v3 }
 0x2d9   :  { %2091 = vadd.xlane.f32.xlu0 %v2090_v13  ;;  %7235 = vmatprep.subr.bf16.mxu1 %v11282_v3 }
 0x2da   :  { %v1721_v38 = vpop.xlane.xlu1 %1720 }
 0x2db   :  { %v1783_v9 = vmax.f32 %v1625_v62, %v1721_v38 }
 0x2dc   :  { %v1724_v50 = vpop.xlane.xlu0 %1723 }
 0x2dd   :  { %v1815_v61 = vsub.f32 %v8691_v26, %v1783_v9  ;;  %v1911_v21 = vsub.f32 %v8763_v31, %v1783_v9  ;;  %v1784_v15 = vmax.f32 %v1628_v2, %v1724_v50 }
 0x2de   :  { %v1679_v8 = vpop.xlane.xlu1 %1678 }
 0x2df   :  { %v1863_v17 = vmul.f32 1.442695, %v1815_v61  ;;  %v1959_v23 = vmul.f32 1.442695, %v1911_v21  ;;  %v1816_v19 = vsub.f32 %v8697_v35, %v1784_v15  ;;  %v1912_v46 = vsub.f32 %v8767_v12, %v1784_v15 }
 0x2e0   :  { %v1769_v22 = vmax.f32 %v8883_v39, %v1679_v8  ;;  %v1682_v48 = vpop.xlane.xlu0 %1681 }
 0x2e1   :  { %7731 = vpow2.f32 %v1863_v17  ;;  %v1865_v57 = vmul.f32 1.442695, %v1816_v19  ;;  %v1961_v13 = vmul.f32 1.442695, %v1912_v46  ;;  %v1770_v62 = vmax.f32 %v8853_v0, %v1682_v48 }
 0x2e2   :  { %7733 = vpow2.f32 %v1959_v23  ;;  %v1801_v26 = vsub.f32 %v8621_v14, %v1769_v22  ;;  %v1897_v31 = vsub.f32 %v8751_v63, %v1769_v22  ;;  %v1733_v2 = vpop.xlane.xlu1 %1732 }
 0x2e3   :  { %7735 = vpow2.f32 %v1865_v57  ;;  %v1802_v38 = vsub.f32 %v8631_v18, %v1770_v62  ;;  %v1898_v35 = vsub.f32 %v8753_v51, %v1770_v62  ;;  %v1787_v12 = vmax.f32 %v1637_v16, %v1733_v2 }
 0x2e4   :  { %7737 = vpow2.f32 %v1961_v13  ;;  %v1835_v39 = vmul.f32 1.442695, %v1801_v26  ;;  %v1931_v9 = vmul.f32 1.442695, %v1897_v31  ;;  %v1736_v50 = vpop.xlane.xlu0 %1735 }
 0x2e5   :  { %v1837_v61 = vmul.f32 1.442695, %v1802_v38  ;;  %v1933_v21 = vmul.f32 1.442695, %v1898_v35  ;;  %v1819_v0 = vsub.f32 %v8707_v52, %v1787_v12  ;;  %v1915_v15 = vsub.f32 %v8779_v36, %v1787_v12 }
 0x2e6   :  { %7739 = vpow2.f32 %v1835_v39  ;;  %v1788_v63 = vmax.f32 %v8937_v45, %v1736_v50  ;;  %v1685_v14 = vpop.xlane.xlu1 %1684 }
 0x2e7   :  { %7741 = vpow2.f32 %v1931_v9  ;;  %v1871_v8 = vmul.f32 1.442695, %v1819_v0  ;;  %v1967_v18 = vmul.f32 1.442695, %v1915_v15  ;;  %v1771_v51 = vmax.f32 %v8905_v25, %v1685_v14 }
 0x2e8   :  { %7743 = vpow2.f32 %v1837_v61  ;;  %v1820_v16 = vsub.f32 %v8713_v7, %v1788_v63  ;;  %v1916_v17 = vsub.f32 %v8783_v53, %v1788_v63  ;;  %v1688_v23 = vpop.xlane.xlu0 %1687 }
 0x2e9   :  { %7745 = vpow2.f32 %v1933_v21  ;;  %v1803_v52 = vsub.f32 %v8643_v29, %v1771_v51  ;;  %v1899_v36 = vsub.f32 %v8755_v58, %v1771_v51  ;;  %v1772_v19 = vmax.f32 %v8875_v47, %v1688_v23 }
 0x2ea   :  { %7747 = vpow2.f32 %v1871_v8  ;;  %v1873_v45 = vmul.f32 1.442695, %v1820_v16  ;;  %v1969_v46 = vmul.f32 1.442695, %v1916_v17  ;;  %v1745_v22 = vpop.xlane.xlu1 %1744 }
 0x2eb   :  { %v8983_v48 = vpop.eup %7731  ;;  %7749 = vpow2.f32 %v1967_v18  ;;  %v1839_v25 = vmul.f32 1.442695, %v1803_v52  ;;  %v1935_v57 = vmul.f32 1.442695, %v1899_v36  ;;  %v1804_v7 = vsub.f32 %v8649_v34, %v1772_v19 }
 0x2ec   :  { %v8986_v53 = vpop.eup %7733  ;;  %7751 = vpow2.f32 %v1873_v45  ;;  %v1900_v29 = vsub.f32 %v8757_v4, %v1772_v19  ;;  %v1791_v58 = vmax.f32 %v8955_v60, %v1745_v22  ;;  %v1748_v13 = vpop.xlane.xlu0 %1747  ;;  %v2039_v47 = vsel %vm128_vm1, %v8983_v48, 0.0 }
 0x2ed   :  { %v8992_v62 = vpop.eup %7735  ;;  %7753 = vpow2.f32 %v1969_v46  ;;  %v1841_v26 = vmul.f32 1.442695, %v1804_v7  ;;  %v8995_v31 = vmax.f32 %v8941_v5, %v1748_v13  ;;  %2040 = vadd.xlane.f32.xlu1 %v2039_v47  ;;  %v2135_v5 = vsel %vm613_vm5, %v8986_v53, 0.0 }
 0x2ee   :  { %v8997_v34 = vpop.eup %7737  ;;  %7755 = vpow2.f32 %v1839_v25  ;;  %v1937_v2 = vmul.f32 1.442695, %v1900_v29  ;;  %v1823_v4 = vsub.f32 %v8723_v37, %v1791_v58  ;;  %v1919_v60 = vsub.f32 %v8795_v30, %v1791_v58  ;;  %v1691_v38 = vpop.xlane.xlu1 %1690 }
 0x2ef   :  { %v2451_v35 = vpack.c.bf16 %v8997_v34, %v8986_v53  ;;  %7757 = vpow2.f32 %v1935_v57  ;;  %v1824_v12 = vsub.f32 %v8729_v41, %v8995_v31  ;;  %v1773_v61 = vmax.f32 %v8901_v56, %v1691_v38 }
 0x2f0   :  { %v7740_v39 = vpop.eup %7739  ;;  %7759 = vpow2.f32 %v1841_v26  ;;  %v1879_v9 = vmul.f32 1.442695, %v1823_v4  ;;  %v1975_v50 = vmul.f32 1.442695, %v1919_v60  ;;  %v1694_v37 = vpop.xlane.xlu0 %1693  ;;  %v2042_v0 = vsel %vm128_vm1, %v8992_v62, 0.0  ;;  %v11297_v60 = vld [vmem:[#allocation64_spill] sm:$0xff] }
 0x2f1   :  { %v7742_v21 = vpop.eup %7741  ;;  %7761 = vpow2.f32 %v1937_v2  ;;  %v1881_v30 = vmul.f32 1.442695, %v1824_v12  ;;  %2136 = vadd.xlane.f32.xlu1 %v2135_v5  ;;  %v1805_v41 = vsub.f32 %v8641_v28, %v1773_v61  ;;  %v1901_v63 = vsub.f32 %v8759_v54, %v1773_v61  ;;  %2043 = vadd.xlane.f32.xlu0 %v2042_v0  ;;  %v11299_v61 = vld [vmem:[#allocation48_spill] sm:$0xff] }
 0x2f2   :  { %v9010_v15 = vpop.eup %7743  ;;  %7763 = vpow2.f32 %v1879_v9  ;;  %v1774_v14 = vmax.f32 %v8863_v55, %v1694_v37  ;;  %v1697_v8 = vpop.xlane.xlu1 %1696  ;;  %v1920_v18 = vsub.f32 %v8799_v6, %v8995_v31  ;;  %v2138_v55 = vsel %vm613_vm5, %v8997_v34, 0.0  ;;  %v11316_v6 = vld [vmem:[#allocation38_spill] sm:$0xff] }
 0x2f3   :  { %v9015_v56 = vpop.eup %7745  ;;  %7765 = vpow2.f32 %v1975_v50  ;;  %v1775_v51 = vmax.f32 %v8917_v44, %v1697_v8  ;;  %v2216_v16 = vpack.c.bf16 %v9010_v15, %v7740_v39  ;;  %v1843_v23 = vmul.f32 1.442695, %v1805_v41 }
 0x2f4   :  { %v9021_v17 = vpop.eup %7747  ;;  %v1939_v28 = vmul.f32 1.442695, %v1901_v63  ;;  %v1806_v54 = vsub.f32 %v8647_v32, %v1774_v14  ;;  %v1700_v52 = vpop.xlane.xlu0 %1699  ;;  %7767 = vpow2.f32 %v1881_v30  ;;  %v1902_v19 = vsub.f32 %v8761_v10, %v1774_v14  ;;  %v11300_v30 = vld [vmem:[#allocation33_spill] sm:$0xff]  ;;  %v11302_v14 = vld [vmem:[#allocation70_spill] sm:$0xff] }
 0x2f5   :  { %v9026_v36 = vpop.eup %7749  ;;  %v1807_v45 = vsub.f32 %v8659_v40, %v1775_v51  ;;  %v1903_v44 = vsub.f32 %v8771_v43, %v1775_v51  ;;  %7192 = vmatmul.mubr.msk.bf16.vlgmr.msra.gmra.mrb[64].mxu0 %vm128_vm1, %v2216_v16  ;;  %7769 = vpow2.f32 %v1843_v23  ;;  %2139 = vadd.xlane.f32.xlu0 %v2138_v55  ;;  %v2444_v32 = vpack.c.bf16 %v9015_v56, %v7742_v21  ;;  %v11301_v63 = vld [vmem:[#allocation49_spill] sm:$0xff] }
 0x2f6   :  { %v9032_v46 = vpop.eup %7751  ;;  %v1845_v22 = vmul.f32 1.442695, %v1806_v54  ;;  %7272 = vmatpush3.bf16.msra.mxu0 %v8581_v33  ;;  %v1776_v25 = vmax.f32 %v8897_v1, %v1700_v52  ;;  %v1703_v57 = vpop.xlane.xlu1 %1702  ;;  %7771 = vpow2.f32 %v1939_v28  ;;  %v1941_v40 = vmul.f32 1.442695, %v1902_v19  ;;  %v11303_v19 = vld [vmem:[#allocation35_spill] sm:$0xff] }
 0x2f7   :  { %v9037_v7 = vpop.eup %7753  ;;  %v1847_v10 = vmul.f32 1.442695, %v1807_v45  ;;  %v1943_v43 = vmul.f32 1.442695, %v1903_v44  ;;  %7283 = vmatprep.subr.bf16.mxu0 %v11282_v3  ;;  %7232 = vmatmul.mubr.msk.bf16.vlgmr.msra.gmra.mrb[100].mxu1 %vm613_vm5, %v2444_v32  ;;  %v1997_v1 = vsel %vm128_vm1, %v7740_v39, 0.0  ;;  %v1777_v2 = vmax.f32 %v8911_v27, %v1703_v57  ;;  %v11298_v27 = vld [vmem:[#allocation32_spill] sm:$0xff] }
 0x2f8   :  { %v9040_v29 = vpop.eup %7755  ;;  %7773 = vpow2.f32 %v1845_v22  ;;  %v1808_v58 = vsub.f32 %v8665_v49, %v1776_v25  ;;  %v1904_v13 = vsub.f32 %v8775_v24, %v1776_v25  ;;  %v1706_v47 = vpop.xlane.xlu0 %1705  ;;  %7236 = vmatpush3.bf16.msra.mxu1 %v8538_v59  ;;  %1998 = vadd.xlane.f32.xlu1 %v1997_v1  ;;  %v2051_v4 = vsel %vm128_vm1, %v9021_v17, 0.0  ;;  %v11304_v44 = vld [vmem:[#allocation50_spill] sm:$0xff] }
 0x2f9   :  { %v9046_v26 = vpop.eup %7757  ;;  %7775 = vpow2.f32 %v1941_v40  ;;  %v1778_v38 = vmax.f32 %v11297_v60, %v1706_v47  ;;  %2052 = vadd.xlane.f32.xlu0 %v2051_v4  ;;  %v2093_v5 = vsel %vm613_vm5, %v7742_v21, 0.0  ;;  %7237 = vmatprep.mubr.msk.bf16.mxu1 %vm8108_vm4, %v11282_v3  ;;  %v1809_v50 = vsub.f32 %v11298_v27, %v1777_v2 }
 0x2fa   :  { %v9053_v12 = vpop.eup %7759  ;;  %7777 = vpow2.f32 %v1847_v10  ;;  %v1849_v24 = vmul.f32 1.442695, %v1808_v58  ;;  %v1945_v49 = vmul.f32 1.442695, %v1904_v13  ;;  %v1709_v39 = vpop.xlane.xlu1 %1708  ;;  %v1905_v37 = vsub.f32 %v11299_v61, %v1777_v2  ;;  %7241 = vmatprep.subr.bf16.mxu1 %v11282_v3  ;;  %v11305_v10 = vld [vmem:[#allocation66_spill] sm:$0xff]  ;;  %v11306_v2 = vld [vmem:[#allocation68_spill] sm:$0xff] }
 0x2fb   :  { %v9058_v9 = vpop.eup %7761  ;;  %7779 = vpow2.f32 %v1943_v43  ;;  %v1810_v0 = vsub.f32 %v11300_v30, %v1778_v38  ;;  %v1906_v21 = vsub.f32 %v11301_v63, %v1778_v38  ;;  %v1779_v8 = vmax.f32 %v11302_v14, %v1709_v39  ;;  %v11309_v61 = vld [vmem:[#allocation19_spill] sm:$0xff] }
 0x2fc   :  { %v9064_v41 = vpop.eup %7763  ;;  %7781 = vpow2.f32 %v1849_v24  ;;  %v2147_v51 = vsel %vm613_vm5, %v9026_v36, 0.0  ;;  %v1712_v16 = vpop.xlane.xlu0 %1711  ;;  %v1851_v28 = vmul.f32 1.442695, %v1809_v50  ;;  %v1947_v54 = vmul.f32 1.442695, %v1905_v37  ;;  %2094 = vadd.xlane.f32.xlu1 %v2093_v5  ;;  %v11307_v24 = vld [vmem:[#allocation37_spill] sm:$0xff] }
 0x2fd   :  { %v9070_v23 = vpop.eup %7765  ;;  %7783 = vpow2.f32 %v1945_v49  ;;  %v1853_v55 = vmul.f32 1.442695, %v1810_v0  ;;  %v1949_v52 = vmul.f32 1.442695, %v1906_v21  ;;  %v1811_v45 = vsub.f32 %v11303_v19, %v1779_v8  ;;  %2148 = vadd.xlane.f32.xlu0 %v2147_v51  ;;  %v11308_v5 = vld [vmem:[#allocation51_spill] sm:$0xff]  ;;  %v11310_v37 = vld [vmem:[#allocation34_spill] sm:$0xff] }
 0x2fe   :  { %v1907_v22 = vsub.f32 %v11304_v44, %v1779_v8  ;;  %v2217_v32 = vpack.c.bf16 %v9053_v12, %v9040_v29  ;;  %v1715_v25 = vpop.xlane.xlu1 %1714  ;;  %v9076_v57 = vpop.eup %7767  ;;  %7785 = vpow2.f32 %v1851_v28  ;;  %v2445_v40 = vpack.c.bf16 %v9058_v9, %v9046_v26  ;;  %v11311_v0 = vld [vmem:[#allocation54_spill] sm:$0xff]  ;;  %v11312_v21 = vld [vmem:[#allocation65_spill] sm:$0xff]  ;;  %v11313_v19 = vld [vmem:[#allocation36_spill] sm:$0xff] }
 0x2ff   :  { %v1780_v43 = vmax.f32 %v11305_v10, %v1712_v16  ;;  %v2054_v58 = vsel %vm128_vm1, %v9032_v46, 0.0  ;;  %v9083_v13 = vpop.eup %7769  ;;  %7787 = vpow2.f32 %v1947_v54  ;;  %v1855_v1 = vmul.f32 1.442695, %v1811_v45 }
 0x300   :  { %v1951_v47 = vmul.f32 1.442695, %v1907_v22  ;;  %7195 = vmatprep.mubr.msk.bf16.mxu0 %vm128_vm1, %v2217_v32  ;;  %v1781_v4 = vmax.f32 %v11306_v2, %v1715_v25  ;;  %v1718_v60 = vpop.xlane.xlu0 %1717  ;;  %v9087_v38 = vpop.eup %7771  ;;  %7789 = vpow2.f32 %v1853_v55  ;;  %7238 = vmatmul.mubr.msk.bf16.vlgmr.msra.gmra.mrb[104].mxu1 %vm613_vm5, %v2445_v40  ;;  %v2000_v27 = vsel %vm128_vm1, %v9010_v15, 0.0  ;;  %v11314_v32 = vld [vmem:[#allocation55_spill] sm:$0xff] }
 0x301   :  { %v1812_v49 = vsub.f32 %v11307_v24, %v1780_v43  ;;  %v1908_v39 = vsub.f32 %v11308_v5, %v1780_v43  ;;  %2055 = vadd.xlane.f32.xlu1 %v2054_v58  ;;  %7791 = vpow2.f32 %v1949_v52  ;;  %7242 = vmatpush3.bf16.msra.mxu1 %v11309_v61  ;;  %v1782_v14 = vmax.f32 %v11312_v21, %v1718_v60 }
 0x302   :  { %v9094_v50 = vpop.eup %7773  ;;  %v1813_v30 = vsub.f32 %v11310_v37, %v1781_v4  ;;  %v1909_v63 = vsub.f32 %v11311_v0, %v1781_v4  ;;  %2001 = vadd.xlane.f32.xlu0 %v2000_v27  ;;  %v1661_v8 = vpop.xlane.xlu1 %1660  ;;  %7793 = vpow2.f32 %v1855_v1  ;;  %v2003_v15 = vsel %vm128_vm1, %v9040_v29, 0.0  ;;  %7243 = vmatprep.mubr.msk.bf16.mxu1 %vm8108_vm4, %v11282_v3  ;;  %v11315_v4 = vld [vmem:[#allocation71_spill] sm:$0xff] }
 0x303   :  { %v9100_v51 = vpop.eup %7775  ;;  %v1857_v16 = vmul.f32 1.442695, %v1812_v49  ;;  %v1953_v28 = vmul.f32 1.442695, %v1908_v39  ;;  %7247 = vmatprep.subr.bf16.mxu1 %v11282_v3  ;;  %7795 = vpow2.f32 %v1951_v47  ;;  %v1814_v45 = vsub.f32 %v11313_v19, %v1782_v14 }
 0x304   :  { %v9107_v54 = vpop.eup %7777  ;;  %v1859_v55 = vmul.f32 1.442695, %v1813_v30  ;;  %v1955_v52 = vmul.f32 1.442695, %v1909_v63  ;;  %v9110_v44 = vpop.xlane.xlu0 %1657  ;;  %v1910_v25 = vsub.f32 %v11314_v32, %v1782_v14  ;;  %v2096_v29 = vsel %vm613_vm5, %v9015_v56, 0.0  ;;  %v11318_v30 = vld [vmem:[#allocation67_spill] sm:$0xff] }
 0x305   :  { %v9112_v22 = vpop.eup %7779  ;;  %7797 = vpow2.f32 %v1857_v16  ;;  %2004 = vadd.xlane.f32.xlu1 %v2003_v15  ;;  %v2218_v40 = vpack.c.bf16 %v9094_v50, %v9083_v13  ;;  %v1861_v43 = vmul.f32 1.442695, %v1814_v45  ;;  %v2446_v58 = vpack.c.bf16 %v9100_v51, %v9087_v38  ;;  %v11319_v63 = vld [vmem:[#allocation21_spill] sm:$0xff]  ;;  %v11320_v15 = vld [vmem:[#allocation39_spill] sm:$0xff] }
 0x306   :  { %v9119_v10 = vpop.eup %7781  ;;  %7799 = vpow2.f32 %v1953_v28  ;;  %2097 = vadd.xlane.f32.xlu0 %v2096_v29  ;;  %v1727_v1 = vpop.xlane.xlu1 %1726  ;;  %v1977_v2 = vmul.f32 1.442695, %v1920_v18  ;;  %v1957_v56 = vmul.f32 1.442695, %v1910_v25  ;;  %v2099_v24 = vsel %vm613_vm5, %v9046_v26, 0.0  ;;  %v11317_v18 = vld [vmem:[#allocation56_spill] sm:$0xff] }
 0x307   :  { %v9123_v47 = vpop.eup %7783  ;;  %7801 = vpow2.f32 %v1859_v55  ;;  %7196 = vmatmul.mubr.msk.bf16.gmra.mrb[68].mxu0 %vm128_vm1, %v2218_v40  ;;  %v1785_v60 = vmax.f32 %v11315_v4, %v1727_v1  ;;  %v2150_v49 = vsel %vm613_vm5, %v9037_v7, 0.0  ;;  %v2219_v5 = vpack.c.bf16 %v9119_v10, %v9107_v54 }
 0x308   :  { %7803 = vpow2.f32 %v1955_v52  ;;  %v1730_v39 = vpop.xlane.xlu0 %1729  ;;  %v9136_v27 = vpop.eup %7785  ;;  %7244 = vmatmul.mubr.msk.bf16.vlgmr.msra.gmra.mrb[108].mxu1 %vm613_vm5, %v2446_v58  ;;  %v2447_v14 = vpack.c.bf16 %v9123_v47, %v9112_v22  ;;  %v11321_v52 = vld [vmem:[#allocation57_spill] sm:$0xff]  ;;  %v2066_v32 = vsel %vm128_vm1, %v9076_v57, 0.0  ;;  %v2063_v29 = vsel %vm128_vm1, %v9064_v41, 0.0 }
 0x309   :  { %7805 = vpow2.f32 %v1861_v43  ;;  %2100 = vadd.xlane.f32.xlu1 %v2099_v24  ;;  %v1817_v31 = vsub.f32 %v11316_v6, %v1785_v60  ;;  %v1913_v37 = vsub.f32 %v11317_v18, %v1785_v60  ;;  %v1786_v0 = vmax.f32 %v11318_v30, %v1730_v39  ;;  %v9142_v26 = vpop.eup %7787  ;;  %7248 = vmatpush3.bf16.msra.mxu1 %v11319_v63  ;;  %v11369_v63 = vld [vmem:[#allocation11_spill] sm:$0xff] }
 0x30a   :  { %7807 = vpow2.f32 %v1957_v56  ;;  %2151 = vadd.xlane.f32.xlu0 %v2150_v49  ;;  %v1757_v21 = vpop.xlane.xlu1 %1756  ;;  %v9147_v16 = vpop.eup %7789  ;;  %7199 = vmatprep.mubr.msk.bf16.mxu0 %vm128_vm1, %v2219_v5  ;;  %v11323_v49 = vld [vmem:[#allocation52_spill] sm:$0xff]  ;;  %v2223_v6 = vpack.c.bf16 %v8992_v62, %v8983_v48  ;;  %v2009_v18 = vsel %vm128_vm1, %v9083_v13, 0.0  ;;  %v2159_v30 = vsel %vm613_vm5, %v9070_v23, 0.0 }
 0x30b   :  { %7809 = vpow2.f32 %v1977_v2  ;;  %v1867_v28 = vmul.f32 1.442695, %v1817_v31  ;;  %v1818_v55 = vsub.f32 %v11320_v15, %v1786_v0  ;;  %v1914_v19 = vsub.f32 %v11321_v52, %v1786_v0  ;;  %7249 = vmatprep.mubr.msk.bf16.mxu1 %vm8108_vm4, %v11282_v3  ;;  %v9154_v45 = vpop.eup %7791  ;;  %7253 = vmatprep.subr.bf16.mxu1 %v11282_v3  ;;  %v11324_v13 = vld [vmem:[#allocation40_spill] sm:$0xff] }
 0x30c   :  { %v1795_v25 = vmax.f32 %v1661_v8, %v1757_v21  ;;  %v2220_v40 = vpack.c.bf16 %v9147_v16, %v9136_v27  ;;  %v1664_v43 = vpop.xlane.xlu0 %1663  ;;  %v9163_v58 = vpop.eup %7793  ;;  %v1963_v1 = vmul.f32 1.442695, %v1913_v37  ;;  %v2448_v4 = vpack.c.bf16 %v9154_v45, %v9142_v26  ;;  %v11322_v8 = vld [vmem:[#allocation45_spill] sm:$0xff] }
 0x30d   :  { %v1869_v2 = vmul.f32 1.442695, %v1818_v55  ;;  %v1965_v56 = vmul.f32 1.442695, %v1914_v19  ;;  %2067 = vadd.xlane.f32.xlu1 %v2066_v32  ;;  %v9167_v60 = vpop.eup %7795  ;;  %7811 = vpow2.f32 %v1867_v28  ;;  %v11325_v55 = vld [vmem:[#allocation58_spill] sm:$0xff]  ;;  %v11326_v19 = vld [vmem:[#allocation69_spill] sm:$0xff] }
 0x30e   :  { %v1827_v24 = vsub.f32 %v11322_v8, %v1795_v25  ;;  %v1923_v5 = vsub.f32 %v11323_v49, %v1795_v25  ;;  %2064 = vadd.xlane.f32.xlu0 %v2063_v29  ;;  %v1739_v39 = vpop.xlane.xlu1 %1738  ;;  %v11327_v29 = vld [vmem:[#allocation20_spill] sm:$0xff] }
 0x30f   :  { %v9173_v31 = vpop.eup %7797  ;;  %7813 = vpow2.f32 %v1869_v2  ;;  %7200 = vmatmul.mubr.msk.bf16.gmra.mrb[72].mxu0 %vm128_vm1, %v2220_v40  ;;  %v1789_v37 = vmax.f32 %v8946_v20, %v1739_v39  ;;  %v2105_v40 = vsel %vm613_vm5, %v9087_v38, 0.0 }
 0x310   :  { %v9181_v0 = vpop.eup %7799  ;;  %7815 = vpow2.f32 %v1965_v56  ;;  %v1887_v21 = vmul.f32 1.442695, %v1827_v24  ;;  %v1983_v28 = vmul.f32 1.442695, %v1923_v5  ;;  %v2221_v48 = vpack.c.bf16 %v9173_v31, %v9163_v58  ;;  %v1742_v62 = vpop.xlane.xlu0 %1741  ;;  %7250 = vmatmul.mubr.msk.bf16.vlgmr.msra.gmra.mrb[112].mxu1 %vm613_vm5, %v2447_v14  ;;  %v11328_v5 = vld [vmem:[#allocation41_spill] sm:$0xff] }
 0x311   :  { %v9185_v15 = vpop.eup %7801  ;;  %7817 = vpow2.f32 %v1963_v1  ;;  %2010 = vadd.xlane.f32.xlu1 %v2009_v18  ;;  %v1821_v20 = vsub.f32 %v11324_v13, %v1789_v37  ;;  %v1917_v52 = vsub.f32 %v11325_v55, %v1789_v37  ;;  %v1790_v32 = vmax.f32 %v11326_v19, %v1742_v62  ;;  %7254 = vmatpush3.bf16.msra.mxu1 %v11327_v29  ;;  %v11329_v18 = vld [vmem:[#allocation59_spill] sm:$0xff] }
 0x312   :  { %v9191_v25 = vpop.eup %7803  ;;  %2160 = vadd.xlane.f32.xlu0 %v2159_v30  ;;  %v1667_v2 = vpop.xlane.xlu1 %1666  ;;  %v2449_v1 = vpack.c.bf16 %v9181_v0, %v9167_v60  ;;  %v2225_v14 = vpack.c.bf16 %v9032_v46, %v9021_v17  ;;  %v2227_v56 = vpack.c.bf16 %v9076_v57, %v9064_v41  ;;  %7819 = vpow2.f32 %v1887_v21  ;;  %7203 = vmatprep.mubr.msk.bf16.mxu0 %vm128_vm1, %v2221_v48 }
 0x313   :  { %v9202_v8 = vpop.eup %7805  ;;  %v1875_v24 = vmul.f32 1.442695, %v1821_v20  ;;  %v1971_v49 = vmul.f32 1.442695, %v1917_v52  ;;  %v1822_v39 = vsub.f32 %v11328_v5, %v1790_v32  ;;  %7255 = vmatprep.mubr.msk.bf16.mxu1 %vm8108_vm4, %v11282_v3  ;;  %7821 = vpow2.f32 %v1983_v28  ;;  %7259 = vmatprep.subr.bf16.mxu1 %v11282_v3 }
 0x314   :  { %v9208_v38 = vpop.eup %7807  ;;  %v1918_v37 = vsub.f32 %v11329_v18, %v1790_v32  ;;  %v2006_v30 = vsel %vm128_vm1, %v9053_v12, 0.0  ;;  %v2222_v21 = vpack.c.bf16 %v9202_v8, %v9185_v15  ;;  %v1760_v62 = vpop.xlane.xlu0 %1759  ;;  %v11330_v12 = vld [vmem:[#allocation47_spill] sm:$0xff]  ;;  %v11331_v32 = vld [vmem:[#allocation53_spill] sm:$0xff]  ;;  %v2015_v41 = vsel %vm128_vm1, %v9107_v54, 0.0 }
 0x315   :  { %v9216_v48 = vpop.eup %7809  ;;  %7823 = vpow2.f32 %v1875_v24  ;;  %v1877_v13 = vmul.f32 1.442695, %v1822_v39  ;;  %2106 = vadd.xlane.f32.xlu1 %v2105_v40  ;;  %v1796_v20 = vmax.f32 %v1664_v43, %v1760_v62  ;;  %v2450_v28 = vpack.c.bf16 %v9208_v38, %v9191_v25 }
 0x316   :  { %7825 = vpow2.f32 %v1971_v49  ;;  %v1973_v55 = vmul.f32 1.442695, %v1918_v37  ;;  %2007 = vadd.xlane.f32.xlu0 %v2006_v30  ;;  %v1751_v52 = vpop.xlane.xlu1 %1750  ;;  %v2102_v43 = vsel %vm613_vm5, %v9058_v9, 0.0  ;;  %v11332_v30 = vld [vmem:[#allocation42_spill] sm:$0xff]  ;;  %v2033_v53 = vsel %vm128_vm1, %v9185_v15, 0.0 }
 0x317   :  { %7827 = vpow2.f32 %v1877_v13  ;;  %7204 = vmatmul.mubr.msk.bf16.gmra.mrb[76].mxu0 %vm128_vm1, %v2222_v21  ;;  %v1828_v19 = vsub.f32 %v11330_v12, %v1796_v20  ;;  %v1924_v5 = vsub.f32 %v11331_v32, %v1796_v20  ;;  %v1793_v18 = vmax.f32 %v8950_v11, %v1751_v52  ;;  %v9224_v24 = vpop.eup %7811  ;;  %v11333_v21 = vld [vmem:[#allocation60_spill] sm:$0xff]  ;;  %v11335_v32 = vld [vmem:[#allocation43_spill] sm:$0xff] }
 0x318   :  { %7829 = vpow2.f32 %v1973_v55  ;;  %7207 = vmatprep.mubr.msk.bf16.mxu0 %vm128_vm1, %v2223_v6  ;;  %v1754_v40 = vpop.xlane.xlu0 %1753  ;;  %7256 = vmatmul.mubr.msk.bf16.vlgmr.msra.gmra.mrb[116].mxu1 %vm613_vm5, %v2448_v4  ;;  %v11334_v6 = vld [vmem:[#allocation23_spill] sm:$0xff]  ;;  %v2030_v34 = vsel %vm128_vm1, %v9173_v31, 0.0  ;;  %v2126_v15 = vsel %vm613_vm5, %v9181_v0, 0.0 }
 0x319   :  { %v9229_v49 = vpop.eup %7813  ;;  %v1889_v39 = vmul.f32 1.442695, %v1828_v19  ;;  %v1985_v37 = vmul.f32 1.442695, %v1924_v5  ;;  %v1825_v11 = vsub.f32 %v11332_v30, %v1793_v18  ;;  %v1921_v62 = vsub.f32 %v11333_v21, %v1793_v18  ;;  %7260 = vmatpush3.bf16.msra.mxu1 %v11334_v6  ;;  %7261 = vmatprep.mubr.msk.bf16.mxu1 %vm8108_vm4, %v11282_v3  ;;  %v11336_v18 = vld [vmem:[#allocation61_spill] sm:$0xff] }
 0x31a   :  { %v9237_v13 = vpop.eup %7815  ;;  %2103 = vadd.xlane.f32.xlu0 %v2102_v43  ;;  %v1794_v9 = vmax.f32 %v9110_v44, %v1754_v40  ;;  %v1763_v20 = vpop.xlane.xlu1 %1762  ;;  %v2224_v55 = vpack.c.bf16 %v9229_v49, %v9224_v24  ;;  %7265 = vmatprep.subr.bf16.mxu1 %v11282_v3 }
 0x31b   :  { %v9243_v52 = vpop.eup %7817  ;;  %7831 = vpow2.f32 %v1889_v39  ;;  %v1883_v4 = vmul.f32 1.442695, %v1825_v11  ;;  %v1979_v12 = vmul.f32 1.442695, %v1921_v62  ;;  %v1797_v19 = vmax.f32 %v1667_v2, %v1763_v20  ;;  %v11337_v39 = vld [vmem:[#allocation44_spill] sm:$0xff]  ;;  %v11338_v20 = vld [vmem:[#allocation62_spill] sm:$0xff] }
 0x31c   :  { %7833 = vpow2.f32 %v1985_v37  ;;  %v1826_v5 = vsub.f32 %v11335_v32, %v1794_v9  ;;  %v1922_v44 = vsub.f32 %v11336_v18, %v1794_v9  ;;  %v1670_v43 = vpop.xlane.xlu0 %1669  ;;  %v2452_v40 = vpack.c.bf16 %v9237_v13, %v9243_v52  ;;  %v9252_v30 = vpop.eup %7819 }
 0x31d   :  { %v1829_v11 = vsub.f32 %v11337_v39, %v1797_v19  ;;  %v2162_v2 = vsel %vm613_vm5, %v9216_v48, 0.0  ;;  %v9257_v21 = vpop.eup %7821  ;;  %7835 = vpow2.f32 %v1883_v4  ;;  %v1925_v32 = vsub.f32 %v11338_v20, %v1797_v19 }
 0x31e   :  { %v1885_v62 = vmul.f32 1.442695, %v1826_v5  ;;  %v1981_v37 = vmul.f32 1.442695, %v1922_v44  ;;  %2163 = vadd.xlane.f32.xlu0 %v2162_v2  ;;  %7837 = vpow2.f32 %v1979_v12  ;;  %v2453_v4 = vpack.c.bf16 %v9037_v7, %v9026_v36  ;;  %v11340_v2 = vld [vmem:[#allocation46_spill] sm:$0xff] }
 0x31f   :  { %v9260_v9 = vpop.eup %7823  ;;  %7208 = vmatmul.mubr.msk.bf16.gmra.mrb[80].mxu0 %vm128_vm1, %v2224_v55  ;;  %v1891_v19 = vmul.f32 1.442695, %v1829_v11  ;;  %v2075_v55 = vsel %vm128_vm1, %v9252_v30, 0.0  ;;  %v1987_v46 = vmul.f32 1.442695, %v1925_v32  ;;  %v2036_v7 = vsel %vm128_vm1, %v9202_v8, 0.0 }
 0x320   :  { %v9263_v18 = vpop.eup %7825  ;;  %7839 = vpow2.f32 %v1885_v62  ;;  %7211 = vmatprep.mubr.msk.bf16.mxu0 %vm128_vm1, %v2225_v14  ;;  %v1766_v39 = vpop.xlane.xlu0 %1765  ;;  %7262 = vmatmul.mubr.msk.bf16.vlgmr.msra.gmra.mrb[120].mxu1 %vm613_vm5, %v2449_v1  ;;  %v11339_v14 = vld [vmem:[#allocation22_spill] sm:$0xff]  ;;  %v11341_v62 = vld [vmem:[#allocation63_spill] sm:$0xff]  ;;  %v2132_v8 = vsel %vm613_vm5, %v9208_v38, 0.0 }
 0x321   :  { %v9271_v5 = vpop.eup %7827  ;;  %7841 = vpow2.f32 %v1981_v37  ;;  %v1798_v12 = vmax.f32 %v1670_v43, %v1766_v39  ;;  %7266 = vmatpush3.bf16.msra.mxu1 %v11339_v14  ;;  %7267 = vmatprep.mubr.msk.bf16.mxu1 %vm8108_vm4, %v11282_v3  ;;  %v2455_v43 = vpack.c.bf16 %v9216_v48, %v9070_v23  ;;  %v2153_v36 = vsel %vm613_vm5, %v9263_v18, 0.0  ;;  %v600_v48 = vld [vmem:[%s11110_s4] sm:$0xff] }
 0x322   :  { %v9279_v17 = vpop.eup %7829  ;;  %2076 = vadd.xlane.f32.xlu0 %v2075_v55  ;;  %v2226_v44 = vpack.c.bf16 %v9271_v5, %v9260_v9  ;;  %7277 = vmatprep.subr.bf16.mxu1 %v11282_v3  ;;  %7843 = vpow2.f32 %v1891_v19  ;;  %v2171_v55 = vsel %vm613_vm5, %v9257_v21, 0.0  ;;  %v2060_v31 = vsel %vm128_vm1, %v9271_v5, 0.0 }
 0x323   :  { %v1830_v11 = vsub.f32 %v11340_v2, %v1798_v12  ;;  %v1926_v37 = vsub.f32 %v11341_v62, %v1798_v12  ;;  %v2454_v1 = vpack.c.bf16 %v9279_v17, %v9263_v18  ;;  %7845 = vpow2.f32 %v1987_v46 }
 0x324   :  { %v9435_v18 = vpop.permute.xlu0 %3520  ;;  %v2156_v23 = vsel %vm613_vm5, %v9279_v17, 0.0  ;;  %v2045_v5 = vsel %vm128_vm1, %v9224_v24, 0.0  ;;  %v2048_v24 = vsel %vm128_vm1, %v9229_v49, 0.0  ;;  %v11356_v49 = vld [vmem:[#allocation4_spill] sm:$0xff] }
 0x325   :  { %v7832_v20 = vpop.eup %7831  ;;  %v1893_v32 = vmul.f32 1.442695, %v1830_v11  ;;  %v1989_v39 = vmul.f32 1.442695, %v1926_v37  ;;  %v11342_v37 = vld [vmem:[#allocation24_spill] sm:$0xff]  ;;  %11351 = vst [vmem:[#allocation48_spill] sm:$0xff] %v9435_v18 }
 0x326   :  { %v9295_v2 = vpop.eup %7833  ;;  %2172 = vadd.xlane.f32.xlu0 %v2171_v55  ;;  %v2078_v12 = vsel %vm128_vm1, %v7832_v20, 0.0  ;;  %v2229_v62 = vpack.c.bf16 %v7832_v20, %v9252_v30  ;;  %v2012_v30 = vsel %vm128_vm1, %v9094_v50, 0.0 }
 0x327   :  { %7847 = vpow2.f32 %v1893_v32  ;;  %7212 = vmatmul.mubr.msk.bf16.gmra.mrb[84].mxu0 %vm128_vm1, %v2226_v44  ;;  %2079 = vadd.xlane.f32.xlu1 %v2078_v12  ;;  %v2457_v19 = vpack.c.bf16 %v9295_v2, %v9257_v21  ;;  %v9302_v11 = vpop.eup %7835  ;;  %v2111_v32 = vsel %vm613_vm5, %v9112_v22, 0.0  ;;  %v11343_v12 = vld [vmem:[#allocation26_spill] sm:$0xff] }
 0x328   :  { %7849 = vpow2.f32 %v1989_v39  ;;  %7215 = vmatprep.mubr.msk.bf16.mxu0 %vm128_vm1, %v2227_v56  ;;  %v9308_v46 = vpop.eup %7837  ;;  %7268 = vmatmul.mubr.msk.bf16.vlgmr.msra.gmra.mrb[124].mxu1 %vm613_vm5, %v2450_v28  ;;  %v2108_v56 = vsel %vm613_vm5, %v9100_v51, 0.0  ;;  %v2174_v51 = vsel %vm613_vm5, %v9295_v2, 0.0 }
 0x329   :  { %7278 = vmatpush3.bf16.msra.mxu1 %v11342_v37  ;;  %7279 = vmatprep.mubr.msk.bf16.mxu1 %vm8108_vm4, %v11282_v3 }
 0x32a   :  { %v9316_v44 = vpop.eup %7839  ;;  %2013 = vadd.xlane.f32.xlu0 %v2012_v30  ;;  %7289 = vmatprep.subr.bf16.mxu1 %v11282_v3  ;;  %v2018_v30 = vsel %vm128_vm1, %v9119_v10, 0.0  ;;  %v2027_v10 = vsel %vm128_vm1, %v9163_v58, 0.0  ;;  %v2123_v58 = vsel %vm613_vm5, %v9167_v60, 0.0  ;;  %v9411_v60 = vpop.permute.xlu1 %3516 }
 0x32b   :  { %v9319_v20 = vpop.eup %7841  ;;  %v2228_v57 = vpack.c.bf16 %v9316_v44, %v9302_v11  ;;  %2016 = vadd.xlane.f32.xlu1 %v2015_v41  ;;  %v2117_v41 = vsel %vm613_vm5, %v9142_v26, 0.0  ;;  %v2024_v26 = vsel %vm128_vm1, %v9147_v16, 0.0  ;;  %11348 = vst [vmem:[#allocation64_spill] sm:$0xff] %v9411_v60 }
 0x32c   :  { %v2456_v50 = vpack.c.bf16 %v9319_v20, %v9308_v46  ;;  %v9332_v28 = vpop.eup %7843 }
 0x32d   :  { %v9337_v39 = vpop.eup %7845 }
 0x32e   :  { %2109 = vadd.xlane.f32.xlu0 %v2108_v56  ;;  %v11345_v56 = vld [vmem:[#allocation27_spill] sm:$0xff]  ;;  %v9432_v0 = vpop.permute.xlu1 %3518 }
 0x32f   :  { %7216 = vmatmul.mubr.msk.bf16.gmra.mrb[88].mxu0 %vm128_vm1, %v2228_v57  ;;  %2112 = vadd.xlane.f32.xlu1 %v2111_v32  ;;  %v11344_v57 = vld [vmem:[#allocation28_spill] sm:$0xff]  ;;  %v2120_v32 = vsel %vm613_vm5, %v9154_v45, 0.0  ;;  %v11347_v45 = vld [vmem:[#allocation29_spill] sm:$0xff]  ;;  %11349 = vst [vmem:[#allocation32_spill] sm:$0xff] %v9432_v0 }
 0x330   :  { %7219 = vmatprep.mubr.msk.bf16.mxu0 %vm128_vm1, %v2229_v62  ;;  %7280 = vmatmul.mubr.msk.bf16.vlgmr.msra.gmra.mrb[128].mxu1 %vm613_vm5, %v2452_v40  ;;  %v2021_v62 = vsel %vm128_vm1, %v9136_v27, 0.0  ;;  %v2114_v27 = vsel %vm613_vm5, %v9123_v47, 0.0  ;;  %v593_v47 = vld [vmem:[%s11106_s6 + $0x18] sm:$0xff] }
 0x331   :  { %v9340_v54 = vpop.eup %7847  ;;  %7290 = vmatpush3.bf16.msra.mxu1 %v11343_v12  ;;  %7291 = vmatprep.mubr.msk.bf16.mxu1 %vm8108_vm4, %v11282_v3  ;;  %v11366_v12 = vld [vmem:[#allocation16_spill] sm:$0xff] }
 0x332   :  { %v9348_v55 = vpop.eup %7849  ;;  %2175 = vadd.xlane.f32.xlu0 %v2174_v51  ;;  %v2230_v22 = vpack.c.bf16 %v9340_v54, %v9332_v28  ;;  %7301 = vmatprep.subr.bf16.mxu1 %v11282_v3  ;;  %v11346_v51 = vld [vmem:[#allocation30_spill] sm:$0xff]  ;;  %v9459_v17 = vpop.permute.xlu1 %3522 }
 0x333   :  { %v2458_v40 = vpack.c.bf16 %v9348_v55, %v9337_v39  ;;  %2022 = vadd.xlane.f32.xlu1 %v2021_v62  ;;  %11352 = vst [vmem:[#allocation33_spill] sm:$0xff] %v9459_v17  ;;  %v2069_v62 = vsel %vm128_vm1, %v9302_v11, 0.0 }
 0x336   :  { %2019 = vadd.xlane.f32.xlu0 %v2018_v30  ;;  %v9472_v21 = vpop.permute.xlu1 %3526  ;;  %v11360_v30 = vld [vmem:[#allocation13_spill] sm:$0xff] }
 0x337   :  { %7220 = vmatmul.mubr.msk.bf16.gmra.mrb[92].mxu0 %vm128_vm1, %v2230_v22  ;;  %2118 = vadd.xlane.f32.xlu1 %v2117_v41  ;;  %11354 = vst [vmem:[#allocation70_spill] sm:$0xff] %v9472_v21 }
 0x338   :  { %7273 = vmatprep.mubr.msk.bf16.mxu0 %vm8108_vm4, %v11282_v3  ;;  %7292 = vmatmul.mubr.msk.bf16.vlgmr.msra.gmra.mrb[132].mxu1 %vm613_vm5, %v2454_v1  ;;  %v592_v1 = vld [vmem:[%s11106_s6 + $0x10] sm:$0xff] }
 0x339   :  { %7302 = vmatpush3.bf16.msra.mxu1 %v11344_v57  ;;  %7303 = vmatprep.mubr.msk.bf16.mxu1 %vm8108_vm4, %v11282_v3  ;;  %v595_v16 = vpack.c.bf16 %v593_v47, %v592_v1  ;;  %v11362_v47 = vld [vmem:[#allocation5_spill] sm:$0xff] }
 0x33a   :  { %2115 = vadd.xlane.f32.xlu0 %v2114_v27  ;;  %7313 = vmatprep.subr.bf16.mxu1 %v11282_v3  ;;  %v9486_v22 = vpop.permute.xlu1 %3530  ;;  %v11361_v27 = vld [vmem:[#allocation12_spill] sm:$0xff]  ;;  %v11365_v57 = vld [vmem:[#allocation17_spill] sm:$0xff] }
 0x33b   :  { %2028 = vadd.xlane.f32.xlu1 %v2027_v10  ;;  %11357 = vst [vmem:[#allocation50_spill] sm:$0xff] %v9486_v22 }
 0x33e   :  { %2025 = vadd.xlane.f32.xlu0 %v2024_v26 }
 0x33f   :  { %7274 = vmatmul.mubr.msk.bf16.vlgmr.msra.gmra.mrb[96].mxu0 %vm613_vm5, %v2451_v35  ;;  %2124 = vadd.xlane.f32.xlu1 %v2123_v58  ;;  %v2129_v35 = vsel %vm613_vm5, %v9191_v25, 0.0  ;;  %v11350_v25 = vld [vmem:[#allocation31_spill] sm:$0xff] }
 0x340   :  { %7284 = vmatpush3.bf16.msra.mxu0 %v11345_v56  ;;  %7304 = vmatmul.mubr.msk.bf16.vlgmr.msra.gmra.mrb[136].mxu1 %vm613_vm5, %v2456_v50  ;;  %v2141_v50 = vsel %vm613_vm5, %v9243_v52, 0.0  ;;  %v2144_v52 = vsel %vm613_vm5, %v9237_v13, 0.0  ;;  %v11358_v13 = vld [vmem:[#allocation9_spill] sm:$0xff]  ;;  %v11367_v56 = vld [vmem:[#allocation7_spill] sm:$0xff] }
 0x341   :  { %7285 = vmatprep.mubr.msk.bf16.mxu0 %vm8108_vm4, %v11282_v3  ;;  %7314 = vmatpush3.bf16.msra.mxu1 %v11346_v51 }
 0x342   :  { %2121 = vadd.xlane.f32.xlu0 %v2120_v32  ;;  %7295 = vmatprep.subr.bf16.mxu0 %v11282_v3 }
 0x343   :  { %7315 = vmatprep.mubr.msk.bf16.mxu1 %vm8108_vm4, %v11282_v3  ;;  %2034 = vadd.xlane.f32.xlu1 %v2033_v53 }
 0x344   :  { %7353 = vmatprep.subr.bf16.mxu1 %v595_v16 }
 0x346   :  { %2031 = vadd.xlane.f32.xlu0 %v2030_v34 }
 0x347   :  { %7286 = vmatmul.mubr.msk.bf16.vlgmr.msra.gmra.mrb[100].mxu0 %vm613_vm5, %v2453_v4  ;;  %2130 = vadd.xlane.f32.xlu1 %v2129_v35  ;;  %v601_v4 = vld [vmem:[%s11110_s4 + $0x8] sm:$0xff] }
 0x348   :  { %7296 = vmatpush3.bf16.msra.mxu0 %v11347_v45  ;;  %7316 = vmatmul.mubr.msk.bf16.vlgmr.msra.gmra.mrb[140].mxu1 %vm613_vm5, %v2458_v40  ;;  %v604_v38 = vpack.c.bf16 %v601_v4, %v600_v48  ;;  %v11359_v40 = vld [vmem:[#allocation8_spill] sm:$0xff]  ;;  %v2072_v4 = vsel %vm128_vm1, %v9316_v44, 0.0 }
 0x349   :  { %7297 = vmatprep.mubr.msk.bf16.mxu0 %vm8108_vm4, %v11282_v3  ;;  %7355 = vmatprep.mubr.msk.bf16.mxu1 %vm613_vm5, %v9411_v60 }
 0x34a   :  { %2127 = vadd.xlane.f32.xlu0 %v2126_v15  ;;  %7354 = vmatpush3.bf16.msra.mxu1 %v595_v16 }
 0x34b   :  { %7307 = vmatprep.subr.bf16.mxu0 %v11282_v3  ;;  %2154 = vadd.xlane.f32.xlu1 %v2153_v36 }
 0x34c   :  { %7393 = vmatprep.subr.bf16.mxu1 %v11282_v3 }
 0x34e   :  { %2037 = vadd.xlane.f32.xlu0 %v2036_v7 }
 0x34f   :  { %7298 = vmatmul.mubr.msk.bf16.vlgmr.msra.gmra.mrb[104].mxu0 %vm613_vm5, %v2455_v43  ;;  %2061 = vadd.xlane.f32.xlu1 %v2060_v31  ;;  %v9461_v43 = vpop.permute.xlu0 %3524 }
 0x350   :  { %7308 = vmatpush3.bf16.msra.mxu0 %v11350_v25  ;;  %7356 = vmatmul.mubr.msk.bf16.vlgmr.msra.gmra.mrb[144].mxu1 %vm613_vm5, %v9432_v0  ;;  %11353 = vst [vmem:[#allocation49_spill] sm:$0xff] %v9461_v43 }
 0x351   :  { %7309 = vmatprep.mubr.msk.bf16.mxu0 %vm8108_vm4, %v11282_v3  ;;  %7359 = vmatprep.mubr.msk.bf16.mxu1 %vm613_vm5, %v9435_v18 }
 0x352   :  { %2133 = vadd.xlane.f32.xlu0 %v2132_v8  ;;  %7319 = vmatprep.subr.bf16.mxu0 %v604_v38 }
 0x353   :  { %2157 = vadd.xlane.f32.xlu1 %v2156_v23  ;;  %v9474_v2 = vpop.permute.xlu0 %3528  ;;  %v2165_v23 = vsel %vm613_vm5, %v9308_v46, 0.0 }
 0x354   :  { %11355 = vst [vmem:[#allocation35_spill] sm:$0xff] %v9474_v2 }
 0x356   :  { %2046 = vadd.xlane.f32.xlu0 %v2045_v5  ;;  %v2081_v5 = vsel %vm128_vm1, %v9332_v28, 0.0 }
 0x357   :  { %7310 = vmatmul.mubr.msk.bf16.vlgmr.msra.gmra.mrb[108].mxu0 %vm613_vm5, %v2457_v19  ;;  %v2057_v19 = vsel %vm128_vm1, %v9260_v9, 0.0 }
 0x358   :  { %7320 = vmatpush3.bf16.msra.mxu0 %v604_v38  ;;  %7360 = vmatmul.mubr.msk.bf16.gmra.mrb[148].mxu1 %vm613_vm5, %v9459_v17 }
 0x359   :  { %7387 = vmatprep.subr.bf16.mxu0 %v11282_v3  ;;  %7363 = vmatprep.mubr.msk.bf16.mxu1 %vm613_vm5, %v9461_v43 }
 0x35a   :  { %2142 = vadd.xlane.f32.xlu0 %v2141_v50 }
 0x35e   :  { %2049 = vadd.xlane.f32.xlu0 %v2048_v24  ;;  %v2168_v24 = vsel %vm613_vm5, %v9319_v20, 0.0  ;;  %v11363_v20 = vld [vmem:[#allocation3_spill] sm:$0xff] }
 0x35f   :  { %v1993_v9 = vpop.xlane.xlu1 %1992 }
 0x360   :  { %7364 = vmatmul.mubr.msk.bf16.gmra.mrb[152].mxu1 %vm613_vm5, %v9472_v21 }
 0x361   :  { %7367 = vmatprep.mubr.msk.bf16.mxu1 %vm613_vm5, %v9474_v2 }
 0x362   :  { %2145 = vadd.xlane.f32.xlu0 %v2144_v52  ;;  %v1996_v41 = vpop.xlane.xlu0 %1995 }
 0x363   :  { %v2089_v10 = vpop.xlane.xlu1 %2088 }
 0x364   :  { %3534 = vrot.lane.b32.xlu1 %v11356_v49, %s8110_s21 }
 0x366   :  { %2058 = vadd.xlane.f32.xlu0 %v2057_v19  ;;  %v2092_v1 = vpop.xlane.xlu0 %2091 }
 0x367   :  { %v2184_v33 = vadd.f32 %v2092_v1, %v1996_v41 }
 0x368   :  { %7368 = vmatmul.mubr.msk.bf16.gmra.mrb[156].mxu1 %vm613_vm5, %v9486_v22  ;;  %3536 = vrot.lane.b32.xlu1 %v11358_v13, %s8110_s21 }
 0x36a   :  { %2070 = vadd.xlane.f32.xlu0 %v2069_v62 }
 0x36c   :  { %3538 = vrot.lane.b32.xlu1 %v11359_v40, %s8110_s21 }
 0x370   :  { %3540 = vrot.lane.b32.xlu1 %v11360_v30, %s8110_s21 }
 0x374   :  { %3542 = vrot.lane.b32.xlu1 %v11361_v27, %s8110_s21 }
 0x37a   :  { %v9500_v26 = vpop.xlane.xlu1 %2040 }
 0x37e   :  { %v9502_v11 = vpop.xlane.xlu0 %2043  ;;  %v9506_v58 = vpop.xlane.xlu1 %2136 }
 0x380   :  { %3532 = vrot.lane.b32.xlu0 %v11362_v47, %s8110_s21 }
 0x382   :  { %v9508_v16 = vpop.xlane.xlu0 %2139 }
 0x385   :  { %v1999_v32 = vpop.xlane.xlu1 %1998 }
 0x386   :  { %v9510_v53 = vpop.xlane.xlu0 %2052 }
 0x389   :  { %v2095_v35 = vpop.xlane.xlu1 %2094 }
 0x38a   :  { %v9512_v34 = vpop.xlane.xlu0 %2148  ;;  %v2185_v29 = vadd.f32 %v2095_v35, %v1999_v32 }
 0x38e   :  { %v9514_v36 = vpop.xlane.xlu1 %2055 }
 0x38f   :  { %v2002_v15 = vpop.xlane.xlu0 %2001 }
 0x392   :  { %v9518_v8 = vpop.xlane.xlu1 %2004 }
 0x393   :  { %v2098_v7 = vpop.xlane.xlu0 %2097 }
 0x394   :  { %v2186_v61 = vadd.f32 %v2098_v7, %v2002_v15 }
 0x396   :  { %v9526_v38 = vpop.xlane.xlu1 %2100 }
 0x397   :  { %v9516_v31 = vpop.xlane.xlu0 %2151 }
 0x398   :  { %2166 = vadd.xlane.f32.xlu1 %v2165_v23 }
 0x39a   :  { %v9536_v52 = vpop.xlane.xlu1 %2067 }
 0x39b   :  { %v9522_v48 = vpop.xlane.xlu0 %2064 }
 0x39c   :  { %2073 = vadd.xlane.f32.xlu1 %v2072_v4 }
 0x39e   :  { %v2011_v44 = vpop.xlane.xlu1 %2010 }
 0x39f   :  { %2082 = vadd.xlane.f32.xlu0 %v2081_v5  ;;  %v9530_v50 = vpop.xlane.xlu0 %2160 }
 0x3a0   :  { %2169 = vadd.xlane.f32.xlu1 %v2168_v24 }
 0x3a2   :  { %v2107_v51 = vpop.xlane.xlu1 %2106 }
 0x3a3   :  { %v9534_v46 = vpop.xlane.xlu0 %2007 }
 0x3a7   :  { %v9538_v19 = vpop.xlane.xlu0 %2103 }
 0x3aa   :  { %v2496_v62 = vpop.f32.mrb[96].mxu1 }
 0x3ab   :  { %v9540_v23 = vpop.xlane.xlu0 %2163  ;;  %v7227_v4 = vpop.f32.mrb[97].mxu1 }
 0x3ac   :  { %v2499_v25 = vpop.f32.mrb[98].mxu1 }
 0x3ad   :  { %v7228_v28 = vpop.f32.mrb[99].mxu1 }
 0x3af   :  { %v9542_v5 = vpop.xlane.xlu0 %2076 }
 0x3b1   :  { %3757 = vrot.lane.b32.xlu1 %v11363_v20, %s8111_s29  ;;  %v2183_v20 = vadd.f32 %v2089_v10, %v1993_v9 }
 0x3b3   :  { %v9546_v24 = vpop.xlane.xlu0 %2172  ;;  %7851 = vrcp.f32 %v2183_v20 }
 0x3b4   :  { %v9548_v45 = vpop.xlane.xlu1 %2079  ;;  %7853 = vrcp.f32 %v2184_v33 }
 0x3b5   :  { %11364 = vst [vmem:[#allocation66_spill] sm:$0xff] %v9548_v45  ;;  %3544 = vrot.lane.b32.xlu0 %v11365_v57, %s8110_s21  ;;  %7855 = vrcp.f32 %v2185_v29  ;;  %v2188_v45 = vadd.f32 %v9538_v19, %v9534_v46 }
 0x3b6   :  { %7857 = vrcp.f32 %v2186_v61 }
 0x3b7   :  { %v2014_v6 = vpop.xlane.xlu0 %2013 }
 0x3b8   :  { %v9554_v4 = vpop.xlane.xlu1 %2016 }
 0x3b9   :  { %3546 = vrot.lane.b32.xlu0 %v11366_v12, %s8110_s21 }
 0x3bb   :  { %v2110_v28 = vpop.xlane.xlu0 %2109 }
 0x3bc   :  { %v9558_v37 = vpop.xlane.xlu1 %2112 }
 0x3bd   :  { %3849 = vrot.lane.b32.xlu0 %v11367_v56, %s8111_s29  ;;  %v11370_v56 = vld [vmem:[#allocation15_spill] sm:$0xff]  ;;  %v7852_v29 = vpop.eup %7851 }
 0x3be   :  { %v7854_v20 = vpop.eup %7853 }
 0x3bf   :  { %v9560_v14 = vpop.xlane.xlu0 %2175 }
 0x3c0   :  { %11368 = vst [vmem:[#allocation68_spill] sm:$0xff] %v9560_v14  ;;  %v9564_v2 = vpop.xlane.xlu1 %2022 }
 0x3c1   :  { %3941 = vrot.lane.b32.xlu0 %v11369_v63, %s8111_s29 }
 0x3c3   :  { %v2020_v43 = vpop.xlane.xlu0 %2019 }
 0x3c4   :  { %v9568_v22 = vpop.xlane.xlu1 %2118 }
 0x3c5   :  { %4033 = vrot.lane.b32.xlu0 %v11370_v56, %s8111_s29 }
 0x3c7   :  { %v2116_v9 = vpop.xlane.xlu0 %2115 }
 0x3c8   :  { %v7193_v41 = vpop.f32.mrb[64].mxu0  ;;  %v9572_v10 = vpop.xlane.xlu1 %2028 }
 0x3c9   :  { %4125 = vrot.lane.b32.xlu0 %v11362_v47, %s8111_s29  ;;  %v2316_v63 = vpop.f32.mrb[65].mxu0  ;;  %v7856_v47 = vpop.eup %7855 }
 0x3ca   :  { %v3163_v1 = vadd.f32 %v2496_v62, %v2316_v63  ;;  %v7194_v32 = vpop.f32.mrb[66].mxu0  ;;  %v2540_v35 = vpop.f32.mrb[100].mxu1  ;;  %v2187_v63 = vadd.f32 %v9526_v38, %v9518_v8  ;;  %v2192_v8 = vadd.f32 %v2116_v9, %v2020_v43 }
 0x3cb   :  { %v9574_v33 = vpop.xlane.xlu0 %2025  ;;  %v3165_v61 = vadd.f32 %v7193_v41, %v2540_v35  ;;  %v7233_v15 = vpop.f32.mrb[101].mxu1  ;;  %v2189_v35 = vadd.f32 %v2107_v51, %v2011_v44 }
 0x3cc   :  { %v2319_v7 = vpop.f32.mrb[67].mxu0  ;;  %v2543_v56 = vpop.f32.mrb[102].mxu1  ;;  %v3227_v0 = vmul.f32 %v7852_v29, %v3163_v1  ;;  %7859 = vrcp.f32 %v2187_v63 }
 0x3cd   :  { %4217 = vrot.lane.b32.xlu0 %v11358_v13, %s8111_s29  ;;  %v3164_v18 = vadd.f32 %v2499_v25, %v2319_v7  ;;  %v9578_v21 = vpop.xlane.xlu1 %2124  ;;  %v3166_v60 = vadd.f32 %v7194_v32, %v2543_v56  ;;  %v7234_v17 = vpop.f32.mrb[103].mxu1  ;;  %v3229_v15 = vmul.f32 %v7856_v47, %v3165_v61  ;;  %7861 = vrcp.f32 %v2189_v35 }
 0x3ce   :  { %v7858_v62 = vpop.eup %7857  ;;  %v2190_v17 = vadd.f32 %v2110_v28, %v2014_v6  ;;  %7863 = vrcp.f32 %v2188_v45  ;;  %v2177_v6 = vsel %vm613_vm5, %v9337_v39, 0.0 }
 0x3cf   :  { %v3228_v3 = vmul.f32 %v7854_v20, %v3164_v18  ;;  %v2122_v41 = vpop.xlane.xlu0 %2121  ;;  %v3230_v14 = vmul.f32 %v7858_v62, %v3166_v60 }
 0x3d0   :  { %7865 = vrcp.f32 %v2190_v17 }
 0x3d1   :  { %v3259_v13 = vpack.c.bf16 %v3228_v3, %v3227_v0  ;;  %4309 = vrot.lane.b32.xlu0 %v11360_v30, %s8111_s29  ;;  %v9586_v25 = vpop.xlane.xlu1 %2034  ;;  %v3260_v32 = vpack.c.bf16 %v3230_v14, %v3229_v15  ;;  %v2191_v30 = vadd.f32 %v9558_v37, %v9554_v4 }
 0x3d3   :  { %v9588_v7 = vpop.xlane.xlu0 %2031  ;;  %7321 = vmatprep.mubr.msk.bf16.mxu0 %vm613_vm5, %v3259_v13  ;;  %v2584_v51 = vpop.f32.mrb[104].mxu1  ;;  %7867 = vrcp.f32 %v2191_v30  ;;  %v2193_v13 = vadd.f32 %v9568_v22, %v9564_v2 }
 0x3d4   :  { %7322 = vmatmul.mubr.msk.bf16.vlgmr.msra.gmra.mrb[112].mxu0 %vm613_vm5, %v3260_v32  ;;  %v7239_v60 = vpop.f32.mrb[105].mxu1  ;;  %7869 = vrcp.f32 %v2192_v8 }
 0x3d5   :  { %4401 = vrot.lane.b32.xlu0 %v11365_v57, %s8111_s29  ;;  %v9594_v3 = vpop.xlane.xlu1 %2130  ;;  %v2587_v14 = vpop.f32.mrb[106].mxu1  ;;  %2178 = vadd.xlane.f32.xlu1 %v2177_v6  ;;  %v2084_v57 = vsel %vm128_vm1, %v9340_v54, 0.0  ;;  %7871 = vrcp.f32 %v2193_v13 }
 0x3d6   :  { %v7240_v0 = vpop.f32.mrb[107].mxu1  ;;  %v7860_v1 = vpop.eup %7859 }
 0x3d7   :  { %v2128_v18 = vpop.xlane.xlu0 %2127  ;;  %v7862_v61 = vpop.eup %7861 }
 0x3d8   :  { %v7864_v20 = vpop.eup %7863 }
 0x3d9   :  { %5426 = vrot.lane.b32.xlu0 %v8519_v42, %s8110_s21  ;;  %v9602_v45 = vpop.xlane.xlu1 %2154  ;;  %2085 = vadd.xlane.f32.xlu1 %v2084_v57  ;;  %v2180_v42 = vsel %vm613_vm5, %v9348_v55, 0.0  ;;  %v2194_v55 = vadd.f32 %v2122_v41, %v9574_v33 }
 0x3da   :  { %v7197_v38 = vpop.f32.mrb[68].mxu0  ;;  %v7866_v63 = vpop.eup %7865 }
 0x3db   :  { %v9606_v39 = vpop.xlane.xlu0 %2037  ;;  %v2332_v46 = vpop.f32.mrb[69].mxu0  ;;  %7873 = vrcp.f32 %v2194_v55  ;;  %v2197_v55 = vadd.f32 %v9594_v3, %v9586_v25 }
 0x3dc   :  { %v2628_v19 = vpop.f32.mrb[108].mxu1  ;;  %v3167_v44 = vadd.f32 %v2584_v51, %v2332_v46  ;;  %v7198_v28 = vpop.f32.mrb[70].mxu0 }
 0x3dd   :  { %v3169_v37 = vadd.f32 %v7197_v38, %v2628_v19  ;;  %v7245_v4 = vpop.f32.mrb[109].mxu1  ;;  %v2335_v29 = vpop.f32.mrb[71].mxu0  ;;  %2181 = vadd.xlane.f32.xlu1 %v2180_v42 }
 0x3de   :  { %v2631_v54 = vpop.f32.mrb[110].mxu1  ;;  %v3168_v43 = vadd.f32 %v2587_v14, %v2335_v29  ;;  %v9610_v9 = vpop.xlane.xlu1 %2061  ;;  %v3231_v35 = vmul.f32 %v7860_v1, %v3167_v44  ;;  %v2195_v1 = vadd.f32 %v9578_v21, %v9572_v10  ;;  %v2196_v29 = vadd.f32 %v2128_v18, %v9588_v7  ;;  %v11371_v18 = vld [vmem:[#allocation2_spill] sm:$0xff] }
 0x3df   :  { %v3170_v56 = vadd.f32 %v7198_v28, %v2631_v54  ;;  %v7246_v47 = vpop.f32.mrb[111].mxu1  ;;  %v2134_v62 = vpop.xlane.xlu0 %2133  ;;  %v3233_v17 = vmul.f32 %v7862_v61, %v3169_v37 }
 0x3e0   :  { %v3232_v15 = vmul.f32 %v7864_v20, %v3168_v43  ;;  %v7868_v33 = vpop.eup %7867  ;;  %7875 = vrcp.f32 %v2195_v1 }
 0x3e1   :  { %v3234_v32 = vmul.f32 %v7866_v63, %v3170_v56  ;;  %v7870_v28 = vpop.eup %7869  ;;  %7877 = vrcp.f32 %v2196_v29 }
 0x3e2   :  { %v3261_v51 = vpack.c.bf16 %v3232_v15, %v3231_v35  ;;  %v7201_v60 = vpop.f32.mrb[72].mxu0  ;;  %v9615_v6 = vpop.xlane.xlu1 %2157  ;;  %7879 = vrcp.f32 %v2197_v55 }
 0x3e3   :  { %v3262_v14 = vpack.c.bf16 %v3234_v32, %v3233_v17  ;;  %v9617_v0 = vpop.xlane.xlu0 %2046  ;;  %v2348_v30 = vpop.f32.mrb[73].mxu0 }
 0x3e4   :  { %v2672_v57 = vpop.f32.mrb[112].mxu1  ;;  %v7202_v8 = vpop.f32.mrb[74].mxu0  ;;  %7325 = vmatprep.mubr.msk.bf16.mxu0 %vm613_vm5, %v3261_v51 }
 0x3e5   :  { %v7251_v38 = vpop.f32.mrb[113].mxu1  ;;  %v3171_v46 = vadd.f32 %v2672_v57, %v2348_v30  ;;  %v2351_v2 = vpop.f32.mrb[75].mxu0  ;;  %7326 = vmatmul.mubr.msk.bf16.gmra.mrb[116].mxu0 %vm613_vm5, %v3262_v14 }
 0x3e6   :  { %v2675_v22 = vpop.f32.mrb[114].mxu1  ;;  %v9624_v42 = vpop.permute.xlu1 %3534 }
 0x3e7   :  { %v3172_v41 = vadd.f32 %v2675_v22, %v2351_v2  ;;  %v7252_v19 = vpop.f32.mrb[115].mxu1  ;;  %v2143_v44 = vpop.xlane.xlu0 %2142  ;;  %v3235_v37 = vmul.f32 %v7868_v33, %v3171_v46 }
 0x3e8   :  { %v7872_v10 = vpop.eup %7871  ;;  %v2201_v29 = vadd.f32 %v2143_v44, %v9617_v0 }
 0x3e9   :  { %v3236_v4 = vmul.f32 %v7870_v28, %v3172_v41  ;;  %v7874_v32 = vpop.eup %7873 }
 0x3ea   :  { %v7205_v61 = vpop.f32.mrb[76].mxu0  ;;  %v9632_v30 = vpop.permute.xlu1 %3536 }
 0x3eb   :  { %v3263_v54 = vpack.c.bf16 %v3236_v4, %v3235_v37  ;;  %v2050_v43 = vpop.xlane.xlu0 %2049  ;;  %v2364_v20 = vpop.f32.mrb[77].mxu0  ;;  %v11373_v37 = vld [vmem:[#allocation10_spill] sm:$0xff] }
 0x3ec   :  { %v2716_v56 = vpop.f32.mrb[116].mxu1  ;;  %v7206_v47 = vpop.f32.mrb[78].mxu0 }
 0x3ed   :  { %v3173_v63 = vadd.f32 %v7201_v60, %v2716_v56  ;;  %v7257_v35 = vpop.f32.mrb[117].mxu1  ;;  %7329 = vmatprep.mubr.msk.bf16.mxu0 %vm613_vm5, %v3263_v54  ;;  %v2367_v15 = vpop.f32.mrb[79].mxu0  ;;  %v2198_v60 = vadd.f32 %v2134_v62, %v9606_v39 }
 0x3ee   :  { %v2719_v21 = vpop.f32.mrb[118].mxu1  ;;  %3803 = vrot.lane.b32.xlu1 %v11371_v18, %s8111_s29  ;;  %v7876_v62 = vpop.eup %7875 }
 0x3ef   :  { %v3174_v13 = vadd.f32 %v7202_v8, %v2719_v21  ;;  %v7258_v17 = vpop.f32.mrb[119].mxu1  ;;  %v2146_v7 = vpop.xlane.xlu0 %2145  ;;  %v3237_v51 = vmul.f32 %v7872_v10, %v3173_v63  ;;  %v11372_v8 = vld [vmem:[#allocation6_spill] sm:$0xff]  ;;  %7881 = vrcp.f32 %v2198_v60 }
 0x3f0   :  { %v7878_v4 = vpop.eup %7877  ;;  %v9648_v56 = vpop.permute.xlu1 %3538  ;;  %v2202_v63 = vadd.f32 %v2146_v7, %v2050_v43  ;;  %7883 = vrcp.f32 %v2201_v29 }
 0x3f1   :  { %v3238_v14 = vmul.f32 %v7874_v32, %v3174_v13  ;;  %v7880_v32 = vpop.eup %7879 }
 0x3f2   :  { %v7209_v57 = vpop.f32.mrb[80].mxu0  ;;  %3895 = vrot.lane.b32.xlu1 %v11372_v8, %s8111_s29  ;;  %7885 = vrcp.f32 %v2202_v63 }
 0x3f3   :  { %v3264_v38 = vpack.c.bf16 %v3238_v14, %v3237_v51  ;;  %v2059_v46 = vpop.xlane.xlu0 %2058  ;;  %v9634_v2 = vpop.f32.mrb[81].mxu0  ;;  %v2206_v14 = vadd.f32 %v9615_v6, %v9610_v9 }
 0x3f4   :  { %v2760_v22 = vpop.f32.mrb[120].mxu1  ;;  %v9638_v33 = vpop.f32.mrb[82].mxu0  ;;  %v2205_v8 = vadd.f32 %v9602_v45, %v2059_v46 }
 0x3f5   :  { %v3175_v41 = vadd.f32 %v2760_v22, %v2364_v20  ;;  %v7263_v25 = vpop.f32.mrb[121].mxu1  ;;  %7330 = vmatmul.mubr.msk.bf16.gmra.mrb[120].mxu0 %vm613_vm5, %v3264_v38  ;;  %v9641_v3 = vpop.f32.mrb[83].mxu0  ;;  %7887 = vrcp.f32 %v2206_v14 }
 0x3f6   :  { %v2763_v39 = vpop.f32.mrb[122].mxu1  ;;  %3987 = vrot.lane.b32.xlu1 %v11373_v37, %s8111_s29  ;;  %7889 = vrcp.f32 %v2205_v8  ;;  %v2200_v37 = vadd.f32 %v9508_v16, %v9502_v11 }
 0x3f7   :  { %v3176_v19 = vadd.f32 %v2763_v39, %v2367_v15  ;;  %v7264_v28 = vpop.f32.mrb[123].mxu1  ;;  %v9643_v1 = vpop.xlane.xlu0 %2070  ;;  %v3239_v54 = vmul.f32 %v7876_v62, %v3175_v41  ;;  %v11374_v15 = vld [vmem:[#allocation14_spill] sm:$0xff] }
 0x3f8   :  { %v9670_v41 = vpop.permute.xlu1 %3540 }
 0x3f9   :  { %v3240_v20 = vmul.f32 %v7878_v4, %v3176_v19 }
 0x3fa   :  { %v7213_v35 = vpop.f32.mrb[84].mxu0  ;;  %4079 = vrot.lane.b32.xlu1 %v11374_v15, %s8111_s29 }
 0x3fb   :  { %v3265_v21 = vpack.c.bf16 %v3240_v20, %v3239_v54  ;;  %v9650_v10 = vpop.permute.xlu0 %3532  ;;  %v9652_v13 = vpop.f32.mrb[85].mxu0 }
 0x3fc   :  { %v2804_v17 = vpop.f32.mrb[124].mxu1  ;;  %v7214_v18 = vpop.f32.mrb[86].mxu0  ;;  %7371 = vmatprep.mubr.msk.bf16.mxu1 %vm613_vm5, %v9650_v10 }
 0x3fd   :  { %v3177_v0 = vadd.f32 %v7205_v61, %v2804_v17  ;;  %v7269_v44 = vpop.f32.mrb[125].mxu1  ;;  %7333 = vmatprep.mubr.msk.bf16.mxu0 %vm613_vm5, %v3265_v21  ;;  %v9659_v43 = vpop.f32.mrb[87].mxu0  ;;  %7372 = vmatmul.mubr.msk.bf16.gmra.mrb[160].mxu1 %vm613_vm5, %v9624_v42  ;;  %v2203_v17 = vadd.f32 %v9512_v34, %v9510_v53 }
 0x3fe   :  { %v2807_v7 = vpop.f32.mrb[126].mxu1  ;;  %7375 = vmatprep.mubr.msk.bf16.mxu1 %vm613_vm5, %v9632_v30  ;;  %4171 = vrot.lane.b32.xlu1 %v11356_v49, %s8111_s29  ;;  %v7882_v61 = vpop.eup %7881 }
 0x3ff   :  { %v3178_v55 = vadd.f32 %v7206_v47, %v2807_v7  ;;  %v7270_v51 = vpop.f32.mrb[127].mxu1  ;;  %v3241_v60 = vmul.f32 %v7880_v32, %v3177_v0  ;;  %v7884_v6 = vpop.eup %7883  ;;  %v11375_v7 = vld [vmem:[#allocation18_spill] sm:$0xff] }
 0x400   :  { %v7886_v28 = vpop.eup %7885  ;;  %v9690_v20 = vpop.permute.xlu1 %3542 }
 0x401   :  { %v3242_v38 = vmul.f32 %v7882_v61, %v3178_v55  ;;  %v7888_v16 = vpop.eup %7887 }
 0x402   :  { %v7217_v22 = vpop.f32.mrb[88].mxu0  ;;  %4263 = vrot.lane.b32.xlu1 %v11359_v40, %s8111_s29  ;;  %v2199_v40 = vadd.f32 %v9506_v58, %v9500_v26 }
 0x403   :  { %v3266_v25 = vpack.c.bf16 %v3242_v38, %v3241_v60  ;;  %v9672_v39 = vpop.f32.mrb[89].mxu0  ;;  %v2892_v47 = vpop.f32.mrb[128].mxu1 }
 0x404   :  { %v7218_v62 = vpop.f32.mrb[90].mxu0  ;;  %v3181_v49 = vadd.f32 %v7209_v57, %v2892_v47  ;;  %v7281_v19 = vpop.f32.mrb[129].mxu1  ;;  %7891 = vrcp.f32 %v2199_v40 }
 0x405   :  { %7334 = vmatmul.mubr.msk.bf16.gmra.mrb[124].mxu0 %vm613_vm5, %v3266_v25  ;;  %v9677_v9 = vpop.f32.mrb[91].mxu0  ;;  %7376 = vmatmul.mubr.msk.bf16.gmra.mrb[164].mxu1 %vm613_vm5, %v9648_v56  ;;  %v2895_v45 = vpop.f32.mrb[130].mxu1  ;;  %7893 = vrcp.f32 %v2200_v37 }
 0x406   :  { %7379 = vmatprep.mubr.msk.bf16.mxu1 %vm613_vm5, %v9670_v41  ;;  %v3182_v46 = vadd.f32 %v9638_v33, %v2895_v45  ;;  %v7282_v57 = vpop.f32.mrb[131].mxu1  ;;  %4355 = vrot.lane.b32.xlu1 %v11361_v27, %s8111_s29  ;;  %v3245_v4 = vmul.f32 %v7884_v6, %v3181_v49  ;;  %7895 = vrcp.f32 %v2203_v17  ;;  %v2207_v49 = vadd.f32 %v9530_v50, %v9522_v48 }
 0x407   :  { %v2208_v6 = vadd.f32 %v9540_v23, %v9536_v52 }
 0x408   :  { %v3246_v29 = vmul.f32 %v7886_v28, %v3182_v46 }
 0x40a   :  { %v7221_v54 = vpop.f32.mrb[92].mxu0  ;;  %v3268_v63 = vpack.c.bf16 %v3246_v29, %v3245_v4  ;;  %4447 = vrot.lane.b32.xlu1 %v11366_v12, %s8111_s29  ;;  %v7890_v12 = vpop.eup %7889 }
 0x40b   :  { %v9692_v21 = vpop.f32.mrb[93].mxu0  ;;  %v2980_v26 = vpop.f32.mrb[132].mxu1 }
 0x40c   :  { %v7222_v58 = vpop.f32.mrb[94].mxu0  ;;  %v3185_v27 = vadd.f32 %v7213_v35, %v2980_v26  ;;  %v7293_v33 = vpop.f32.mrb[133].mxu1  ;;  %v2204_v35 = vadd.f32 %v9516_v31, %v9514_v36 }
 0x40d   :  { %v9696_v15 = vpop.f32.mrb[95].mxu0  ;;  %7380 = vmatmul.mubr.msk.bf16.gmra.mrb[168].mxu1 %vm613_vm5, %v9690_v20  ;;  %v2983_v11 = vpop.f32.mrb[134].mxu1  ;;  %v2211_v33 = vadd.f32 %v9546_v24, %v9542_v5 }
 0x40e   :  { %v3186_v0 = vadd.f32 %v7214_v18, %v2983_v11  ;;  %v7294_v44 = vpop.f32.mrb[135].mxu1  ;;  %5378 = vrot.lane.b32.xlu1 %v11375_v7, %s8110_s21  ;;  %v3249_v32 = vmul.f32 %v7890_v12, %v3185_v27  ;;  %7897 = vrcp.f32 %v2204_v35  ;;  %v7892_v18 = vpop.eup %7891  ;;  %v11376_v11 = vld [vmem:[#allocation66_spill] sm:$0xff] }
 0x40f   :  { %v7894_v25 = vpop.eup %7893  ;;  %7899 = vrcp.f32 %v2207_v49 }
 0x410   :  { %v3250_v55 = vmul.f32 %v7888_v16, %v3186_v0  ;;  %7901 = vrcp.f32 %v2208_v6  ;;  %v7896_v48 = vpop.eup %7895  ;;  %v11377_v16 = vld [vmem:[#allocation68_spill] sm:$0xff] }
 0x411   :  { %7903 = vrcp.f32 %v2211_v33 }
 0x412   :  { %v2848_v51 = vpop.f32.mrb[96].mxu0  ;;  %v3270_v61 = vpack.c.bf16 %v3250_v55, %v3249_v32  ;;  %5474 = vrot.lane.b32.xlu1 %v8538_v59, %s8110_s21 }
 0x413   :  { %v3179_v14 = vadd.f32 %v2848_v51, %v9634_v2  ;;  %v7275_v60 = vpop.f32.mrb[97].mxu0  ;;  %v3068_v53 = vpop.f32.mrb[136].mxu1 }
 0x414   :  { %v2851_v34 = vpop.f32.mrb[98].mxu0  ;;  %v9709_v38 = vadd.f32 %v7217_v22, %v3068_v53  ;;  %v7305_v8 = vpop.f32.mrb[137].mxu1 }
 0x415   :  { %v3180_v36 = vadd.f32 %v2851_v34, %v9641_v3  ;;  %v7276_v31 = vpop.f32.mrb[99].mxu0  ;;  %v3071_v47 = vpop.f32.mrb[138].mxu1  ;;  %v3243_v2 = vmul.f32 %v7892_v18, %v3179_v14 }
 0x416   :  { %v9714_v45 = vadd.f32 %v7218_v62, %v3071_v47  ;;  %v7306_v59 = vpop.f32.mrb[139].mxu1 }
 0x417   :  { %v3244_v19 = vmul.f32 %v7894_v25, %v3180_v36 }
 0x418   :  { %v7898_v23 = vpop.eup %7897 }
 0x419   :  { %v3267_v40 = vpack.c.bf16 %v3244_v19, %v3243_v2 }
 0x41a   :  { %v2936_v22 = vpop.f32.mrb[100].mxu0 }
 0x41b   :  { %v3183_v46 = vadd.f32 %v2936_v22, %v9652_v13  ;;  %v7287_v3 = vpop.f32.mrb[101].mxu0  ;;  %7337 = vmatprep.mubr.msk.bf16.mxu0 %vm613_vm5, %v3267_v40  ;;  %v3156_v57 = vpop.f32.mrb[140].mxu1 }
 0x41c   :  { %v2939_v28 = vpop.f32.mrb[102].mxu0  ;;  %7338 = vmatmul.mubr.msk.bf16.gmra.mrb[128].mxu0 %vm613_vm5, %v3268_v63  ;;  %v9721_v50 = vadd.f32 %v7221_v54, %v3156_v57  ;;  %v7317_v62 = vpop.f32.mrb[141].mxu1  ;;  %v2212_v63 = vadd.f32 %v11377_v16, %v11376_v11 }
 0x41d   :  { %v3184_v37 = vadd.f32 %v2939_v28, %v9659_v43  ;;  %v7288_v52 = vpop.f32.mrb[103].mxu0  ;;  %v3159_v4 = vpop.f32.mrb[142].mxu1  ;;  %v3247_v29 = vmul.f32 %v7896_v48, %v3183_v46 }
 0x41e   :  { %v9724_v13 = vadd.f32 %v7222_v58, %v3159_v4  ;;  %v7318_v27 = vpop.f32.mrb[143].mxu1  ;;  %v7900_v58 = vpop.eup %7899  ;;  %7905 = vrcp.f32 %v2212_v63 }
 0x41f   :  { %v3248_v26 = vmul.f32 %v7898_v23, %v3184_v37  ;;  %v7902_v35 = vpop.eup %7901  ;;  %v11380_v27 = vmov 0.0  }
 0x420   :  { %v7904_v2 = vpop.eup %7903 }
 0x421   :  { %v3269_v17 = vpack.c.bf16 %v3248_v26, %v3247_v29 }
 0x422   :  { %v3024_v54 = vpop.f32.mrb[104].mxu0 }
 0x423   :  { %v3187_v0 = vadd.f32 %v3024_v54, %v9672_v39  ;;  %v7299_v44 = vpop.f32.mrb[105].mxu0  ;;  %7341 = vmatprep.mubr.msk.bf16.mxu0 %vm613_vm5, %v3269_v17  ;;  %v9732_v43 = vpop.f32.mrb[144].mxu1 }
 0x424   :  { %v3027_v7 = vpop.f32.mrb[106].mxu0  ;;  %7342 = vmatmul.mubr.msk.bf16.gmra.mrb[132].mxu0 %vm613_vm5, %v3270_v61  ;;  %v9735_v12 = vpop.f32.mrb[145].mxu1  ;;  %v4499_v26 = vsel %vm128_vm1, %v9732_v43, -inf }
 0x425   :  { %v3188_v5 = vadd.f32 %v3027_v7, %v9677_v9  ;;  %v7300_v24 = vpop.f32.mrb[107].mxu0  ;;  %v9738_v32 = vpop.f32.mrb[146].mxu1  ;;  %v4493_v39 = vsel %vm128_vm1, %v9735_v12, -inf  ;;  %v3251_v51 = vmul.f32 %v7900_v58, %v3187_v0 }
 0x426   :  { %v2167_v55 = vpop.xlane.xlu1 %2166  ;;  %4494 = vmax.xlane.f32.xlu0 %v4493_v39  ;;  %v9742_v60 = vpop.f32.mrb[147].mxu1  ;;  %v4502_v53 = vsel %vm128_vm1, %v9738_v32, -inf }
 0x427   :  { %v3252_v14 = vmul.f32 %v7902_v35, %v3188_v5  ;;  %11378 = vst [vmem:[#allocation37_spill] sm:$0xff] %v9742_v60  ;;  %v2209_v36 = vadd.f32 %v2167_v55, %v9643_v1  ;;  %v4496_v63 = vsel %vm128_vm1, %v9742_v60, -inf }
 0x428   :  { %v7906_v40 = vpop.eup %7905 }
 0x429   :  { %v3271_v61 = vpack.c.bf16 %v3252_v14, %v3251_v51  ;;  %7907 = vrcp.f32 %v2209_v36 }
 0x42a   :  { %v3112_v34 = vpop.f32.mrb[108].mxu0  ;;  %v2074_v18 = vpop.xlane.xlu1 %2073  ;;  %4503 = vmax.xlane.f32.xlu0 %v4502_v53 }
 0x42b   :  { %v3191_v9 = vadd.f32 %v3112_v34, %v9692_v21  ;;  %v7311_v8 = vpop.f32.mrb[109].mxu0  ;;  %7345 = vmatprep.mubr.msk.bf16.mxu0 %vm613_vm5, %v3271_v61  ;;  %v9749_v31 = vpop.f32.mrb[148].mxu1 }
 0x42c   :  { %v9751_v25 = vpop.xlane.xlu0 %2082  ;;  %v9753_v47 = vpop.f32.mrb[149].mxu1  ;;  %v4511_v24 = vsel %vm128_vm1, %v9749_v31, -inf }
 0x42d   :  { %v3115_v49 = vpop.f32.mrb[110].mxu0  ;;  %v9755_v19 = vpop.f32.mrb[150].mxu1  ;;  %v3255_v46 = vmul.f32 %v7904_v2, %v3191_v9 }
 0x42e   :  { %v3192_v59 = vadd.f32 %v3115_v49, %v9696_v15  ;;  %v7312_v6 = vpop.f32.mrb[111].mxu0  ;;  %v9758_v21 = vpop.f32.mrb[151].mxu1  ;;  %v4514_v22 = vsel %vm128_vm1, %v9755_v19, -inf }
 0x42f   :  { %11379 = vst [vmem:[#allocation51_spill] sm:$0xff] %v9758_v21  ;;  %v2170_v1 = vpop.xlane.xlu1 %2169  ;;  %4515 = vmax.xlane.f32.xlu0 %v4514_v22  ;;  %v4508_v15 = vsel %vm128_vm1, %v9758_v21, -inf }
 0x430   :  { %v3256_v3 = vmul.f32 %v7906_v40, %v3192_v59  ;;  %v2210_v57 = vadd.f32 %v2170_v1, %v2074_v18  ;;  %v9762_v28 = vpop.permute.xlu0 %3544  ;;  %v11384_v1 = vld [vmem:[#allocation32_spill] sm:$0xff] }
 0x431   :  { %7383 = vmatprep.mubr.msk.bf16.mxu1 %vm613_vm5, %v9762_v28 }
 0x432   :  { %v3273_v48 = vpack.c.bf16 %v3256_v3, %v3255_v46  ;;  %7909 = vrcp.f32 %v2210_v57 }
 0x433   :  { %v3758_v62 = vpop.permute.xlu1 %3757  ;;  %v9768_v37 = vpop.f32.mrb[152].mxu1  ;;  %4509 = vmax.xlane.f32.xlu0 %v4508_v15  ;;  %v11385_v15 = vld [vmem:[#allocation33_spill] sm:$0xff] }
 0x434   :  { %v3760_v52 = vsel %vm613_vm5, %v3758_v62, 0  ;;  %v9771_v23 = vpop.permute.xlu0 %3546  ;;  %v9773_v4 = vpop.f32.mrb[153].mxu1  ;;  %v4523_v51 = vsel %vm128_vm1, %v9768_v37, -inf }
 0x435   :  { %7384 = vmatmul.mubr.msk.bf16.gmra.mrb[172].mxu1 %vm613_vm5, %v9771_v23  ;;  %7388 = vmatpush3.bf16.xpose.msra.mxu0 %v3760_v52  ;;  %v9777_v29 = vpop.f32.mrb[154].mxu1  ;;  %v7908_v16 = vpop.eup %7907  ;;  %v4517_v14 = vsel %vm128_vm1, %v9773_v4, -inf  ;;  %v11386_v52 = vld [vmem:[#allocation64_spill] sm:$0xff] }
 0x436   :  { %7395 = vmatprep.mubr.msk.bf16.mxu1 %vm8108_vm4, %v11380_v27  ;;  %7399 = vmatprep.subr.bf16.mxu0 %v11380_v27  ;;  %v9784_v33 = vpop.f32.mrb[155].mxu1  ;;  %v4526_v11 = vsel %vm128_vm1, %v9777_v29, -inf  ;;  %v3253_v7 = vmul.f32 %v7908_v16, %v9709_v38  ;;  %v4505_v38 = vsel %vm128_vm1, %v9753_v47, -inf }
 0x437   :  { %11381 = vst [vmem:[#allocation34_spill] sm:$0xff] %v9784_v33  ;;  %4500 = vmax.xlane.f32.xlu1 %v4499_v26  ;;  %4527 = vmax.xlane.f32.xlu0 %v4526_v11  ;;  %v4520_v17 = vsel %vm128_vm1, %v9784_v33, -inf  ;;  %v11387_v11 = vld [vmem:[#allocation70_spill] sm:$0xff] }
 0x43b   :  { %4497 = vmax.xlane.f32.xlu1 %v4496_v63  ;;  %v9792_v0 = vpop.f32.mrb[156].mxu1  ;;  %4521 = vmax.xlane.f32.xlu0 %v4520_v17 }
 0x43c   :  { %v7910_v54 = vpop.eup %7909  ;;  %v9794_v44 = vpop.f32.mrb[157].mxu1  ;;  %v4535_v61 = vsel %vm128_vm1, %v9792_v0, -inf }
 0x43d   :  { %11382 = vst [vmem:[#allocation54_spill] sm:$0xff] %v9794_v44  ;;  %v3254_v58 = vmul.f32 %v7910_v54, %v9714_v45  ;;  %v9798_v5 = vpop.f32.mrb[158].mxu1  ;;  %v4529_v53 = vsel %vm128_vm1, %v9794_v44, -inf  ;;  %v11388_v54 = vld [vmem:[#allocation48_spill] sm:$0xff]  ;;  %v11421_v44 = vld [vmem:[#allocation21_spill] sm:$0xff] }
 0x43e   :  { %v9802_v35 = vpop.f32.mrb[159].mxu1  ;;  %v4538_v39 = vsel %vm128_vm1, %v9798_v5, -inf }
 0x43f   :  { %11383 = vst [vmem:[#allocation65_spill] sm:$0xff] %v9802_v35  ;;  %4512 = vmax.xlane.f32.xlu1 %v4511_v24  ;;  %v3272_v55 = vpack.c.bf16 %v3254_v58, %v3253_v7  ;;  %4539 = vmax.xlane.f32.xlu0 %v4538_v39  ;;  %v4532_v45 = vsel %vm128_vm1, %v9802_v35, -inf  ;;  %v11389_v58 = vld [vmem:[#allocation50_spill] sm:$0xff] }
 0x441   :  { %7346 = vmatmul.mubr.msk.bf16.gmra.mrb[136].mxu0 %vm613_vm5, %v3272_v55 }
 0x442   :  { %7349 = vmatprep.mubr.msk.bf16.mxu0 %vm613_vm5, %v3273_v48 }
 0x443   :  { %4506 = vmax.xlane.f32.xlu1 %v4505_v38  ;;  %4533 = vmax.xlane.f32.xlu0 %v4532_v45  ;;  %v11390_v38 = vld [vmem:[#allocation49_spill] sm:$0xff] }
 0x447   :  { %4524 = vmax.xlane.f32.xlu1 %v4523_v51 }
 0x44b   :  { %4518 = vmax.xlane.f32.xlu1 %v4517_v14 }
 0x44f   :  { %4536 = vmax.xlane.f32.xlu1 %v4535_v61 }
 0x453   :  { %4530 = vmax.xlane.f32.xlu1 %v4529_v53  ;;  %v11391_v53 = vld [vmem:[#allocation35_spill] sm:$0xff] }
 0x462   :  { %v2179_v34 = vpop.xlane.xlu1 %2178 }
 0x463   :  { %v2213_v9 = vadd.f32 %v2179_v34, %v9751_v25 }
 0x465   :  { %7911 = vrcp.f32 %v2213_v9 }
 0x466   :  { %v2086_v18 = vpop.xlane.xlu1 %2085 }
 0x46a   :  { %v2182_v8 = vpop.xlane.xlu1 %2181 }
 0x46b   :  { %v2214_v36 = vadd.f32 %v2182_v8, %v2086_v18 }
 0x46d   :  { %7913 = vrcp.f32 %v2214_v36 }
 0x46e   :  { %v3804_v49 = vpop.permute.xlu1 %3803 }
 0x46f   :  { %v3806_v2 = vsel %vm613_vm5, %v3804_v49, 0  ;;  %v7912_v6 = vpop.eup %7911 }
 0x470   :  { %7394 = vmatpush3.bf16.xpose.msra.mxu1 %v3806_v2  ;;  %v3257_v25 = vmul.f32 %v7912_v6, %v9721_v50  ;;  %v3850_v50 = vpop.permute.xlu0 %3849 }
 0x471   :  { %7405 = vmatprep.subr.bf16.mxu1 %v11380_v27 }
 0x472   :  { %v3896_v59 = vpop.permute.xlu1 %3895 }
 0x473   :  { %v3898_v22 = vsel %vm613_vm5, %v3896_v59, 0 }
 0x474   :  { %v3942_v16 = vpop.permute.xlu0 %3941 }
 0x475   :  { %v3944_v63 = vsel %vm613_vm5, %v3942_v16, 0 }
 0x476   :  { %v3988_v57 = vpop.permute.xlu1 %3987 }
 0x477   :  { %v7914_v40 = vpop.eup %7913  ;;  %7396 = vmatmul.mubr.msk.bf16.vlgmr.msra.gmra.mrb[176].mxu1 %vm613_vm5, %v11384_v1  ;;  %v3990_v48 = vsel %vm613_vm5, %v3988_v57, 0 }
 0x478   :  { %7406 = vmatpush3.bf16.xpose.msra.mxu1 %v3898_v22  ;;  %v3258_v46 = vmul.f32 %v7914_v40, %v9724_v13  ;;  %7407 = vmatprep.mubr.msk.bf16.mxu1 %vm8108_vm4, %v11380_v27  ;;  %v3852_v13 = vsel %vm613_vm5, %v3850_v50, 0  ;;  %v4034_v24 = vpop.permute.xlu0 %4033 }
 0x479   :  { %7417 = vmatprep.subr.bf16.mxu1 %v11380_v27  ;;  %v4036_v39 = vsel %vm613_vm5, %v4034_v24, 0 }
 0x47a   :  { %v3274_v3 = vpack.c.bf16 %v3258_v46, %v3257_v25  ;;  %v4080_v62 = vpop.permute.xlu1 %4079 }
 0x47b   :  { %v4082_v26 = vsel %vm613_vm5, %v4080_v62, 0 }
 0x47c   :  { %7350 = vmatmul.mubr.msk.bf16.gmra.mrb[140].mxu0 %vm613_vm5, %v3274_v3  ;;  %v4126_v51 = vpop.permute.xlu0 %4125 }
 0x47d   :  { %7389 = vmatprep.mubr.msk.bf16.mxu0 %vm8108_vm4, %v11380_v27  ;;  %v4128_v14 = vsel %vm613_vm5, %v4126_v51, 0 }
 0x47e   :  { %v4172_v17 = vpop.permute.xlu1 %4171 }
 0x47f   :  { %7408 = vmatmul.mubr.msk.bf16.vlgmr.msra.gmra.mrb[180].mxu1 %vm613_vm5, %v11385_v15  ;;  %v4174_v7 = vsel %vm613_vm5, %v4172_v17, 0 }
 0x480   :  { %7418 = vmatpush3.bf16.xpose.msra.mxu1 %v3990_v48  ;;  %7419 = vmatprep.mubr.msk.bf16.mxu1 %vm8108_vm4, %v11380_v27  ;;  %v4218_v34 = vpop.permute.xlu0 %4217 }
 0x481   :  { %7429 = vmatprep.subr.bf16.mxu1 %v11380_v27  ;;  %v4220_v18 = vsel %vm613_vm5, %v4218_v34, 0 }
 0x482   :  { %v4264_v55 = vpop.permute.xlu1 %4263 }
 0x483   :  { %v4266_v45 = vsel %vm613_vm5, %v4264_v55, 0 }
 0x484   :  { %7390 = vmatmul.mubr.msk.bf16.vlgmr.msra.gmra.mrb[144].mxu0 %vm613_vm5, %v11386_v52  ;;  %v4310_v8 = vpop.permute.xlu0 %4309 }
 0x485   :  { %7400 = vmatpush3.bf16.xpose.msra.mxu0 %v3852_v13  ;;  %7401 = vmatprep.mubr.msk.bf16.mxu0 %vm8108_vm4, %v11380_v27 }
 0x486   :  { %7411 = vmatprep.subr.bf16.mxu0 %v11380_v27  ;;  %v4356_v61 = vpop.permute.xlu1 %4355 }
 0x487   :  { %7420 = vmatmul.mubr.msk.bf16.vlgmr.msra.gmra.mrb[184].mxu1 %vm613_vm5, %v11387_v11 }
 0x488   :  { %7430 = vmatpush3.bf16.xpose.msra.mxu1 %v4082_v26  ;;  %7431 = vmatprep.mubr.msk.bf16.mxu1 %vm8108_vm4, %v11380_v27 }
 0x489   :  { %7441 = vmatprep.subr.bf16.mxu1 %v11380_v27 }
 0x48a   :  { %v4448_v9 = vpop.permute.xlu1 %4447 }
 0x48c   :  { %7402 = vmatmul.mubr.msk.bf16.vlgmr.msra.gmra.mrb[148].mxu0 %vm613_vm5, %v11388_v54 }
 0x48d   :  { %7412 = vmatpush3.bf16.xpose.msra.mxu0 %v3944_v63  ;;  %7413 = vmatprep.mubr.msk.bf16.mxu0 %vm8108_vm4, %v11380_v27 }
 0x48e   :  { %7423 = vmatprep.subr.bf16.mxu0 %v11380_v27  ;;  %v5379_v36 = vpop.permute.xlu1 %5378 }
 0x48f   :  { %7432 = vmatmul.mubr.msk.bf16.vlgmr.msra.gmra.mrb[188].mxu1 %vm613_vm5, %v11389_v58 }
 0x490   :  { %7442 = vmatpush3.bf16.xpose.msra.mxu1 %v4174_v7  ;;  %7443 = vmatprep.mubr.msk.bf16.mxu1 %vm8108_vm4, %v11380_v27 }
 0x491   :  { %7453 = vmatprep.subr.bf16.mxu1 %v11380_v27 }
 0x494   :  { %7414 = vmatmul.mubr.msk.bf16.vlgmr.msra.gmra.mrb[152].mxu0 %vm613_vm5, %v11390_v38 }
 0x495   :  { %7424 = vmatpush3.bf16.xpose.msra.mxu0 %v4036_v39  ;;  %7425 = vmatprep.mubr.msk.bf16.mxu0 %vm8108_vm4, %v11380_v27 }
 0x496   :  { %7435 = vmatprep.subr.bf16.mxu0 %v11380_v27 }
 0x497   :  { %7444 = vmatmul.mubr.msk.bf16.vlgmr.msra.gmra.mrb[192].mxu1 %vm613_vm5, %v9624_v42  ;;  %v4358_v42 = vsel %vm613_vm5, %v4356_v61, 0 }
 0x498   :  { %7454 = vmatpush3.bf16.xpose.msra.mxu1 %v4266_v45  ;;  %7455 = vmatprep.mubr.msk.bf16.mxu1 %vm8108_vm4, %v11380_v27 }
 0x499   :  { %7465 = vmatprep.subr.bf16.mxu1 %v11380_v27 }
 0x49c   :  { %7426 = vmatmul.mubr.msk.bf16.vlgmr.msra.gmra.mrb[156].mxu0 %vm613_vm5, %v11391_v53 }
 0x49d   :  { %7436 = vmatpush3.bf16.xpose.msra.mxu0 %v4128_v14  ;;  %7437 = vmatprep.mubr.msk.bf16.mxu0 %vm8108_vm4, %v11380_v27 }
 0x49e   :  { %7447 = vmatprep.subr.bf16.mxu0 %v11380_v27 }
 0x49f   :  { %7456 = vmatmul.mubr.msk.bf16.vlgmr.msra.gmra.mrb[196].mxu1 %vm613_vm5, %v9648_v56  ;;  %v4450_v56 = vsel %vm613_vm5, %v4448_v9, 0 }
 0x4a0   :  { %7466 = vmatpush3.bf16.xpose.msra.mxu1 %v4358_v42  ;;  %7467 = vmatprep.mubr.msk.bf16.mxu1 %vm8108_vm4, %v11380_v27 }
 0x4a1   :  { %7477 = vmatprep.subr.bf16.mxu1 %v11380_v27 }
 0x4a4   :  { %7438 = vmatmul.mubr.msk.bf16.vlgmr.msra.gmra.mrb[160].mxu0 %vm613_vm5, %v9650_v10  ;;  %v4312_v10 = vsel %vm613_vm5, %v4310_v8, 0 }
 0x4a5   :  { %7448 = vmatpush3.bf16.xpose.msra.mxu0 %v4220_v18  ;;  %7449 = vmatprep.mubr.msk.bf16.mxu0 %vm8108_vm4, %v11380_v27 }
 0x4a6   :  { %7459 = vmatprep.subr.bf16.mxu0 %v11380_v27 }
 0x4a7   :  { %7468 = vmatmul.mubr.msk.bf16.vlgmr.msra.gmra.mrb[200].mxu1 %vm613_vm5, %v9690_v20  ;;  %v4402_v20 = vpop.permute.xlu0 %4401 }
 0x4a8   :  { %7478 = vmatpush3.bf16.xpose.msra.mxu1 %v4450_v56  ;;  %7479 = vmatprep.mubr.msk.bf16.mxu1 %vm8108_vm4, %v11380_v27  ;;  %v4404_v49 = vsel %vm613_vm5, %v4402_v20, 0 }
 0x4a9   :  { %7517 = vmatprep.subr.bf16.mxu1 %v11380_v27 }
 0x4ac   :  { %7450 = vmatmul.mubr.msk.bf16.vlgmr.msra.gmra.mrb[164].mxu0 %vm613_vm5, %v9632_v30 }
 0x4ad   :  { %7460 = vmatpush3.bf16.xpose.msra.mxu0 %v4312_v10  ;;  %7461 = vmatprep.mubr.msk.bf16.mxu0 %vm8108_vm4, %v11380_v27 }
 0x4ae   :  { %7471 = vmatprep.subr.bf16.mxu0 %v11380_v27 }
 0x4af   :  { %7480 = vmatmul.mubr.msk.bf16.vlgmr.msra.gmra.mrb[204].mxu1 %vm613_vm5, %v9771_v23 }
 0x4b0   :  { %7518 = vmatpush3.bf16.msra.mxu1 %v5379_v36  ;;  %7519 = vmatprep.mubr.msk.bf16.mxu1 %vm8108_vm4, %v11380_v27 }
 0x4b1   :  { %7523 = vmatprep.subr.bf16.mxu1 %v11380_v27 }
 0x4b4   :  { %7462 = vmatmul.mubr.msk.bf16.vlgmr.msra.gmra.mrb[168].mxu0 %vm613_vm5, %v9670_v41 }
 0x4b5   :  { %7472 = vmatpush3.bf16.xpose.msra.mxu0 %v4404_v49  ;;  %7473 = vmatprep.mubr.msk.bf16.mxu0 %vm8108_vm4, %v11380_v27 }
 0x4bc   :  { %7474 = vmatmul.mubr.msk.bf16.vlgmr.msra.gmra.mrb[172].mxu0 %vm613_vm5, %v9762_v28 }
 0x4d0   :  { %v9918_v30 = vpop.f32.mrb[160].mxu1 }
 0x4d1   :  { %v9920_v23 = vpop.f32.mrb[161].mxu1  ;;  %v4547_v2 = vsel %vm128_vm1, %v9918_v30, -inf }
 0x4d2   :  { %11392 = vst [vmem:[#allocation36_spill] sm:$0xff] %v9920_v23  ;;  %4548 = vmax.xlane.f32.xlu0 %v4547_v2  ;;  %v9924_v59 = vpop.f32.mrb[162].mxu1  ;;  %v4541_v41 = vsel %vm128_vm1, %v9920_v23, -inf  ;;  %v10082_v23 = vpop.permute.xlu1 %5474 }
 0x4d3   :  { %4542 = vmax.xlane.f32.xlu1 %v4541_v41  ;;  %v9928_v6 = vpop.f32.mrb[163].mxu1  ;;  %v4550_v40 = vsel %vm128_vm1, %v9924_v59, -inf  ;;  %11416 = vst [vmem:[#allocation63_spill] sm:$0xff] %v10082_v23 }
 0x4d4   :  { %11393 = vst [vmem:[#allocation55_spill] sm:$0xff] %v9928_v6  ;;  %v4544_v1 = vsel %vm128_vm1, %v9928_v6, -inf }
 0x4d6   :  { %4551 = vmax.xlane.f32.xlu0 %v4550_v40 }
 0x4d8   :  { %v9932_v28 = vpop.f32.mrb[164].mxu1 }
 0x4d9   :  { %v9934_v22 = vpop.f32.mrb[165].mxu1  ;;  %v4559_v57 = vsel %vm128_vm1, %v9932_v28, -inf }
 0x4da   :  { %11394 = vst [vmem:[#allocation71_spill] sm:$0xff] %v9934_v22  ;;  %4545 = vmax.xlane.f32.xlu0 %v4544_v1  ;;  %v9938_v25 = vpop.f32.mrb[166].mxu1  ;;  %v4553_v46 = vsel %vm128_vm1, %v9934_v22, -inf }
 0x4db   :  { %4554 = vmax.xlane.f32.xlu1 %v4553_v46  ;;  %v9942_v3 = vpop.f32.mrb[167].mxu1  ;;  %v4562_v48 = vsel %vm128_vm1, %v9938_v25, -inf }
 0x4dc   :  { %11395 = vst [vmem:[#allocation38_spill] sm:$0xff] %v9942_v3  ;;  %v4556_v13 = vsel %vm128_vm1, %v9942_v3, -inf }
 0x4de   :  { %4560 = vmax.xlane.f32.xlu0 %v4559_v57 }
 0x4df   :  { %4563 = vmax.xlane.f32.xlu1 %v4562_v48 }
 0x4e0   :  { %v9948_v15 = vpop.f32.mrb[168].mxu1 }
 0x4e1   :  { %v9950_v50 = vpop.f32.mrb[169].mxu1  ;;  %v4571_v11 = vsel %vm128_vm1, %v9948_v15, -inf }
 0x4e2   :  { %11396 = vst [vmem:[#allocation56_spill] sm:$0xff] %v9950_v50  ;;  %4557 = vmax.xlane.f32.xlu0 %v4556_v13  ;;  %v9954_v62 = vpop.f32.mrb[170].mxu1  ;;  %v4565_v52 = vsel %vm128_vm1, %v9950_v50, -inf }
 0x4e3   :  { %4566 = vmax.xlane.f32.xlu1 %v4565_v52  ;;  %v9958_v26 = vpop.f32.mrb[171].mxu1  ;;  %v4574_v63 = vsel %vm128_vm1, %v9954_v62, -inf }
 0x4e4   :  { %11397 = vst [vmem:[#allocation67_spill] sm:$0xff] %v9958_v26  ;;  %v4568_v16 = vsel %vm128_vm1, %v9958_v26, -inf }
 0x4e6   :  { %4572 = vmax.xlane.f32.xlu0 %v4571_v11 }
 0x4e7   :  { %4569 = vmax.xlane.f32.xlu1 %v4568_v16 }
 0x4ea   :  { %4575 = vmax.xlane.f32.xlu0 %v4574_v63 }
 0x508   :  { %v9966_v17 = vpop.f32.mrb[172].mxu1 }
 0x509   :  { %11398 = vst [vmem:[#allocation39_spill] sm:$0xff] %v9966_v17  ;;  %v9968_v54 = vpop.f32.mrb[173].mxu1 }
 0x50a   :  { %11399 = vst [vmem:[#allocation57_spill] sm:$0xff] %v9968_v54  ;;  %v9970_v7 = vpop.f32.mrb[174].mxu1  ;;  %v4577_v58 = vsel %vm128_vm1, %v9968_v54, -inf }
 0x50b   :  { %11400 = vst [vmem:[#allocation45_spill] sm:$0xff] %v9970_v7  ;;  %4578 = vmax.xlane.f32.xlu1 %v4577_v58  ;;  %v9974_v24 = vpop.f32.mrb[175].mxu1 }
 0x50c   :  { %11401 = vst [vmem:[#allocation52_spill] sm:$0xff] %v9974_v24  ;;  %v4580_v39 = vsel %vm128_vm1, %v9974_v24, -inf }
 0x50d   :  { %4581 = vmax.xlane.f32.xlu0 %v4580_v39 }
 0x54a   :  { %v9978_v55 = vpop.f32.mrb[176].mxu1 }
 0x54b   :  { %v7397_v38 = vpop.f32.mrb[177].mxu1  ;;  %v4595_v45 = vsel %vm613_vm5, %v9978_v55, -inf }
 0x54c   :  { %4596 = vmax.xlane.f32.xlu1 %v4595_v45  ;;  %v9982_v51 = vpop.f32.mrb[178].mxu1 }
 0x54d   :  { %v7398_v14 = vpop.f32.mrb[179].mxu1  ;;  %v4598_v61 = vsel %vm613_vm5, %v9982_v51, -inf }
 0x54e   :  { %4599 = vmax.xlane.f32.xlu0 %v4598_v61 }
 0x552   :  { %v9986_v53 = vpop.f32.mrb[180].mxu1 }
 0x553   :  { %v7409_v42 = vpop.f32.mrb[181].mxu1  ;;  %v4607_v34 = vsel %vm613_vm5, %v9986_v53, -inf }
 0x554   :  { %4608 = vmax.xlane.f32.xlu1 %v4607_v34  ;;  %v9990_v18 = vpop.f32.mrb[182].mxu1 }
 0x555   :  { %v7410_v9 = vpop.f32.mrb[183].mxu1  ;;  %v4610_v56 = vsel %vm613_vm5, %v9990_v18, -inf }
 0x556   :  { %4611 = vmax.xlane.f32.xlu0 %v4610_v56 }
 0x557   :  { %v9994_v8 = vpop.f32.mrb[144].mxu0 }
 0x558   :  { %v7391_v10 = vpop.f32.mrb[145].mxu0 }
 0x559   :  { %v9996_v36 = vpop.f32.mrb[146].mxu0 }
 0x55a   :  { %11402 = vst [vmem:[#allocation40_spill] sm:$0xff] %v9996_v36  ;;  %v7392_v20 = vpop.f32.mrb[147].mxu0  ;;  %v9998_v49 = vpop.f32.mrb[184].mxu1 }
 0x55b   :  { %v7421_v2 = vpop.f32.mrb[185].mxu1  ;;  %v4619_v41 = vsel %vm613_vm5, %v9998_v49, -inf }
 0x55c   :  { %4620 = vmax.xlane.f32.xlu1 %v4619_v41  ;;  %v10002_v40 = vpop.f32.mrb[186].mxu1 }
 0x55d   :  { %v7422_v1 = vpop.f32.mrb[187].mxu1  ;;  %v4622_v46 = vsel %vm613_vm5, %v10002_v40, -inf }
 0x55e   :  { %4623 = vmax.xlane.f32.xlu0 %v4622_v46 }
 0x55f   :  { %v10006_v57 = vpop.f32.mrb[148].mxu0 }
 0x560   :  { %v7403_v48 = vpop.f32.mrb[149].mxu0 }
 0x561   :  { %v10008_v13 = vpop.f32.mrb[150].mxu0 }
 0x562   :  { %11403 = vst [vmem:[#allocation58_spill] sm:$0xff] %v10008_v13  ;;  %v7404_v52 = vpop.f32.mrb[151].mxu0  ;;  %v10010_v11 = vpop.f32.mrb[188].mxu1 }
 0x563   :  { %v7433_v16 = vpop.f32.mrb[189].mxu1  ;;  %v4631_v63 = vsel %vm613_vm5, %v10010_v11, -inf }
 0x564   :  { %4632 = vmax.xlane.f32.xlu1 %v4631_v63  ;;  %v10014_v58 = vpop.f32.mrb[190].mxu1 }
 0x565   :  { %v7434_v39 = vpop.f32.mrb[191].mxu1  ;;  %v4634_v38 = vsel %vm613_vm5, %v10014_v58, -inf }
 0x566   :  { %4635 = vmax.xlane.f32.xlu0 %v4634_v38 }
 0x567   :  { %v10018_v45 = vpop.f32.mrb[152].mxu0 }
 0x568   :  { %11404 = vst [vmem:[#allocation69_spill] sm:$0xff] %v10018_v45  ;;  %v7415_v14 = vpop.f32.mrb[153].mxu0 }
 0x569   :  { %v10020_v61 = vpop.f32.mrb[154].mxu0 }
 0x56a   :  { %11405 = vst [vmem:[#allocation41_spill] sm:$0xff] %v10020_v61  ;;  %v7416_v42 = vpop.f32.mrb[155].mxu0  ;;  %v10022_v34 = vpop.f32.mrb[192].mxu1 }
 0x56b   :  { %v7445_v9 = vpop.f32.mrb[193].mxu1  ;;  %v4643_v56 = vsel %vm613_vm5, %v10022_v34, -inf }
 0x56c   :  { %4644 = vmax.xlane.f32.xlu0 %v4643_v56  ;;  %v10026_v10 = vpop.f32.mrb[194].mxu1 }
 0x56d   :  { %v7446_v20 = vpop.f32.mrb[195].mxu1  ;;  %v4646_v41 = vsel %vm613_vm5, %v10026_v10, -inf }
 0x56f   :  { %v10028_v2 = vpop.f32.mrb[156].mxu0 }
 0x570   :  { %11406 = vst [vmem:[#allocation59_spill] sm:$0xff] %v10028_v2  ;;  %v7427_v1 = vpop.f32.mrb[157].mxu0  ;;  %4647 = vmax.xlane.f32.xlu0 %v4646_v41 }
 0x571   :  { %v10032_v46 = vpop.f32.mrb[158].mxu0 }
 0x572   :  { %11407 = vst [vmem:[#allocation47_spill] sm:$0xff] %v10032_v46  ;;  %v7428_v48 = vpop.f32.mrb[159].mxu0  ;;  %v10034_v52 = vpop.f32.mrb[196].mxu1 }
 0x573   :  { %v7457_v16 = vpop.f32.mrb[197].mxu1  ;;  %v4655_v63 = vsel %vm613_vm5, %v10034_v52, -inf }
 0x574   :  { %4656 = vmax.xlane.f32.xlu1 %v4655_v63  ;;  %v10038_v39 = vpop.f32.mrb[198].mxu1  ;;  %v4601_v63 = vsel %vm613_vm5, %v10006_v57, -inf }
 0x575   :  { %v7458_v38 = vpop.f32.mrb[199].mxu1  ;;  %v4658_v42 = vsel %vm613_vm5, %v10038_v39, -inf }
 0x576   :  { %v10054_v38 = vpop.permute.xlu0 %5426 }
 0x577   :  { %v10040_v14 = vpop.f32.mrb[160].mxu0  ;;  %11410 = vst [vmem:[#allocation60_spill] sm:$0xff] %v10054_v38 }
 0x578   :  { %11408 = vst [vmem:[#allocation53_spill] sm:$0xff] %v10040_v14  ;;  %v7439_v9 = vpop.f32.mrb[161].mxu0  ;;  %4659 = vmax.xlane.f32.xlu1 %v4658_v42 }
 0x579   :  { %v10044_v56 = vpop.f32.mrb[162].mxu0 }
 0x57a   :  { %11409 = vst [vmem:[#allocation42_spill] sm:$0xff] %v10044_v56  ;;  %v7440_v20 = vpop.f32.mrb[163].mxu0  ;;  %v10046_v41 = vpop.f32.mrb[200].mxu1 }
 0x57b   :  { %v7469_v1 = vpop.f32.mrb[201].mxu1  ;;  %v4667_v48 = vsel %vm613_vm5, %v10046_v41, -inf }
 0x57c   :  { %4668 = vmax.xlane.f32.xlu0 %v4667_v48  ;;  %v10050_v16 = vpop.f32.mrb[202].mxu1  ;;  %4602 = vmax.xlane.f32.xlu1 %v4601_v63  ;;  %v4613_v1 = vsel %vm613_vm5, %v10018_v45, -inf  ;;  %v10062_v48 = vpop.xlane.xlu0 %4494 }
 0x57d   :  { %v7470_v9 = vpop.f32.mrb[203].mxu1  ;;  %v4670_v20 = vsel %vm613_vm5, %v10050_v16, -inf }
 0x57e   :  { %v4589_v9 = vsel %vm613_vm5, %v9994_v8, -inf }
 0x57f   :  { %v10056_v42 = vpop.f32.mrb[164].mxu0 }
 0x580   :  { %11411 = vst [vmem:[#allocation43_spill] sm:$0xff] %v10056_v42  ;;  %4671 = vmax.xlane.f32.xlu0 %v4670_v20  ;;  %v7451_v24 = vpop.f32.mrb[165].mxu0  ;;  %4614 = vmax.xlane.f32.xlu1 %v4613_v1  ;;  %v4625_v20 = vsel %vm613_vm5, %v10028_v2, -inf  ;;  %v10074_v50 = vpop.xlane.xlu0 %4503 }
 0x581   :  { %v10064_v54 = vpop.f32.mrb[166].mxu0 }
 0x582   :  { %11412 = vst [vmem:[#allocation61_spill] sm:$0xff] %v10064_v54  ;;  %v7452_v3 = vpop.f32.mrb[167].mxu0  ;;  %v10066_v26 = vpop.f32.mrb[204].mxu1 }
 0x583   :  { %11413 = vst [vmem:[#allocation44_spill] sm:$0xff] %v10066_v26  ;;  %v7481_v63 = vpop.f32.mrb[205].mxu1  ;;  %v4592_v3 = vsel %vm613_vm5, %v9996_v36, -inf }
 0x584   :  { %v10070_v22 = vpop.f32.mrb[206].mxu1  ;;  %4590 = vmax.xlane.f32.xlu0 %v4589_v9  ;;  %4626 = vmax.xlane.f32.xlu1 %v4625_v20  ;;  %v4637_v63 = vsel %vm613_vm5, %v10040_v14, -inf  ;;  %v4604_v20 = vsel %vm613_vm5, %v10008_v13, -inf  ;;  %v10090_v35 = vpop.xlane.xlu0 %4515 }
 0x585   :  { %11414 = vst [vmem:[#allocation62_spill] sm:$0xff] %v10070_v22  ;;  %v7482_v24 = vpop.f32.mrb[207].mxu1 }
 0x586   :  { %v4586_v24 = vsel %vm128_vm1, %v9970_v7, -inf }
 0x587   :  { %v10076_v1 = vpop.f32.mrb[168].mxu0 }
 0x588   :  { %11415 = vst [vmem:[#allocation46_spill] sm:$0xff] %v10076_v1  ;;  %4593 = vmax.xlane.f32.xlu0 %v4592_v3  ;;  %v7463_v6 = vpop.f32.mrb[169].mxu0  ;;  %4638 = vmax.xlane.f32.xlu1 %v4637_v63  ;;  %v10092_v3 = vpop.xlane.xlu1 %4500 }
 0x589   :  { %v10084_v9 = vpop.f32.mrb[170].mxu0  ;;  %v4616_v6 = vsel %vm613_vm5, %v10020_v61, -inf  ;;  %v10102_v7 = vpop.xlane.xlu0 %4509  ;;  %v4682_v61 = vsel %vm613_vm5, %v10070_v22, -inf }
 0x58a   :  { %11417 = vst [vmem:[#allocation4_spill] sm:$0xff] %v10084_v9  ;;  %v7464_v38 = vpop.f32.mrb[171].mxu0  ;;  %11419 = vst [vmem:[#allocation8_spill] sm:$0xff] %v10102_v7 }
 0x58b   :  { %v4679_v38 = vsel %vm613_vm5, %v10066_v26, -inf }
 0x58c   :  { %4605 = vmax.xlane.f32.xlu0 %v4604_v20  ;;  %4587 = vmax.xlane.f32.xlu1 %v4586_v24  ;;  %v10104_v33 = vpop.xlane.xlu1 %4497  ;;  %v4628_v24 = vsel %vm613_vm5, %v10032_v46, -inf  ;;  %v597_v46 = vld [vmem:[%s11109_s7 + $0x4] sm:$0xf] }
 0x58f   :  { %v10094_v14 = vpop.f32.mrb[172].mxu0 }
 0x590   :  { %11418 = vst [vmem:[#allocation9_spill] sm:$0xff] %v10094_v14  ;;  %4617 = vmax.xlane.f32.xlu0 %v4616_v6  ;;  %v7475_v63 = vpop.f32.mrb[173].mxu0  ;;  %4680 = vmax.xlane.f32.xlu1 %v4679_v38  ;;  %v10110_v6 = vpop.xlane.xlu0 %4527 }
 0x591   :  { %v10100_v20 = vpop.f32.mrb[174].mxu0  ;;  %v10112_v26 = vpop.xlane.xlu1 %4512 }
 0x592   :  { %v7476_v23 = vpop.f32.mrb[175].mxu0 }
 0x594   :  { %4629 = vmax.xlane.f32.xlu0 %v4628_v24  ;;  %4683 = vmax.xlane.f32.xlu1 %v4682_v61  ;;  %v10114_v38 = vpop.xlane.xlu0 %4521  ;;  %v11422_v24 = vld [vmem:[#allocation19_spill] sm:$0xff] }
 0x595   :  { %11420 = vst [vmem:[#allocation13_spill] sm:$0xff] %v10114_v38  ;;  %v10116_v63 = vpop.xlane.xlu1 %4506  ;;  %v599_v38 = vpack.c.bf16 %v597_v46, %v597_v46 }
 0x597   :  { %7717 = vmatprep.subr.msk.bf16.mxu0 %vm177_vm0, %v599_v38  ;;  %v5198_v13 = vsel %vm177_vm0, %v599_v38, 0 }
 0x598   :  { %v10118_v23 = vpop.xlane.xlu0 %4539  ;;  %7484 = vmatpush3.bf16.msra.mxu0 %v5198_v13  ;;  %v4640_v13 = vsel %vm613_vm5, %v10044_v56, -inf }
 0x599   :  { %v10120_v2 = vpop.xlane.xlu1 %4524  ;;  %7565 = vmatprep.subr.bf16.mxu0 %v11380_v27  ;;  %v4661_v27 = vsel %vm613_vm5, %v10076_v1, -inf }
 0x59c   :  { %v10126_v22 = vpop.xlane.xlu0 %4533 }
 0x59d   :  { %11423 = vst [vmem:[#allocation12_spill] sm:$0xff] %v10126_v22  ;;  %v10128_v61 = vpop.xlane.xlu1 %4518 }
 0x5a0   :  { %v10135_v21 = vpop.xlane.xlu0 %4548 }
 0x5a5   :  { %5570 = vrot.lane.b32.xlu1 %v11421_v44, %s8110_s21  ;;  %v10138_v44 = vpop.xlane.xlu1 %4536 }
 0x5a9   :  { %v10142_v22 = vpop.xlane.xlu1 %4530 }
 0x5aa   :  { %5522 = vrot.lane.b32.xlu0 %v11422_v24, %s8110_s21  ;;  %v10140_v24 = vpop.xlane.xlu0 %4551  ;;  %11424 = vst [vmem:[#allocation5_spill] sm:$0xff] %v10142_v22 }
 0x5ad   :  { %v10144_v45 = vpop.xlane.xlu1 %4542 }
 0x5ae   :  { %11425 = vst [vmem:[#allocation3_spill] sm:$0xff] %v10144_v45  ;;  %v10146_v7 = vpop.xlane.xlu0 %4545  ;;  %v4664_v45 = vsel %vm613_vm5, %v10084_v9, -inf }
 0x5af   :  { %11426 = vst [vmem:[#allocation17_spill] sm:$0xff] %v10146_v7  ;;  %v4649_v7 = vsel %vm613_vm5, %v10056_v42, -inf }
 0x5b1   :  { %v10148_v46 = vpop.xlane.xlu1 %4554 }
 0x5b2   :  { %11427 = vst [vmem:[#allocation16_spill] sm:$0xff] %v10148_v46  ;;  %v10150_v36 = vpop.xlane.xlu0 %4560 }
 0x5b5   :  { %v10152_v38 = vpop.xlane.xlu1 %4563 }
 0x5b6   :  { %v10154_v60 = vpop.xlane.xlu0 %4557 }
 0x5b7   :  { %11428 = vst [vmem:[#allocation7_spill] sm:$0xff] %v10154_v60  ;;  %v4652_v60 = vsel %vm613_vm5, %v10064_v54, -inf }
 0x5b9   :  { %v10160_v22 = vpop.xlane.xlu1 %4566 }
 0x5ba   :  { %11429 = vst [vmem:[#allocation11_spill] sm:$0xff] %v10160_v22  ;;  %v10164_v46 = vpop.xlane.xlu0 %4572 }
 0x5be   :  { %v10172_v1 = vpop.xlane.xlu0 %4575 }
 0x5c2   :  { %v10178_v42 = vpop.xlane.xlu0 %4581 }
 0x5c3   :  { %11432 = vst [vmem:[#allocation6_spill] sm:$0xff] %v10178_v42 }
 0x5c9   :  { %4641 = vmax.xlane.f32.xlu0 %v4640_v13  ;;  %4662 = vmax.xlane.f32.xlu1 %v4661_v27  ;;  %v10170_v13 = vpop.xlane.xlu1 %4569  ;;  %v4583_v27 = vsel %vm128_vm1, %v9966_v17, -inf }
 0x5ca   :  { %11430 = vst [vmem:[#allocation15_spill] sm:$0xff] %v10170_v13 }
 0x5cd   :  { %4650 = vmax.xlane.f32.xlu0 %v4649_v7  ;;  %4665 = vmax.xlane.f32.xlu1 %v4664_v45  ;;  %v10176_v56 = vpop.xlane.xlu1 %4578  ;;  %v4673_v7 = vsel %vm613_vm5, %v10094_v14, -inf }
 0x5ce   :  { %11431 = vst [vmem:[#allocation2_spill] sm:$0xff] %v10176_v56  ;;  %v4676_v56 = vsel %vm613_vm5, %v10100_v20, -inf }
 0x5d1   :  { %4653 = vmax.xlane.f32.xlu0 %v4652_v60 }
 0x5d5   :  { %4584 = vmax.xlane.f32.xlu0 %v4583_v27 }
 0x5d9   :  { %v4597_v45 = vpop.xlane.xlu1 %4596  ;;  %4674 = vmax.xlane.f32.xlu0 %v4673_v7  ;;  %v11433_v7 = vld [vmem:[#allocation20_spill] sm:$0xff] }
 0x5da   :  { %v4687_v54 = vmax.f32 %v10092_v3, %v4597_v45 }
 0x5db   :  { %v4600_v9 = vpop.xlane.xlu0 %4599 }
 0x5dc   :  { %v4719_v60 = vsub.f32 %v9732_v43, %v4687_v54  ;;  %v4815_v13 = vsub.f32 %v9978_v55, %v4687_v54  ;;  %v4688_v22 = vmax.f32 %v10074_v50, %v4600_v9  ;;  %v11434_v54 = vld [vmem:[#allocation22_spill] sm:$0xff] }
 0x5dd   :  { %4677 = vmax.xlane.f32.xlu0 %v4676_v56 }
 0x5de   :  { %v4753_v27 = vmul.f32 1.442695, %v4719_v60  ;;  %v4720_v42 = vsub.f32 %v9738_v32, %v4688_v22  ;;  %v4816_v14 = vsub.f32 %v9982_v51, %v4688_v22  ;;  %5618 = vrot.lane.b32.xlu1 %v11433_v7, %s8110_s21  ;;  %v4849_v3 = vmul.f32 1.442695, %v4815_v13 }
 0x5e0   :  { %v4755_v45 = vmul.f32 1.442695, %v4720_v42  ;;  %v4851_v17 = vmul.f32 1.442695, %v4816_v14  ;;  %7915 = vpow2.f32 %v4753_v27 }
 0x5e1   :  { %v4609_v43 = vpop.xlane.xlu1 %4608 }
 0x5e2   :  { %7917 = vpow2.f32 %v4755_v45  ;;  %v4691_v50 = vmax.f32 %v10112_v26, %v4609_v43  ;;  %5714 = vrot.lane.b32.xlu1 %v11434_v54, %s8110_s21  ;;  %v11435_v26 = vld [vmem:[#allocation25_spill] sm:$0xff] }
 0x5e3   :  { %7919 = vpow2.f32 %v4851_v17  ;;  %v4612_v55 = vpop.xlane.xlu0 %4611 }
 0x5e4   :  { %7921 = vpow2.f32 %v4849_v3  ;;  %v4723_v32 = vsub.f32 %v9749_v31, %v4691_v50  ;;  %v4819_v22 = vsub.f32 %v9986_v53, %v4691_v50  ;;  %v4692_v51 = vmax.f32 %v10090_v35, %v4612_v55  ;;  %v11436_v35 = vld [vmem:[#allocation24_spill] sm:$0xff] }
 0x5e6   :  { %v4761_v56 = vmul.f32 1.442695, %v4723_v32  ;;  %v4857_v42 = vmul.f32 1.442695, %v4819_v22  ;;  %v4724_v14 = vsub.f32 %v9755_v19, %v4692_v51  ;;  %v4820_v9 = vsub.f32 %v9990_v18, %v4692_v51  ;;  %5762 = vrot.lane.b32.xlu1 %v11435_v26, %s8110_s21  ;;  %v11437_v22 = vld [vmem:[#allocation27_spill] sm:$0xff] }
 0x5e8   :  { %7923 = vpow2.f32 %v4761_v56  ;;  %v4763_v17 = vmul.f32 1.442695, %v4724_v14  ;;  %v4859_v13 = vmul.f32 1.442695, %v4820_v9  ;;  %v11439_v14 = vld [vmem:[#allocation23_spill] sm:$0xff] }
 0x5e9   :  { %7925 = vpow2.f32 %v4857_v42  ;;  %v4621_v60 = vpop.xlane.xlu1 %4620 }
 0x5ea   :  { %7927 = vpow2.f32 %v4763_v17  ;;  %v4695_v31 = vmax.f32 %v10120_v2, %v4621_v60  ;;  %v10203_v53 = vpop.eup %7915  ;;  %5810 = vrot.lane.b32.xlu1 %v11436_v35, %s8110_s21 }
 0x5eb   :  { %7929 = vpow2.f32 %v4859_v13  ;;  %v4624_v19 = vpop.xlane.xlu0 %4623 }
 0x5ec   :  { %v10207_v27 = vpop.eup %7917  ;;  %v4727_v18 = vsub.f32 %v9768_v37, %v4695_v31  ;;  %v4823_v7 = vsub.f32 %v9998_v49, %v4695_v31  ;;  %v4696_v3 = vmax.f32 %v10110_v6, %v4624_v19 }
 0x5ed   :  { %v10212_v45 = vpop.eup %7919  ;;  %v5134_v2 = vpack.c.bf16 %v10207_v27, %v10203_v53 }
 0x5ee   :  { %v10216_v43 = vpop.eup %7921  ;;  %v4769_v50 = vmul.f32 1.442695, %v4727_v18  ;;  %v4865_v54 = vmul.f32 1.442695, %v4823_v7  ;;  %v4728_v55 = vsub.f32 %v9777_v29, %v4696_v3  ;;  %v4824_v32 = vsub.f32 %v10002_v40, %v4696_v3  ;;  %5858 = vrot.lane.b32.xlu1 %v11437_v22, %s8110_s21  ;;  %v11438_v40 = vld [vmem:[#allocation26_spill] sm:$0xff]  ;;  %v11440_v3 = vld [vmem:[#allocation28_spill] sm:$0xff] }
 0x5ef   :  { %v5362_v37 = vpack.c.bf16 %v10212_v45, %v10216_v43 }
 0x5f0   :  { %7931 = vpow2.f32 %v4769_v50  ;;  %v4771_v49 = vmul.f32 1.442695, %v4728_v55  ;;  %v4867_v6 = vmul.f32 1.442695, %v4824_v32 }
 0x5f1   :  { %7933 = vpow2.f32 %v4865_v54  ;;  %v4633_v56 = vpop.xlane.xlu1 %4632 }
 0x5f2   :  { %v10224_v51 = vpop.eup %7923  ;;  %7935 = vpow2.f32 %v4771_v49  ;;  %v4699_v29 = vmax.f32 %v10138_v44, %v4633_v56  ;;  %5906 = vrot.lane.b32.xlu1 %v11438_v40, %s8110_s21 }
 0x5f3   :  { %v10226_v42 = vpop.eup %7925  ;;  %7937 = vpow2.f32 %v4867_v6  ;;  %5666 = vrot.lane.b32.xlu0 %v11439_v14, %s8110_s21  ;;  %v4636_v26 = vpop.xlane.xlu0 %4635 }
 0x5f4   :  { %v10233_v9 = vpop.eup %7927  ;;  %v4731_v13 = vsub.f32 %v9792_v0, %v4699_v29  ;;  %v4827_v60 = vsub.f32 %v10010_v11, %v4699_v29  ;;  %v4700_v31 = vmax.f32 %v10118_v23, %v4636_v26  ;;  %v11441_v0 = vld [vmem:[#allocation29_spill] sm:$0xff] }
 0x5f5   :  { %v10235_v17 = vpop.eup %7929  ;;  %v5136_v44 = vpack.c.bf16 %v10233_v9, %v10224_v51 }
 0x5f6   :  { %v5364_v35 = vpack.c.bf16 %v10235_v17, %v10226_v42  ;;  %v4777_v19 = vmul.f32 1.442695, %v4731_v13  ;;  %v4732_v18 = vsub.f32 %v9798_v5, %v4700_v31  ;;  %v4828_v7 = vsub.f32 %v10014_v58, %v4700_v31  ;;  %6002 = vrot.lane.b32.xlu1 %v11440_v3, %s8110_s21  ;;  %v11442_v5 = vld [vmem:[#allocation30_spill] sm:$0xff]  ;;  %v11443_v58 = vld [vmem:[#allocation31_spill] sm:$0xff] }
 0x5f7   :  { %5954 = vrot.lane.b32.xlu0 %v11441_v0, %s8110_s21  ;;  %v4873_v11 = vmul.f32 1.442695, %v4827_v60 }
 0x5f8   :  { %v4779_v50 = vmul.f32 1.442695, %v4732_v18  ;;  %v4875_v23 = vmul.f32 1.442695, %v4828_v7  ;;  %7939 = vpow2.f32 %v4777_v19 }
 0x5f9   :  { %v4645_v55 = vpop.xlane.xlu0 %4644 }
 0x5fa   :  { %v10250_v54 = vpop.eup %7931  ;;  %7941 = vpow2.f32 %v4779_v50  ;;  %6098 = vrot.lane.b32.xlu1 %v11442_v5, %s8110_s21  ;;  %v4703_v40 = vmax.f32 %v10135_v21, %v4645_v55 }
 0x5fb   :  { %v10252_v32 = vpop.eup %7933  ;;  %6050 = vrot.lane.b32.xlu0 %v11443_v58, %s8110_s21  ;;  %7943 = vpow2.f32 %v4875_v23 }
 0x5fc   :  { %v10258_v22 = vpop.eup %7935  ;;  %7945 = vpow2.f32 %v4873_v11  ;;  %v4735_v60 = vsub.f32 %v9918_v30, %v4703_v40  ;;  %v4831_v19 = vsub.f32 %v10022_v34, %v4703_v40 }
 0x5fd   :  { %v10260_v49 = vpop.eup %7937  ;;  %v5138_v6 = vpack.c.bf16 %v10258_v22, %v10250_v54  ;;  %v4648_v29 = vpop.xlane.xlu0 %4647 }
 0x5fe   :  { %v5366_v56 = vpack.c.bf16 %v10260_v49, %v10252_v32  ;;  %v4704_v14 = vmax.f32 %v10140_v24, %v4648_v29  ;;  %v4785_v50 = vmul.f32 1.442695, %v4735_v60  ;;  %v4881_v23 = vmul.f32 1.442695, %v4831_v19 }
 0x600   :  { %v4736_v3 = vsub.f32 %v9924_v59, %v4704_v14  ;;  %v4832_v11 = vsub.f32 %v10026_v10, %v4704_v14  ;;  %7947 = vpow2.f32 %v4785_v50 }
 0x601   :  { %v4657_v26 = vpop.xlane.xlu1 %4656  ;;  %7949 = vpow2.f32 %v4881_v23 }
 0x602   :  { %v10268_v13 = vpop.eup %7939  ;;  %v4707_v18 = vmax.f32 %v10150_v36, %v4657_v26  ;;  %v4787_v5 = vmul.f32 1.442695, %v4736_v3  ;;  %v4883_v26 = vmul.f32 1.442695, %v4832_v11 }
 0x604   :  { %v10271_v31 = vpop.eup %7941  ;;  %v4739_v36 = vsub.f32 %v9932_v28, %v4707_v18  ;;  %v4835_v28 = vsub.f32 %v10034_v52, %v4707_v18  ;;  %7951 = vpow2.f32 %v4787_v5 }
 0x605   :  { %v10275_v7 = vpop.eup %7943  ;;  %v4660_v0 = vpop.xlane.xlu1 %4659  ;;  %v5140_v21 = vpack.c.bf16 %v10271_v31, %v10268_v13  ;;  %7953 = vpow2.f32 %v4883_v26 }
 0x606   :  { %v10280_v24 = vpop.eup %7945  ;;  %v4708_v30 = vmax.f32 %v10152_v38, %v4660_v0  ;;  %v4793_v60 = vmul.f32 1.442695, %v4739_v36 }
 0x608   :  { %v4740_v55 = vsub.f32 %v9938_v25, %v4708_v30  ;;  %v4836_v58 = vsub.f32 %v10038_v39, %v4708_v30  ;;  %v4889_v30 = vmul.f32 1.442695, %v4835_v28  ;;  %v11446_v28 = vld [vmem:[#allocation5_spill] sm:$0xff] }
 0x609   :  { %v4669_v59 = vpop.xlane.xlu0 %4668  ;;  %v4603_v40 = vpop.xlane.xlu1 %4602 }
 0x60a   :  { %v4711_v29 = vmax.f32 %v10164_v46, %v4669_v59  ;;  %v4795_v10 = vmul.f32 1.442695, %v4740_v55  ;;  %v4689_v14 = vmax.f32 %v10116_v63, %v4603_v40  ;;  %v4891_v25 = vmul.f32 1.442695, %v4836_v58  ;;  %v10303_v5 = vpop.eup %7947 }
 0x60b   :  { %v10308_v40 = vpop.eup %7949 }
 0x60c   :  { %v4743_v38 = vsub.f32 %v9948_v15, %v4711_v29  ;;  %v4839_v0 = vsub.f32 %v10046_v41, %v4711_v29  ;;  %7955 = vpow2.f32 %v4795_v10  ;;  %v4721_v11 = vsub.f32 %v9753_v47, %v4689_v14 }
 0x60d   :  { %v4672_v19 = vpop.xlane.xlu0 %4671  ;;  %v4615_v39 = vpop.xlane.xlu1 %4614  ;;  %7957 = vpow2.f32 %v4793_v60  ;;  %v4817_v52 = vsub.f32 %v10006_v57, %v4689_v14 }
 0x60e   :  { %v4712_v3 = vmax.f32 %v10172_v1, %v4672_v19  ;;  %v4801_v46 = vmul.f32 1.442695, %v4743_v38  ;;  %7959 = vpow2.f32 %v4891_v25  ;;  %v4897_v41 = vmul.f32 1.442695, %v4839_v0  ;;  %v11445_v38 = vld [vmem:[#allocation40_spill] sm:$0xff] }
 0x60f   :  { %v4693_v55 = vmax.f32 %v10128_v61, %v4615_v39  ;;  %v4757_v47 = vmul.f32 1.442695, %v4721_v11  ;;  %v4853_v59 = vmul.f32 1.442695, %v4817_v52  ;;  %v4918_v25 = vsel %vm128_vm1, %v10207_v27, 0.0 }
 0x610   :  { %v4744_v15 = vsub.f32 %v9954_v62, %v4712_v3  ;;  %v4840_v63 = vsub.f32 %v10050_v16, %v4712_v3  ;;  %7961 = vpow2.f32 %v4801_v46  ;;  %v11447_v46 = vld [vmem:[#allocation8_spill] sm:$0xff] }
 0x611   :  { %v4591_v18 = vpop.xlane.xlu0 %4590  ;;  %v4627_v36 = vpop.xlane.xlu1 %4626  ;;  %v4725_v61 = vsub.f32 %v9773_v4, %v4693_v55 }
 0x612   :  { %v4803_v50 = vmul.f32 1.442695, %v4744_v15  ;;  %v4899_v1 = vmul.f32 1.442695, %v4840_v63  ;;  %v4685_v23 = vmax.f32 %v10062_v48, %v4591_v18 }
 0x613   :  { %v4765_v63 = vmul.f32 1.442695, %v4725_v61 }
 0x614   :  { %7963 = vpow2.f32 %v4803_v50  ;;  %v4717_v62 = vsub.f32 %v9735_v12, %v4685_v23  ;;  %v4813_v16 = vsub.f32 %v9994_v8, %v4685_v23  ;;  %v10311_v12 = vpop.eup %7951  ;;  %v11444_v8 = vld [vmem:[#allocation37_spill] sm:$0xff]  ;;  %v11449_v50 = vld [vmem:[#allocation51_spill] sm:$0xff]  ;;  %v11450_v23 = vld [vmem:[#allocation58_spill] sm:$0xff] }
 0x615   :  { %7965 = vpow2.f32 %v4889_v30  ;;  %v4594_v57 = vpop.xlane.xlu0 %4593  ;;  %v10306_v29 = vpop.xlane.xlu1 %4638  ;;  %v11448_v30 = vld [vmem:[#allocation69_spill] sm:$0xff] }
 0x616   :  { %7967 = vpow2.f32 %v4899_v1  ;;  %v4749_v58 = vmul.f32 1.442695, %v4717_v62  ;;  %v4686_v48 = vmax.f32 %v10104_v33, %v4594_v57  ;;  %v4845_v26 = vmul.f32 1.442695, %v4813_v16  ;;  %v10315_v60 = vpop.eup %7953 }
 0x617   :  { %7969 = vpow2.f32 %v4897_v41  ;;  %v4697_v33 = vmax.f32 %v11446_v28, %v4627_v36  ;;  %v10320_v3 = vpop.eup %7955  ;;  %v4821_v52 = vsub.f32 %v11448_v30, %v4693_v55  ;;  %v4915_v41 = vsel %vm128_vm1, %v10203_v53, 0.0  ;;  %v11455_v30 = vld [vmem:[#allocation41_spill] sm:$0xff] }
 0x618   :  { %7971 = vpow2.f32 %v4757_v47  ;;  %v4718_v10 = vsub.f32 %v11444_v8, %v4686_v48  ;;  %v4814_v14 = vsub.f32 %v11445_v38, %v4686_v48  ;;  %v10323_v15 = vpop.eup %7957  ;;  %v5014_v16 = vsel %vm613_vm5, %v10212_v45, 0.0  ;;  %v11452_v8 = vld [vmem:[#allocation13_spill] sm:$0xff] }
 0x619   :  { %7973 = vpow2.f32 %v4853_v59  ;;  %v4606_v19 = vpop.xlane.xlu0 %4605  ;;  %v4588_v11 = vpop.xlane.xlu1 %4587  ;;  %v5142_v55 = vpack.c.bf16 %v10311_v12, %v10303_v5  ;;  %v4861_v28 = vmul.f32 1.442695, %v4821_v52 }
 0x61a   :  { %7975 = vpow2.f32 %v4749_v58  ;;  %v4751_v4 = vmul.f32 1.442695, %v4718_v10  ;;  %v4847_v39 = vmul.f32 1.442695, %v4814_v14  ;;  %v4690_v0 = vmax.f32 %v11447_v46, %v4606_v19  ;;  %4919 = vadd.xlane.f32.xlu0 %v4918_v25  ;;  %v10326_v18 = vpop.eup %7959  ;;  %v11451_v58 = vld [vmem:[#allocation54_spill] sm:$0xff]  ;;  %v11453_v19 = vld [vmem:[#allocation59_spill] sm:$0xff] }
 0x61b   :  { %7977 = vpow2.f32 %v4845_v26  ;;  %v10332_v47 = vpop.eup %7961  ;;  %v4729_v48 = vsub.f32 %v11451_v58, %v4697_v33  ;;  %v4825_v25 = vsub.f32 %v11453_v19, %v4697_v33  ;;  %v11454_v46 = vld [vmem:[#allocation34_spill] sm:$0xff]  ;;  %v4930_v33 = vsel %vm128_vm1, %v10233_v9, 0.0 }
 0x61c   :  { %7979 = vpow2.f32 %v4751_v4  ;;  %v4722_v1 = vsub.f32 %v11449_v50, %v4690_v0  ;;  %v4818_v36 = vsub.f32 %v11450_v23, %v4690_v0  ;;  %v4954_v4 = vsel %vm128_vm1, %v10271_v31, 0.0  ;;  %v11464_v31 = vld [vmem:[#allocation3_spill] sm:$0xff] }
 0x61d   :  { %7981 = vpow2.f32 %v4847_v39  ;;  %v4618_v62 = vpop.xlane.xlu0 %4617  ;;  %v10344_v38 = vpop.xlane.xlu1 %4680  ;;  %v4869_v19 = vmul.f32 1.442695, %v4825_v25 }
 0x61e   :  { %v10340_v57 = vpop.eup %7963  ;;  %v4759_v61 = vmul.f32 1.442695, %v4722_v1  ;;  %v4855_v26 = vmul.f32 1.442695, %v4818_v36  ;;  %v4694_v10 = vmax.f32 %v11452_v8, %v4618_v62  ;;  %5015 = vadd.xlane.f32.xlu0 %v5014_v16  ;;  %7983 = vpow2.f32 %v4765_v63  ;;  %4916 = vadd.xlane.f32.xlu1 %v4915_v41 }
 0x61f   :  { %v10346_v14 = vpop.eup %7965  ;;  %v5011_v1 = vsel %vm613_vm5, %v10216_v43, 0.0  ;;  %v4773_v62 = vmul.f32 1.442695, %v4729_v48  ;;  %v11457_v48 = vld [vmem:[#allocation65_spill] sm:$0xff] }
 0x620   :  { %v10351_v39 = vpop.eup %7967  ;;  %7985 = vpow2.f32 %v4759_v61  ;;  %v4726_v0 = vsub.f32 %v11454_v46, %v4694_v10  ;;  %v4822_v50 = vsub.f32 %v11455_v30, %v4694_v10  ;;  %v11456_v61 = vld [vmem:[#allocation12_spill] sm:$0xff]  ;;  %v11462_v30 = vld [vmem:[#allocation63_spill] sm:$0xff] }
 0x621   :  { %v10357_v23 = vpop.eup %7969  ;;  %7987 = vpow2.f32 %v4855_v26  ;;  %v4630_v63 = vpop.xlane.xlu0 %4629 }
 0x622   :  { %v10365_v41 = vpop.eup %7971  ;;  %v4767_v16 = vmul.f32 1.442695, %v4726_v0  ;;  %v4863_v58 = vmul.f32 1.442695, %v4822_v50  ;;  %v4698_v8 = vmax.f32 %v11456_v61, %v4630_v63  ;;  %v4684_v10 = vpop.xlane.xlu1 %4683  ;;  %4931 = vadd.xlane.f32.xlu0 %v4930_v33  ;;  %7989 = vpow2.f32 %v4861_v28  ;;  %5012 = vadd.xlane.f32.xlu1 %v5011_v1  ;;  %v11458_v50 = vld [vmem:[#allocation47_spill] sm:$0xff]  ;;  %v11459_v33 = vld [vmem:[#allocation62_spill] sm:$0xff] }
 0x623   :  { %v10368_v26 = vpop.eup %7973  ;;  %v10370_v46 = vmax.f32 %v4588_v11, %v4684_v10  ;;  %v5026_v11 = vsel %vm613_vm5, %v10235_v17, 0.0  ;;  %v5074_v17 = vsel %vm613_vm5, %v10326_v18, 0.0 }
 0x624   :  { %v10374_v36 = vpop.eup %7975  ;;  %7991 = vpow2.f32 %v4767_v16  ;;  %v4730_v0 = vsub.f32 %v11457_v48, %v4698_v8  ;;  %v4826_v52 = vsub.f32 %v11458_v50, %v4698_v8  ;;  %v4927_v16 = vsel %vm128_vm1, %v10224_v51, 0.0 }
 0x625   :  { %v10378_v63 = vpop.eup %7977  ;;  %7993 = vpow2.f32 %v4863_v58  ;;  %v4844_v28 = vsub.f32 %v11459_v33, %v10370_v46  ;;  %v4942_v50 = vsel %vm128_vm1, %v10258_v22, 0.0  ;;  %v5050_v51 = vsel %vm613_vm5, %v10275_v7, 0.0  ;;  %v5523_v9 = vpop.permute.xlu0 %5522  ;;  %v11484_v33 = vld [vmem:[#allocation2_spill] sm:$0xff] }
 0x626   :  { %v10384_v25 = vpop.eup %7979  ;;  %7995 = vpow2.f32 %v4773_v62  ;;  %v4775_v1 = vmul.f32 1.442695, %v4730_v0  ;;  %v4871_v61 = vmul.f32 1.442695, %v4826_v52  ;;  %5027 = vadd.xlane.f32.xlu0 %v5026_v11  ;;  %4928 = vadd.xlane.f32.xlu1 %v4927_v16  ;;  %v5023_v62 = vsel %vm613_vm5, %v10226_v42, 0.0  ;;  %v11460_v0 = vld [vmem:[#allocation60_spill] sm:$0xff] }
 0x627   :  { %v10388_v10 = vpop.eup %7981  ;;  %7997 = vpow2.f32 %v4869_v19  ;;  %v5133_v58 = vpack.c.bf16 %v10384_v25, %v10374_v36  ;;  %v4975_v42 = vsel %vm128_vm1, %v10323_v15, 0.0 }
 0x628   :  { %7999 = vpow2.f32 %v4775_v1  ;;  %v5361_v8 = vpack.c.bf16 %v10388_v10, %v10378_v63  ;;  %v10394_v48 = vpop.eup %7983  ;;  %v11461_v1 = vmov 0.0  }
 0x629   :  { %8001 = vpow2.f32 %v4871_v61  ;;  %7485 = vmatprep.mubr.msk.bf16.mxu0 %vm128_vm1, %v5133_v58  ;;  %v4939_v61 = vsel %vm128_vm1, %v10250_v54, 0.0  ;;  %v5038_v58 = vsel %vm613_vm5, %v10260_v49, 0.0  ;;  %v11463_v54 = vld [vmem:[#allocation45_spill] sm:$0xff] }
 0x62a   :  { %v10397_v52 = vpop.eup %7985  ;;  %7520 = vmatmul.mubr.msk.bf16.vlgmr.msra.gmra.mrb[208].mxu1 %vm613_vm5, %v5361_v8  ;;  %7486 = vmatmul.mubr.msk.bf16.vlgmr.msra.gmra.mrb[176].mxu0 %vm128_vm1, %v5134_v2  ;;  %v4748_v22 = vsub.f32 %v11463_v54, %v10370_v46 }
 0x62b   :  { %v10406_v19 = vpop.eup %7987  ;;  %7524 = vmatpush3.bf16.msra.mxu1 %v11460_v0  ;;  %5024 = vadd.xlane.f32.xlu1 %v5023_v62  ;;  %v5135_v11 = vpack.c.bf16 %v10397_v52, %v10365_v41 }
 0x62c   :  { %4943 = vadd.xlane.f32.xlu0 %v4942_v50  ;;  %7525 = vmatprep.mubr.msk.bf16.mxu1 %vm8108_vm4, %v11461_v1  ;;  %v5363_v53 = vpack.c.bf16 %v10406_v19, %v10368_v26  ;;  %v10417_v27 = vpop.eup %7989 }
 0x62d   :  { %7489 = vmatprep.mubr.msk.bf16.mxu0 %vm128_vm1, %v5135_v11  ;;  %7529 = vmatprep.subr.bf16.mxu1 %v11461_v1 }
 0x62e   :  { %v10421_v2 = vpop.eup %7991 }
 0x62f   :  { %v10425_v16 = vpop.eup %7993  ;;  %4940 = vadd.xlane.f32.xlu1 %v4939_v61  ;;  %v5137_v8 = vpack.c.bf16 %v10421_v2, %v10394_v48  ;;  %v5035_v61 = vsel %vm613_vm5, %v10252_v32, 0.0 }
 0x630   :  { %v10431_v62 = vpop.eup %7995  ;;  %5039 = vadd.xlane.f32.xlu0 %v5038_v58  ;;  %v5365_v0 = vpack.c.bf16 %v10425_v16, %v10417_v27 }
 0x631   :  { %v10435_v50 = vpop.eup %7997 }
 0x632   :  { %v10437_v11 = vpop.eup %7999  ;;  %7526 = vmatmul.mubr.msk.bf16.vlgmr.msra.gmra.mrb[212].mxu1 %vm613_vm5, %v5362_v37  ;;  %7490 = vmatmul.mubr.msk.bf16.gmra.mrb[180].mxu0 %vm128_vm1, %v5136_v44  ;;  %v4951_v37 = vsel %vm128_vm1, %v10268_v13, 0.0  ;;  %v5047_v44 = vsel %vm613_vm5, %v10280_v24, 0.0  ;;  %v4990_v13 = vsel %vm128_vm1, %v10340_v57, 0.0 }
 0x633   :  { %v10449_v58 = vpop.eup %8001  ;;  %7530 = vmatpush3.bf16.msra.mxu1 %v11462_v30  ;;  %5036 = vadd.xlane.f32.xlu1 %v5035_v61  ;;  %v5139_v45 = vpack.c.bf16 %v10437_v11, %v10431_v62  ;;  %v5062_v30 = vsel %vm613_vm5, %v10315_v60, 0.0  ;;  %v5059_v61 = vsel %vm613_vm5, %v10308_v40, 0.0 }
 0x634   :  { %4955 = vadd.xlane.f32.xlu0 %v4954_v4  ;;  %7493 = vmatprep.mubr.msk.bf16.mxu0 %vm128_vm1, %v5137_v8  ;;  %v5367_v43 = vpack.c.bf16 %v10449_v58, %v10435_v50  ;;  %v4966_v4 = vsel %vm128_vm1, %v10311_v12, 0.0  ;;  %v5571_v8 = vpop.permute.xlu1 %5570 }
 0x635   :  { %7531 = vmatprep.mubr.msk.bf16.mxu1 %vm8108_vm4, %v11461_v1  ;;  %7535 = vmatprep.subr.bf16.mxu1 %v11461_v1 }
 0x637   :  { %4952 = vadd.xlane.f32.xlu1 %v4951_v37  ;;  %v4987_v37 = vsel %vm128_vm1, %v10332_v47, 0.0 }
 0x638   :  { %5051 = vadd.xlane.f32.xlu0 %v5050_v51 }
 0x63a   :  { %7532 = vmatmul.mubr.msk.bf16.vlgmr.msra.gmra.mrb[216].mxu1 %vm613_vm5, %v5363_v53  ;;  %7494 = vmatmul.mubr.msk.bf16.gmra.mrb[184].mxu0 %vm128_vm1, %v5138_v6  ;;  %v4963_v6 = vsel %vm128_vm1, %v10303_v5, 0.0  ;;  %v4811_v53 = vmul.f32 1.442695, %v4748_v22 }
 0x63b   :  { %7536 = vmatpush3.bf16.msra.mxu1 %v5523_v9  ;;  %5048 = vadd.xlane.f32.xlu1 %v5047_v44  ;;  %v11465_v9 = vld [vmem:[#allocation36_spill] sm:$0xff] }
 0x63c   :  { %4967 = vadd.xlane.f32.xlu0 %v4966_v4  ;;  %7497 = vmatprep.mubr.msk.bf16.mxu0 %vm128_vm1, %v5139_v45  ;;  %v4978_v45 = vsel %vm128_vm1, %v10320_v3, 0.0  ;;  %8003 = vpow2.f32 %v4811_v53  ;;  %v5083_v4 = vsel %vm613_vm5, %v10357_v23, 0.0  ;;  %v11467_v53 = vld [vmem:[#allocation17_spill] sm:$0xff] }
 0x63d   :  { %7537 = vmatprep.mubr.msk.bf16.mxu1 %vm8108_vm4, %v11461_v1  ;;  %7541 = vmatprep.subr.bf16.mxu1 %v11461_v1 }
 0x63f   :  { %4964 = vadd.xlane.f32.xlu1 %v4963_v6 }
 0x640   :  { %5063 = vadd.xlane.f32.xlu0 %v5062_v30 }
 0x642   :  { %7538 = vmatmul.mubr.msk.bf16.vlgmr.msra.gmra.mrb[220].mxu1 %vm613_vm5, %v5364_v35  ;;  %7498 = vmatmul.mubr.msk.bf16.gmra.mrb[188].mxu0 %vm128_vm1, %v5140_v21  ;;  %v5071_v35 = vsel %vm613_vm5, %v10346_v14, 0.0  ;;  %v4701_v21 = vmax.f32 %v11464_v31, %v10306_v29  ;;  %v11466_v29 = vld [vmem:[#allocation53_spill] sm:$0xff] }
 0x643   :  { %7542 = vmatpush3.bf16.msra.mxu1 %v5571_v8  ;;  %5060 = vadd.xlane.f32.xlu1 %v5059_v61 }
 0x644   :  { %4979 = vadd.xlane.f32.xlu0 %v4978_v45  ;;  %7543 = vmatprep.mubr.msk.bf16.mxu1 %vm8108_vm4, %v11461_v1  ;;  %v4733_v44 = vsub.f32 %v11465_v9, %v4701_v21  ;;  %v4829_v22 = vsub.f32 %v11466_v29, %v4701_v21  ;;  %v4909_v45 = vsel %vm128_vm1, %v10374_v36, 0.0  ;;  %v11471_v9 = vld [vmem:[#allocation56_spill] sm:$0xff]  ;;  %v5005_v36 = vsel %vm613_vm5, %v10378_v63, 0.0 }
 0x645   :  { %7547 = vmatprep.subr.bf16.mxu1 %v11461_v1  ;;  %v5008_v63 = vsel %vm613_vm5, %v10388_v10, 0.0 }
 0x646   :  { %v10517_v51 = vpop.eup %8003  ;;  %v4781_v6 = vmul.f32 1.442695, %v4733_v44 }
 0x647   :  { %4976 = vadd.xlane.f32.xlu1 %v4975_v42  ;;  %v5002_v54 = vsel %vm128_vm1, %v10517_v51, 0.0  ;;  %v4877_v42 = vmul.f32 1.442695, %v4829_v22 }
 0x648   :  { %5075 = vadd.xlane.f32.xlu0 %v5074_v17  ;;  %v11468_v17 = vld [vmem:[#allocation11_spill] sm:$0xff]  ;;  %8005 = vpow2.f32 %v4781_v6 }
 0x649   :  { %8007 = vpow2.f32 %v4877_v42  ;;  %v11475_v6 = vld [vmem:[#allocation71_spill] sm:$0xff] }
 0x64a   :  { %7544 = vmatmul.mubr.msk.bf16.vlgmr.msra.gmra.mrb[224].mxu1 %vm613_vm5, %v5365_v0  ;;  %v5086_v0 = vsel %vm613_vm5, %v10351_v39, 0.0 }
 0x64b   :  { %5072 = vadd.xlane.f32.xlu1 %v5071_v35  ;;  %7549 = vmatprep.mubr.msk.bf16.mxu1 %vm8108_vm4, %v11461_v1 }
 0x64c   :  { %4991 = vadd.xlane.f32.xlu0 %v4990_v13  ;;  %v11469_v13 = vld [vmem:[#allocation55_spill] sm:$0xff] }
 0x64f   :  { %4988 = vadd.xlane.f32.xlu1 %v4987_v37  ;;  %v11470_v37 = vld [vmem:[#allocation42_spill] sm:$0xff] }
 0x650   :  { %5087 = vadd.xlane.f32.xlu0 %v5086_v0 }
 0x653   :  { %5084 = vadd.xlane.f32.xlu1 %v5083_v4  ;;  %v11472_v4 = vld [vmem:[#allocation46_spill] sm:$0xff] }
 0x654   :  { %5003 = vadd.xlane.f32.xlu0 %v5002_v54 }
 0x656   :  { %v4642_v30 = vpop.xlane.xlu0 %4641  ;;  %v4663_v61 = vpop.xlane.xlu1 %4662 }
 0x657   :  { %v4702_v8 = vmax.f32 %v11467_v53, %v4642_v30  ;;  %v4709_v35 = vmax.f32 %v11468_v17, %v4663_v61  ;;  %v11473_v53 = vld [vmem:[#allocation16_spill] sm:$0xff] }
 0x658   :  { %4910 = vadd.xlane.f32.xlu0 %v4909_v45  ;;  %v11474_v45 = vld [vmem:[#allocation15_spill] sm:$0xff] }
 0x659   :  { %v4734_v31 = vsub.f32 %v11469_v13, %v4702_v8  ;;  %v4830_v0 = vsub.f32 %v11470_v37, %v4702_v8  ;;  %v4741_v21 = vsub.f32 %v11471_v9, %v4709_v35  ;;  %v4837_v44 = vsub.f32 %v11472_v4, %v4709_v35  ;;  %v11476_v13 = vld [vmem:[#allocation43_spill] sm:$0xff] }
 0x65a   :  { %v4651_v54 = vpop.xlane.xlu0 %4650  ;;  %v4666_v59 = vpop.xlane.xlu1 %4665 }
 0x65b   :  { %v4783_v29 = vmul.f32 1.442695, %v4734_v31  ;;  %v4879_v30 = vmul.f32 1.442695, %v4830_v0  ;;  %v4705_v34 = vmax.f32 %v11473_v53, %v4651_v54  ;;  %v4797_v22 = vmul.f32 1.442695, %v4741_v21 }
 0x65c   :  { %v4893_v61 = vmul.f32 1.442695, %v4837_v44  ;;  %v4710_v17 = vmax.f32 %v11474_v45, %v4666_v59  ;;  %5006 = vadd.xlane.f32.xlu0 %v5005_v36  ;;  %v11477_v31 = vld [vmem:[#allocation67_spill] sm:$0xff]  ;;  %v11478_v0 = vld [vmem:[#allocation4_spill] sm:$0xff]  ;;  %v11481_v36 = vld [vmem:[#allocation61_spill] sm:$0xff] }
 0x65d   :  { %8009 = vpow2.f32 %v4783_v29  ;;  %v4737_v8 = vsub.f32 %v11475_v6, %v4705_v34  ;;  %v4833_v35 = vsub.f32 %v11476_v13, %v4705_v34  ;;  %v11479_v44 = vld [vmem:[#allocation7_spill] sm:$0xff]  ;;  %v11480_v34 = vld [vmem:[#allocation38_spill] sm:$0xff]  ;;  %v10556_v13 = vpop.eup %8005 }
 0x65e   :  { %8011 = vpow2.f32 %v4879_v30  ;;  %v4742_v37 = vsub.f32 %v11477_v31, %v4710_v17  ;;  %v4838_v9 = vsub.f32 %v11478_v0, %v4710_v17  ;;  %v4654_v4 = vpop.xlane.xlu0 %4653  ;;  %v5619_v54 = vpop.permute.xlu1 %5618  ;;  %v11483_v31 = vld [vmem:[#allocation44_spill] sm:$0xff] }
 0x65f   :  { %8013 = vpow2.f32 %v4797_v22  ;;  %v4789_v42 = vmul.f32 1.442695, %v4737_v8  ;;  %v4885_v21 = vmul.f32 1.442695, %v4833_v35  ;;  %v4706_v59 = vmax.f32 %v11479_v44, %v4654_v4  ;;  %7548 = vmatpush3.bf16.msra.mxu1 %v5619_v54  ;;  %v10565_v49 = vpop.eup %8007 }
 0x660   :  { %8015 = vpow2.f32 %v4893_v61  ;;  %v4799_v29 = vmul.f32 1.442695, %v4742_v37  ;;  %v4895_v53 = vmul.f32 1.442695, %v4838_v9  ;;  %5009 = vadd.xlane.f32.xlu0 %v5008_v63  ;;  %7553 = vmatprep.subr.bf16.mxu1 %v11461_v1  ;;  %v4924_v22 = vsel %vm128_vm1, %v10397_v52, 0.0 }
 0x661   :  { %8017 = vpow2.f32 %v4789_v42  ;;  %v4738_v30 = vsub.f32 %v11480_v34, %v4706_v59  ;;  %v4834_v45 = vsub.f32 %v11481_v36, %v4706_v59  ;;  %v4907_v35 = vmul.f32 1.442695, %v4844_v28  ;;  %v11485_v59 = vld [vmem:[#allocation57_spill] sm:$0xff] }
 0x662   :  { %8019 = vpow2.f32 %v4885_v21  ;;  %v4585_v10 = vpop.xlane.xlu0 %4584  ;;  %7550 = vmatmul.mubr.msk.bf16.vlgmr.msra.gmra.mrb[228].mxu1 %vm613_vm5, %v5366_v56  ;;  %v10554_v8 = vpop.permute.xlu1 %5714  ;;  %v5020_v4 = vsel %vm613_vm5, %v10406_v19, 0.0 }
 0x663   :  { %8021 = vpow2.f32 %v4799_v29  ;;  %v4791_v17 = vmul.f32 1.442695, %v4738_v30  ;;  %v4887_v6 = vmul.f32 1.442695, %v4834_v45  ;;  %v4715_v61 = vmax.f32 %v4585_v10, %v10344_v38  ;;  %7555 = vmatprep.mubr.msk.bf16.mxu1 %vm8108_vm4, %v11461_v1  ;;  %v11482_v38 = vld [vmem:[#allocation39_spill] sm:$0xff]  ;;  %v11486_v29 = vld [vmem:[#allocation9_spill] sm:$0xff] }
 0x664   :  { %8023 = vpow2.f32 %v4895_v53  ;;  %4925 = vadd.xlane.f32.xlu0 %v4924_v22  ;;  %v4936_v45 = vsel %vm128_vm1, %v10421_v2, 0.0  ;;  %v11487_v10 = vld [vmem:[#allocation6_spill] sm:$0xff]  ;;  %v5032_v2 = vsel %vm613_vm5, %v10425_v16, 0.0 }
 0x665   :  { %8025 = vpow2.f32 %v4791_v17  ;;  %v4747_v52 = vsub.f32 %v11482_v38, %v4715_v61  ;;  %v4843_v32 = vsub.f32 %v11483_v31, %v4715_v61 }
 0x666   :  { %8027 = vpow2.f32 %v4887_v6  ;;  %v4675_v56 = vpop.xlane.xlu0 %4674  ;;  %v5763_v46 = vpop.permute.xlu1 %5762 }
 0x667   :  { %v10567_v37 = vpop.eup %8009  ;;  %v4809_v0 = vmul.f32 1.442695, %v4747_v52  ;;  %v4905_v9 = vmul.f32 1.442695, %v4843_v32  ;;  %v4713_v28 = vmax.f32 %v11484_v33, %v4675_v56  ;;  %8029 = vpow2.f32 %v4907_v35  ;;  %7566 = vmatpush3.bf16.msra.mxu0 %v5763_v46  ;;  %v11488_v35 = vld [vmem:[#allocation52_spill] sm:$0xff] }
 0x668   :  { %v10572_v63 = vpop.eup %8011  ;;  %5021 = vadd.xlane.f32.xlu0 %v5020_v4  ;;  %v5141_v42 = vpack.c.bf16 %v10567_v37, %v10556_v13  ;;  %7577 = vmatprep.subr.bf16.mxu0 %v11461_v1  ;;  %v11489_v4 = vpack.c.bf16 %v10320_v3, %v10323_v15 }
 0x669   :  { %v10576_v21 = vpop.eup %8013  ;;  %v5369_v44 = vpack.c.bf16 %v10572_v63, %v10565_v49  ;;  %8031 = vpow2.f32 %v4809_v0  ;;  %v4745_v54 = vsub.f32 %v11485_v59, %v4713_v28  ;;  %v4841_v53 = vsub.f32 %v11486_v29, %v4713_v28 }
 0x66a   :  { %v10583_v19 = vpop.eup %8015  ;;  %8033 = vpow2.f32 %v4905_v9  ;;  %7501 = vmatprep.mubr.msk.bf16.mxu0 %vm128_vm1, %v5141_v42  ;;  %v4678_v34 = vpop.xlane.xlu0 %4677  ;;  %v4948_v28 = vsel %vm128_vm1, %v10437_v11, 0.0  ;;  %v5044_v11 = vsel %vm613_vm5, %v10449_v58, 0.0  ;;  %v11490_v29 = vpack.c.bf16 %v10275_v7, %v10280_v24 }
 0x66b   :  { %v10586_v30 = vpop.eup %8017  ;;  %v4805_v36 = vmul.f32 1.442695, %v4745_v54  ;;  %v4714_v22 = vmax.f32 %v11487_v10, %v4678_v34  ;;  %7502 = vmatmul.mubr.msk.bf16.gmra.mrb[192].mxu0 %vm128_vm1, %v5142_v55  ;;  %v4901_v6 = vmul.f32 1.442695, %v4841_v53  ;;  %v5811_v15 = vpop.permute.xlu1 %5810  ;;  %v4960_v34 = vsel %vm128_vm1, %v10567_v37, 0.0 }
 0x66c   :  { %v10595_v17 = vpop.eup %8019  ;;  %4937 = vadd.xlane.f32.xlu0 %v4936_v45  ;;  %v11491_v58 = vpack.c.bf16 %v10340_v57, %v10332_v47  ;;  %v4921_v45 = vsel %vm128_vm1, %v10365_v41, 0.0  ;;  %v5056_v47 = vsel %vm613_vm5, %v10572_v63, 0.0  ;;  %v5017_v57 = vsel %vm613_vm5, %v10368_v26, 0.0 }
 0x66d   :  { %v10597_v61 = vpop.eup %8021  ;;  %v4746_v38 = vsub.f32 %v11488_v35, %v4714_v22  ;;  %v4842_v52 = vsub.f32 %v10100_v20, %v4714_v22  ;;  %8035 = vpow2.f32 %v4805_v36  ;;  %v11492_v37 = vpack.c.bf16 %v10315_v60, %v10308_v40  ;;  %v603_v35 = vld [vmem:[%s11110_s4 + $0x18] sm:$0xff] }
 0x66e   :  { %v10601_v31 = vpop.eup %8023  ;;  %v5667_v32 = vpop.permute.xlu0 %5666  ;;  %v5145_v5 = vpack.c.bf16 %v10597_v61, %v10576_v21  ;;  %8037 = vpow2.f32 %v4901_v6  ;;  %v4933_v22 = vsel %vm128_vm1, %v10394_v48, 0.0  ;;  %v5029_v60 = vsel %vm613_vm5, %v10417_v27, 0.0 }
 0x66f   :  { %v8026_v12 = vpop.eup %8025  ;;  %v4807_v55 = vmul.f32 1.442695, %v4746_v38  ;;  %v4903_v56 = vmul.f32 1.442695, %v4842_v52  ;;  %7554 = vmatpush3.bf16.msra.mxu1 %v5667_v32  ;;  %v5373_v0 = vpack.c.bf16 %v10601_v31, %v10583_v19  ;;  %v5859_v36 = vpop.permute.xlu1 %5858  ;;  %v11493_v48 = vpack.c.bf16 %v10326_v18, %v10346_v14 }
 0x670   :  { %v10609_v9 = vpop.eup %8027  ;;  %5033 = vadd.xlane.f32.xlu0 %v5032_v2  ;;  %v5143_v20 = vpack.c.bf16 %v8026_v12, %v10586_v30  ;;  %7559 = vmatprep.subr.bf16.mxu1 %v11461_v1  ;;  %v4972_v10 = vsel %vm128_vm1, %v8026_v12, 0.0  ;;  %v4984_v6 = vsel %vm128_vm1, %v10597_v61, 0.0  ;;  %v4945_v27 = vsel %vm128_vm1, %v10431_v62, 0.0 }
 0x671   :  { %8039 = vpow2.f32 %v4807_v55  ;;  %v5371_v16 = vpack.c.bf16 %v10609_v9, %v10595_v17  ;;  %v10615_v46 = vpop.eup %8029  ;;  %v5068_v40 = vsel %vm613_vm5, %v10609_v9, 0.0  ;;  %v5080_v18 = vsel %vm613_vm5, %v10601_v31, 0.0 }
 0x672   :  { %8041 = vpow2.f32 %v4903_v56  ;;  %7505 = vmatprep.mubr.msk.bf16.mxu0 %vm128_vm1, %v5143_v20  ;;  %7556 = vmatmul.mubr.msk.bf16.vlgmr.msra.gmra.mrb[232].mxu1 %vm613_vm5, %v5367_v43  ;;  %v5041_v14 = vsel %vm613_vm5, %v10435_v50, 0.0  ;;  %v11494_v63 = vpack.c.bf16 %v10351_v39, %v10357_v23  ;;  %v4957_v50 = vsel %vm128_vm1, %v10556_v13, 0.0  ;;  %v602_v13 = vld [vmem:[%s11110_s4 + $0x10] sm:$0xff] }
 0x673   :  { %v8032_v33 = vpop.eup %8031  ;;  %7506 = vmatmul.mubr.msk.bf16.gmra.mrb[196].mxu0 %vm128_vm1, %v11489_v4  ;;  %7560 = vmatpush3.bf16.msra.mxu1 %v10554_v8  ;;  %v4912_v8 = vsel %vm128_vm1, %v10384_v25, 0.0  ;;  %v5907_v41 = vpop.permute.xlu1 %5906  ;;  %v5053_v23 = vsel %vm613_vm5, %v10565_v49, 0.0  ;;  %v605_v38 = vpack.c.bf16 %v603_v35, %v602_v13  ;;  %v5098_v2 = vsel %vm613_vm5, %v10615_v46, 0.0 }
 0x674   :  { %v10629_v42 = vpop.eup %8033  ;;  %4949 = vadd.xlane.f32.xlu0 %v4948_v28  ;;  %7509 = vmatprep.mubr.msk.bf16.mxu0 %vm128_vm1, %v5145_v5  ;;  %v4999_v59 = vsel %vm128_vm1, %v8032_v33, 0.0  ;;  %v5148_v43 = vpack.c.bf16 %v10517_v51, %v8032_v33  ;;  %v4969_v49 = vsel %vm128_vm1, %v10586_v30, 0.0  ;;  %v5065_v32 = vsel %vm613_vm5, %v10595_v17, 0.0 }
 0x675   :  { %5000 = vadd.xlane.f32.xlu1 %v4999_v59  ;;  %7561 = vmatprep.mubr.msk.bf16.mxu1 %vm8108_vm4, %v11461_v1  ;;  %v5376_v3 = vpack.c.bf16 %v10615_v46, %v10629_v42  ;;  %v4981_v31 = vsel %vm128_vm1, %v10576_v21, 0.0  ;;  %v5077_v5 = vsel %vm613_vm5, %v10583_v19, 0.0  ;;  %v5095_v19 = vsel %vm613_vm5, %v10629_v42, 0.0 }
 0x676   :  { %7571 = vmatprep.subr.bf16.mxu1 %v11461_v1 }
 0x677   :  { %v10643_v54 = vpop.eup %8035  ;;  %v6003_v26 = vpop.permute.xlu1 %6002 }
 0x678   :  { %5045 = vadd.xlane.f32.xlu0 %v5044_v11  ;;  %v10645_v51 = vpop.eup %8037  ;;  %v4993_v17 = vsel %vm128_vm1, %v10643_v54, 0.0 }
 0x679   :  { %4913 = vadd.xlane.f32.xlu1 %v4912_v8  ;;  %v5089_v9 = vsel %vm613_vm5, %v10645_v51, 0.0 }
 0x67a   :  { %7562 = vmatmul.mubr.msk.bf16.vlgmr.msra.gmra.mrb[236].mxu1 %vm613_vm5, %v11490_v29 }
 0x67b   :  { %v8040_v53 = vpop.eup %8039  ;;  %7572 = vmatpush3.bf16.msra.mxu1 %v5811_v15  ;;  %7510 = vmatmul.mubr.msk.bf16.gmra.mrb[200].mxu0 %vm128_vm1, %v11491_v58  ;;  %v6099_v62 = vpop.permute.xlu1 %6098 }
 0x67c   :  { %v10657_v25 = vpop.eup %8041  ;;  %4961 = vadd.xlane.f32.xlu0 %v4960_v34  ;;  %v5147_v7 = vpack.c.bf16 %v8040_v53, %v10643_v54  ;;  %7573 = vmatprep.mubr.msk.bf16.mxu1 %vm8108_vm4, %v11461_v1  ;;  %v4996_v61 = vsel %vm128_vm1, %v8040_v53, 0.0 }
 0x67d   :  { %4922 = vadd.xlane.f32.xlu1 %v4921_v45  ;;  %7583 = vmatprep.subr.bf16.mxu1 %v11461_v1  ;;  %v5375_v24 = vpack.c.bf16 %v10657_v25, %v10645_v51  ;;  %v5092_v39 = vsel %vm613_vm5, %v10657_v25, 0.0 }
 0x67e   :  { %7513 = vmatprep.mubr.msk.bf16.mxu0 %vm128_vm1, %v5147_v7 }
 0x680   :  { %5057 = vadd.xlane.f32.xlu0 %v5056_v47 }
 0x681   :  { %5018 = vadd.xlane.f32.xlu1 %v5017_v57 }
 0x682   :  { %7574 = vmatmul.mubr.msk.bf16.vlgmr.msra.gmra.mrb[240].mxu1 %vm613_vm5, %v11492_v37 }
 0x683   :  { %7584 = vmatpush3.bf16.msra.mxu1 %v5907_v41  ;;  %7514 = vmatmul.mubr.msk.bf16.gmra.mrb[204].mxu0 %vm128_vm1, %v5148_v43 }
 0x684   :  { %4973 = vadd.xlane.f32.xlu0 %v4972_v10  ;;  %7585 = vmatprep.mubr.msk.bf16.mxu1 %vm8108_vm4, %v11461_v1 }
 0x685   :  { %4934 = vadd.xlane.f32.xlu1 %v4933_v22  ;;  %7595 = vmatprep.subr.bf16.mxu1 %v11461_v1 }
 0x686   :  { %7567 = vmatprep.mubr.msk.bf16.mxu0 %vm8108_vm4, %v11461_v1 }
 0x688   :  { %5069 = vadd.xlane.f32.xlu0 %v5068_v40 }
 0x689   :  { %5030 = vadd.xlane.f32.xlu1 %v5029_v60 }
 0x68a   :  { %7586 = vmatmul.mubr.msk.bf16.vlgmr.msra.gmra.mrb[244].mxu1 %vm613_vm5, %v11493_v48 }
 0x68b   :  { %7596 = vmatpush3.bf16.msra.mxu1 %v6003_v26  ;;  %7568 = vmatmul.mubr.msk.bf16.vlgmr.msra.gmra.mrb[208].mxu0 %vm613_vm5, %v5369_v44  ;;  %v5955_v44 = vpop.permute.xlu0 %5954 }
 0x68c   :  { %4985 = vadd.xlane.f32.xlu0 %v4984_v6  ;;  %7578 = vmatpush3.bf16.msra.mxu0 %v5859_v36 }
 0x68d   :  { %4946 = vadd.xlane.f32.xlu1 %v4945_v27  ;;  %7597 = vmatprep.mubr.msk.bf16.mxu1 %vm8108_vm4, %v11461_v1 }
 0x68e   :  { %7607 = vmatprep.subr.bf16.mxu1 %v11461_v1  ;;  %7579 = vmatprep.mubr.msk.bf16.mxu0 %vm8108_vm4, %v11461_v1 }
 0x68f   :  { %7589 = vmatprep.subr.bf16.mxu0 %v11461_v1  ;;  %v6051_v52 = vpop.permute.xlu0 %6050 }
 0x690   :  { %5081 = vadd.xlane.f32.xlu0 %v5080_v18 }
 0x691   :  { %5042 = vadd.xlane.f32.xlu1 %v5041_v14 }
 0x692   :  { %7598 = vmatmul.mubr.msk.bf16.vlgmr.msra.gmra.mrb[248].mxu1 %vm613_vm5, %v11494_v63 }
 0x693   :  { %7608 = vmatpush3.bf16.msra.mxu1 %v6099_v62  ;;  %7580 = vmatmul.mubr.msk.bf16.vlgmr.msra.gmra.mrb[212].mxu0 %vm613_vm5, %v5371_v16 }
 0x694   :  { %4997 = vadd.xlane.f32.xlu0 %v4996_v61  ;;  %7590 = vmatpush3.bf16.msra.mxu0 %v5955_v44 }
 0x695   :  { %4958 = vadd.xlane.f32.xlu1 %v4957_v50  ;;  %7609 = vmatprep.mubr.msk.bf16.mxu1 %vm8108_vm4, %v11461_v1 }
 0x696   :  { %7591 = vmatprep.mubr.msk.bf16.mxu0 %vm8108_vm4, %v11461_v1  ;;  %7601 = vmatprep.subr.bf16.mxu0 %v11461_v1 }
 0x698   :  { %5093 = vadd.xlane.f32.xlu0 %v5092_v39 }
 0x699   :  { %5054 = vadd.xlane.f32.xlu1 %v5053_v23 }
 0x69a   :  { %7610 = vmatmul.mubr.msk.bf16.vlgmr.msra.gmra.mrb[252].mxu1 %vm613_vm5, %v5376_v3 }
 0x69b   :  { %7592 = vmatmul.mubr.msk.bf16.vlgmr.msra.gmra.mrb[216].mxu0 %vm613_vm5, %v5373_v0 }
 0x69c   :  { %5099 = vadd.xlane.f32.xlu0 %v5098_v2  ;;  %7602 = vmatpush3.bf16.msra.mxu0 %v6051_v52 }
 0x69d   :  { %4970 = vadd.xlane.f32.xlu1 %v4969_v49  ;;  %7603 = vmatprep.mubr.msk.bf16.mxu0 %vm8108_vm4, %v11461_v1 }
 0x69e   :  { %7613 = vmatprep.subr.bf16.mxu0 %v605_v38 }
 0x6a1   :  { %5066 = vadd.xlane.f32.xlu1 %v5065_v32 }
 0x6a3   :  { %7604 = vmatmul.mubr.msk.bf16.vlgmr.msra.gmra.mrb[220].mxu0 %vm613_vm5, %v5375_v24 }
 0x6a4   :  { %7614 = vmatpush3.bf16.msra.mxu0 %v605_v38 }
 0x6a5   :  { %4982 = vadd.xlane.f32.xlu1 %v4981_v31 }
 0x6a7   :  { %v4920_v30 = vpop.xlane.xlu0 %4919 }
 0x6a9   :  { %5078 = vadd.xlane.f32.xlu1 %v5077_v5 }
 0x6ab   :  { %v5016_v1 = vpop.xlane.xlu0 %5015  ;;  %v4917_v12 = vpop.xlane.xlu1 %4916 }
 0x6ac   :  { %v5104_v55 = vadd.f32 %v5016_v1, %v4920_v30 }
 0x6ad   :  { %4994 = vadd.xlane.f32.xlu1 %v4993_v17 }
 0x6ae   :  { %8043 = vrcp.f32 %v5104_v55 }
 0x6af   :  { %v4932_v56 = vpop.xlane.xlu0 %4931  ;;  %v5013_v0 = vpop.xlane.xlu1 %5012 }
 0x6b0   :  { %v5103_v14 = vadd.f32 %v5013_v0, %v4917_v12 }
 0x6b1   :  { %5090 = vadd.xlane.f32.xlu1 %v5089_v9 }
 0x6b2   :  { %8045 = vrcp.f32 %v5103_v14 }
 0x6b3   :  { %v5028_v21 = vpop.xlane.xlu0 %5027  ;;  %v10765_v20 = vpop.xlane.xlu1 %4928 }
 0x6b4   :  { %v10767_v16 = vadd.f32 %v5028_v21, %v4932_v56 }
 0x6b5   :  { %5096 = vadd.xlane.f32.xlu1 %v5095_v19 }
 0x6b8   :  { %v10771_v46 = vpop.xlane.xlu1 %5024  ;;  %v8044_v17 = vpop.eup %8043 }
 0x6b9   :  { %v4944_v33 = vpop.xlane.xlu0 %4943 }
 0x6bc   :  { %v4941_v28 = vpop.xlane.xlu1 %4940  ;;  %v8046_v19 = vpop.eup %8045 }
 0x6bd   :  { %v5040_v4 = vpop.xlane.xlu0 %5039 }
 0x6be   :  { %v10773_v59 = vadd.f32 %v5040_v4, %v4944_v33 }
 0x6c0   :  { %v5037_v43 = vpop.xlane.xlu1 %5036 }
 0x6c1   :  { %v10775_v3 = vadd.f32 %v5037_v43, %v4941_v28  ;;  %v4956_v15 = vpop.xlane.xlu0 %4955 }
 0x6c4   :  { %v4953_v11 = vpop.xlane.xlu1 %4952 }
 0x6c5   :  { %v5052_v8 = vpop.xlane.xlu0 %5051 }
 0x6c6   :  { %v10777_v54 = vadd.f32 %v5052_v8, %v4956_v15  ;;  %v5107_v15 = vadd.f32 %v10771_v46, %v10765_v20 }
 0x6c8   :  { %v5049_v51 = vpop.xlane.xlu1 %5048 }
 0x6c9   :  { %v10779_v29 = vadd.f32 %v5049_v51, %v4953_v11  ;;  %v4968_v42 = vpop.xlane.xlu0 %4967 }
 0x6cc   :  { %v4965_v53 = vpop.xlane.xlu1 %4964 }
 0x6cd   :  { %v5064_v34 = vpop.xlane.xlu0 %5063 }
 0x6ce   :  { %v10781_v58 = vadd.f32 %v5064_v34, %v4968_v42 }
 0x6d0   :  { %v5061_v25 = vpop.xlane.xlu1 %5060 }
 0x6d1   :  { %v10783_v36 = vadd.f32 %v5061_v25, %v4965_v53  ;;  %v4980_v45 = vpop.xlane.xlu0 %4979 }
 0x6d4   :  { %v4977_v7 = vpop.xlane.xlu1 %4976 }
 0x6d5   :  { %v5076_v24 = vpop.xlane.xlu0 %5075 }
 0x6d6   :  { %v10785_v47 = vadd.f32 %v5076_v24, %v4980_v45 }
 0x6d8   :  { %v5073_v57 = vpop.xlane.xlu1 %5072 }
 0x6d9   :  { %v10787_v41 = vadd.f32 %v5073_v57, %v4977_v7  ;;  %v4992_v37 = vpop.xlane.xlu0 %4991 }
 0x6dc   :  { %v4989_v10 = vpop.xlane.xlu1 %4988 }
 0x6dd   :  { %v5088_v22 = vpop.xlane.xlu0 %5087 }
 0x6de   :  { %v10789_v40 = vadd.f32 %v5088_v22, %v4992_v37 }
 0x6e0   :  { %v5085_v60 = vpop.xlane.xlu1 %5084 }
 0x6e1   :  { %v10791_v26 = vadd.f32 %v5085_v60, %v4989_v10  ;;  %v10793_v48 = vpop.xlane.xlu0 %5003 }
 0x6e5   :  { %v4911_v6 = vpop.xlane.xlu0 %4910 }
 0x6e9   :  { %v5007_v27 = vpop.xlane.xlu0 %5006 }
 0x6ea   :  { %v5101_v49 = vadd.f32 %v5007_v27, %v4911_v6 }
 0x6ec   :  { %8047 = vrcp.f32 %v5101_v49 }
 0x6ed   :  { %v5010_v18 = vpop.xlane.xlu0 %5009 }
 0x6f1   :  { %v4926_v62 = vpop.xlane.xlu0 %4925 }
 0x6f5   :  { %v5022_v32 = vpop.xlane.xlu0 %5021 }
 0x6f6   :  { %v5106_v42 = vadd.f32 %v5022_v32, %v4926_v62  ;;  %v8048_v6 = vpop.eup %8047 }
 0x6f9   :  { %v4938_v8 = vpop.xlane.xlu0 %4937 }
 0x6fd   :  { %v5418_v63 = vpop.f32.mrb[208].mxu1  ;;  %v7487_v44 = vpop.f32.mrb[176].mxu0 }
 0x6fe   :  { %v7521_v61 = vpop.f32.mrb[209].mxu1  ;;  %v5234_v50 = vpop.f32.mrb[177].mxu0 }
 0x6ff   :  { %v5421_v39 = vpop.f32.mrb[210].mxu1  ;;  %v6145_v23 = vadd.f32 %v5418_v63, %v5234_v50  ;;  %v7488_v35 = vpop.f32.mrb[178].mxu0 }
 0x700   :  { %v7522_v13 = vpop.f32.mrb[211].mxu1  ;;  %v5237_v38 = vpop.f32.mrb[179].mxu0 }
 0x701   :  { %v6146_v52 = vadd.f32 %v5421_v39, %v5237_v38  ;;  %v5034_v46 = vpop.xlane.xlu0 %5033  ;;  %v6209_v14 = vmul.f32 %v8048_v6, %v6145_v23 }
 0x702   :  { %v10795_v2 = vpop.xlane.xlu1 %5000 }
 0x705   :  { %v5466_v31 = vpop.f32.mrb[212].mxu1  ;;  %v7491_v5 = vpop.f32.mrb[180].mxu0 }
 0x706   :  { %v6147_v30 = vadd.f32 %v7487_v44, %v5466_v31  ;;  %v7527_v1 = vpop.f32.mrb[213].mxu1  ;;  %v4914_v55 = vpop.xlane.xlu1 %4913 }
 0x707   :  { %v5469_v12 = vpop.f32.mrb[214].mxu1  ;;  %v5102_v0 = vadd.f32 %v5010_v18, %v4914_v55  ;;  %v5250_v9 = vpop.f32.mrb[181].mxu0  ;;  %v5110_v18 = vadd.f32 %v5034_v46, %v4938_v8 }
 0x708   :  { %v6148_v56 = vadd.f32 %v7488_v35, %v5469_v12  ;;  %v7528_v21 = vpop.f32.mrb[215].mxu1  ;;  %v7492_v33 = vpop.f32.mrb[182].mxu0  ;;  %v6211_v28 = vmul.f32 %v8046_v19, %v6147_v30 }
 0x709   :  { %8049 = vrcp.f32 %v5102_v0  ;;  %v5253_v43 = vpop.f32.mrb[183].mxu0  ;;  %v4950_v23 = vpop.xlane.xlu0 %4949 }
 0x70a   :  { %v6212_v4 = vmul.f32 %v8044_v17, %v6148_v56  ;;  %v4923_v11 = vpop.xlane.xlu1 %4922  ;;  %8051 = vrcp.f32 %v10767_v16 }
 0x70b   :  { %8053 = vrcp.f32 %v5107_v15 }
 0x70c   :  { %v6242_v51 = vpack.c.bf16 %v6212_v4, %v6211_v28  ;;  %8055 = vrcp.f32 %v5106_v42 }
 0x70d   :  { %v5514_v53 = vpop.f32.mrb[216].mxu1  ;;  %v10800_v25 = vpop.f32.mrb[184].mxu0 }
 0x70e   :  { %v6149_v34 = vadd.f32 %v5514_v53, %v5250_v9  ;;  %v7533_v45 = vpop.f32.mrb[217].mxu1  ;;  %v5019_v24 = vpop.xlane.xlu1 %5018 }
 0x70f   :  { %v5517_v7 = vpop.f32.mrb[218].mxu1  ;;  %v5105_v37 = vadd.f32 %v5019_v24, %v4923_v11  ;;  %v5266_v10 = vpop.f32.mrb[185].mxu0 }
 0x710   :  { %v6150_v57 = vadd.f32 %v5517_v7, %v5253_v43  ;;  %v7534_v22 = vpop.f32.mrb[219].mxu1  ;;  %v10802_v20 = vpop.f32.mrb[186].mxu0 }
 0x711   :  { %8057 = vrcp.f32 %v5105_v37  ;;  %v5269_v60 = vpop.f32.mrb[187].mxu0  ;;  %v5046_v11 = vpop.xlane.xlu0 %5045 }
 0x712   :  { %v4935_v27 = vpop.xlane.xlu1 %4934  ;;  %8059 = vrcp.f32 %v5110_v18 }
 0x713   :  { %v8050_v16 = vpop.eup %8049 }
 0x714   :  { %v6210_v63 = vmul.f32 %v8050_v16, %v6146_v52  ;;  %v8052_v38 = vpop.eup %8051 }
 0x715   :  { %v5562_v62 = vpop.f32.mrb[220].mxu1  ;;  %v10804_v61 = vpop.f32.mrb[188].mxu0 }
 0x716   :  { %v6151_v44 = vadd.f32 %v7491_v5, %v5562_v62  ;;  %v7539_v50 = vpop.f32.mrb[221].mxu1  ;;  %v5031_v13 = vpop.xlane.xlu1 %5030  ;;  %v6241_v35 = vpack.c.bf16 %v6210_v63, %v6209_v14 }
 0x717   :  { %v5565_v39 = vpop.f32.mrb[222].mxu1  ;;  %v5109_v32 = vadd.f32 %v5031_v13, %v4935_v27  ;;  %v10806_v31 = vpop.f32.mrb[189].mxu0 }
 0x718   :  { %v6152_v49 = vadd.f32 %v7492_v33, %v5565_v39  ;;  %v7540_v30 = vpop.f32.mrb[223].mxu1  ;;  %v8054_v1 = vpop.eup %8053  ;;  %7615 = vmatprep.mubr.msk.bf16.mxu0 %vm613_vm5, %v6241_v35 }
 0x719   :  { %v10808_v12 = vpop.f32.mrb[190].mxu0  ;;  %v6215_v52 = vmul.f32 %v8054_v1, %v6151_v44  ;;  %8061 = vrcp.f32 %v5109_v32  ;;  %7616 = vmatmul.mubr.msk.bf16.vlgmr.msra.gmra.mrb[112].mxu0 %vm613_vm5, %v6242_v51  ;;  %v8056_v17 = vpop.eup %8055 }
 0x71a   :  { %v6216_v5 = vmul.f32 %v8052_v38, %v6152_v49  ;;  %v10811_v55 = vpop.f32.mrb[191].mxu0  ;;  %v4947_v56 = vpop.xlane.xlu1 %4946  ;;  %v6214_v21 = vmul.f32 %v8056_v17, %v6150_v57  ;;  %8063 = vrcp.f32 %v10775_v3 }
 0x71b   :  { %v8058_v0 = vpop.eup %8057  ;;  %v10816_v37 = vpop.xlane.xlu0 %4961  ;;  %8065 = vrcp.f32 %v10773_v59  ;;  %v5114_v59 = vadd.f32 %v5046_v11, %v4950_v23 }
 0x71c   :  { %v6244_v9 = vpack.c.bf16 %v6216_v5, %v6215_v52  ;;  %v6213_v33 = vmul.f32 %v8058_v0, %v6149_v34  ;;  %v8060_v51 = vpop.eup %8059 }
 0x71d   :  { %v5610_v19 = vpop.f32.mrb[224].mxu1  ;;  %8067 = vrcp.f32 %v5114_v59 }
 0x71e   :  { %v6153_v28 = vadd.f32 %v5610_v19, %v5266_v10  ;;  %v7545_v4 = vpop.f32.mrb[225].mxu1  ;;  %v6243_v15 = vpack.c.bf16 %v6214_v21, %v6213_v33  ;;  %v5043_v53 = vpop.xlane.xlu1 %5042 }
 0x71f   :  { %v5613_v43 = vpop.f32.mrb[226].mxu1  ;;  %v10821_v10 = vpop.xlane.xlu0 %5057  ;;  %v5113_v13 = vadd.f32 %v5043_v53, %v4947_v56 }
 0x720   :  { %v6154_v8 = vadd.f32 %v5613_v43, %v5269_v60  ;;  %v7546_v42 = vpop.f32.mrb[227].mxu1  ;;  %7619 = vmatprep.mubr.msk.bf16.mxu0 %vm613_vm5, %v6243_v15 }
 0x721   :  { %7620 = vmatmul.mubr.msk.bf16.gmra.mrb[116].mxu0 %vm613_vm5, %v6244_v9  ;;  %8069 = vrcp.f32 %v5113_v13 }
 0x722   :  { %v6218_v24 = vmul.f32 %v8060_v51, %v6154_v8  ;;  %v10818_v34 = vpop.xlane.xlu1 %4958  ;;  %8071 = vrcp.f32 %v10779_v29 }
 0x723   :  { %v8062_v45 = vpop.eup %8061  ;;  %v10827_v46 = vpop.xlane.xlu0 %4973  ;;  %8073 = vrcp.f32 %v10777_v54 }
 0x724   :  { %v6217_v7 = vmul.f32 %v8062_v45, %v6153_v28  ;;  %v8064_v18 = vpop.eup %8063  ;;  %8075 = vrcp.f32 %v10783_v36 }
 0x725   :  { %v8066_v39 = vpop.eup %8065  ;;  %8077 = vrcp.f32 %v10781_v58 }
 0x726   :  { %v6245_v57 = vpack.c.bf16 %v6218_v24, %v6217_v7  ;;  %v10823_v22 = vpop.xlane.xlu1 %5054  ;;  %8079 = vrcp.f32 %v10787_v41 }
 0x727   :  { %v10832_v14 = vpop.xlane.xlu0 %5069  ;;  %v8068_v19 = vpop.eup %8067  ;;  %v5117_v58 = vadd.f32 %v10823_v22, %v10818_v34  ;;  %8081 = vrcp.f32 %v10785_v47 }
 0x728   :  { %7623 = vmatprep.mubr.msk.bf16.mxu0 %vm613_vm5, %v6245_v57 }
 0x72a   :  { %v10829_v60 = vpop.xlane.xlu1 %4970 }
 0x72b   :  { %v10837_v49 = vpop.xlane.xlu0 %4985  ;;  %v8070_v29 = vpop.eup %8069 }
 0x72c   :  { %v8072_v45 = vpop.eup %8071 }
 0x72e   :  { %v10834_v63 = vpop.xlane.xlu1 %5066 }
 0x732   :  { %v10839_v32 = vpop.xlane.xlu1 %4982 }
 0x735   :  { %v5658_v6 = vpop.f32.mrb[228].mxu1 }
 0x736   :  { %v6155_v27 = vadd.f32 %v10800_v25, %v5658_v6  ;;  %v7551_v16 = vpop.f32.mrb[229].mxu1  ;;  %v10849_v23 = vpop.xlane.xlu1 %5078 }
 0x737   :  { %v5661_v62 = vpop.f32.mrb[230].mxu1  ;;  %v8074_v16 = vpop.eup %8073 }
 0x738   :  { %v6219_v44 = vmul.f32 %v8064_v18, %v6155_v27  ;;  %v6156_v50 = vadd.f32 %v10802_v20, %v5661_v62  ;;  %v7552_v3 = vpop.f32.mrb[231].mxu1  ;;  %v10846_v20 = vpop.xlane.xlu0 %5081  ;;  %v5118_v62 = vadd.f32 %v10821_v10, %v10816_v37 }
 0x739   :  { %v8076_v37 = vpop.eup %8075 }
 0x73a   :  { %v6220_v35 = vmul.f32 %v8066_v39, %v6156_v50  ;;  %v10865_v54 = vpop.xlane.xlu1 %4994  ;;  %8083 = vrcp.f32 %v5118_v62 }
 0x73b   :  { %8085 = vrcp.f32 %v5117_v58 }
 0x73c   :  { %v6246_v38 = vpack.c.bf16 %v6220_v35, %v6219_v44  ;;  %8087 = vrcp.f32 %v10791_v26 }
 0x73d   :  { %8089 = vrcp.f32 %v10789_v40 }
 0x73e   :  { %v7503_v25 = vpop.f32.mrb[192].mxu0  ;;  %7624 = vmatmul.mubr.msk.bf16.gmra.mrb[120].mxu0 %vm613_vm5, %v6246_v38  ;;  %v10886_v3 = vpop.xlane.xlu1 %5090 }
 0x73f   :  { %v10842_v30 = vpop.f32.mrb[193].mxu0 }
 0x740   :  { %v7504_v1 = vpop.f32.mrb[194].mxu0 }
 0x741   :  { %v10844_v52 = vpop.f32.mrb[195].mxu0 }
 0x745   :  { %v5706_v5 = vpop.f32.mrb[232].mxu1 }
 0x746   :  { %v6157_v17 = vadd.f32 %v5706_v5, %v10806_v31  ;;  %v10852_v56 = vpop.f32.mrb[196].mxu0  ;;  %v7557_v0 = vpop.f32.mrb[233].mxu1 }
 0x747   :  { %v10855_v9 = vpop.f32.mrb[197].mxu0  ;;  %v5709_v21 = vpop.f32.mrb[234].mxu1 }
 0x748   :  { %v6158_v33 = vadd.f32 %v5709_v21, %v10811_v55  ;;  %v10858_v28 = vpop.f32.mrb[198].mxu0  ;;  %v7558_v4 = vpop.f32.mrb[235].mxu1  ;;  %v6221_v15 = vmul.f32 %v8070_v29, %v6157_v17  ;;  %v5121_v21 = vadd.f32 %v10834_v63, %v10829_v60 }
 0x749   :  { %v10860_v43 = vpop.f32.mrb[199].mxu0  ;;  %v10862_v31 = vpop.xlane.xlu0 %4997 }
 0x74a   :  { %v6222_v11 = vmul.f32 %v8068_v19, %v6158_v33  ;;  %v8078_v5 = vpop.eup %8077  ;;  %v5097_v33 = vpop.xlane.xlu1 %5096 }
 0x74b   :  { %v5131_v40 = vadd.f32 %v5097_v33, %v10795_v2 }
 0x74c   :  { %v6247_v8 = vpack.c.bf16 %v6222_v11, %v6221_v15  ;;  %v8080_v11 = vpop.eup %8079 }
 0x74d   :  { %v5754_v42 = vpop.f32.mrb[236].mxu1  ;;  %v10881_v44 = vpop.xlane.xlu0 %5093 }
 0x74e   :  { %v6159_v53 = vadd.f32 %v10804_v61, %v5754_v42  ;;  %v10868_v51 = vpop.f32.mrb[200].mxu0  ;;  %v7563_v55 = vpop.f32.mrb[237].mxu1  ;;  %7627 = vmatprep.mubr.msk.bf16.mxu0 %vm613_vm5, %v6247_v8 }
 0x74f   :  { %v10872_v7 = vpop.f32.mrb[201].mxu0  ;;  %v5757_v24 = vpop.f32.mrb[238].mxu1 }
 0x750   :  { %v6223_v57 = vmul.f32 %v8072_v45, %v6159_v53  ;;  %v6160_v6 = vadd.f32 %v10808_v12, %v5757_v24  ;;  %v10875_v36 = vpop.f32.mrb[202].mxu0  ;;  %v7564_v27 = vpop.f32.mrb[239].mxu1 }
 0x751   :  { %v10877_v18 = vpop.f32.mrb[203].mxu0  ;;  %v5100_v0 = vpop.xlane.xlu0 %5099 }
 0x752   :  { %v6224_v61 = vmul.f32 %v8074_v16, %v6160_v6  ;;  %v8082_v42 = vpop.eup %8081  ;;  %v5132_v6 = vadd.f32 %v5100_v0, %v10793_v48 }
 0x753   :  { %v8084_v55 = vpop.eup %8083 }
 0x754   :  { %v6248_v50 = vpack.c.bf16 %v6224_v61, %v6223_v57  ;;  %v8086_v24 = vpop.eup %8085 }
 0x755   :  { %v5850_v12 = vpop.f32.mrb[240].mxu1 }
 0x756   :  { %v6163_v39 = vadd.f32 %v7503_v25, %v5850_v12  ;;  %v10889_v59 = vpop.f32.mrb[204].mxu0  ;;  %v7575_v13 = vpop.f32.mrb[241].mxu1  ;;  %7628 = vmatmul.mubr.msk.bf16.gmra.mrb[124].mxu0 %vm613_vm5, %v6248_v50  ;;  %v5122_v25 = vadd.f32 %v10832_v14, %v10827_v46 }
 0x757   :  { %v10892_v10 = vpop.f32.mrb[205].mxu0  ;;  %v5853_v35 = vpop.f32.mrb[242].mxu1 }
 0x758   :  { %v6227_v34 = vmul.f32 %v8076_v37, %v6163_v39  ;;  %v6164_v22 = vadd.f32 %v7504_v1, %v5853_v35  ;;  %v10894_v41 = vpop.f32.mrb[206].mxu0  ;;  %v7576_v38 = vpop.f32.mrb[243].mxu1  ;;  %8091 = vrcp.f32 %v5122_v25  ;;  %v5129_v25 = vadd.f32 %v10886_v3, %v10865_v54 }
 0x759   :  { %v10896_v17 = vpop.f32.mrb[207].mxu0  ;;  %8093 = vrcp.f32 %v5121_v21  ;;  %v8088_v12 = vpop.eup %8087 }
 0x75a   :  { %v6228_v47 = vmul.f32 %v8078_v5, %v6164_v22  ;;  %8095 = vrcp.f32 %v5131_v40  ;;  %v8090_v39 = vpop.eup %8089 }
 0x75c   :  { %v6250_v19 = vpack.c.bf16 %v6228_v47, %v6227_v34 }
 0x75d   :  { %v5946_v4 = vpop.f32.mrb[244].mxu1 }
 0x75e   :  { %v6167_v1 = vadd.f32 %v10852_v56, %v5946_v4  ;;  %v5802_v29 = vpop.f32.mrb[208].mxu0  ;;  %v7587_v15 = vpop.f32.mrb[245].mxu1 }
 0x75f   :  { %v6161_v8 = vadd.f32 %v5802_v29, %v10842_v30  ;;  %v7569_v46 = vpop.f32.mrb[209].mxu0  ;;  %v5949_v14 = vpop.f32.mrb[246].mxu1  ;;  %v5126_v30 = vadd.f32 %v10846_v20, %v10837_v49 }
 0x760   :  { %v10906_v60 = vmul.f32 %v8080_v11, %v6167_v1  ;;  %v6168_v26 = vadd.f32 %v10858_v28, %v5949_v14  ;;  %v5805_v63 = vpop.f32.mrb[210].mxu0  ;;  %v7588_v53 = vpop.f32.mrb[247].mxu1  ;;  %v5125_v28 = vadd.f32 %v10849_v23, %v10839_v32 }
 0x761   :  { %v6162_v56 = vadd.f32 %v5805_v63, %v10844_v52  ;;  %v7570_v45 = vpop.f32.mrb[211].mxu0  ;;  %v6225_v27 = vmul.f32 %v8086_v24, %v6161_v8  ;;  %8097 = vrcp.f32 %v5126_v30 }
 0x762   :  { %v6232_v57 = vmul.f32 %v8082_v42, %v6168_v26  ;;  %8099 = vrcp.f32 %v5132_v6 }
 0x763   :  { %v6226_v16 = vmul.f32 %v8084_v55, %v6162_v56  ;;  %8101 = vrcp.f32 %v5125_v28 }
 0x764   :  { %v6252_v61 = vpack.c.bf16 %v6232_v57, %v10906_v60 }
 0x765   :  { %v6249_v62 = vpack.c.bf16 %v6226_v16, %v6225_v27  ;;  %v6042_v2 = vpop.f32.mrb[248].mxu1 }
 0x766   :  { %v6171_v52 = vadd.f32 %v10868_v51, %v6042_v2  ;;  %v5898_v58 = vpop.f32.mrb[212].mxu0  ;;  %v7599_v50 = vpop.f32.mrb[249].mxu1 }
 0x767   :  { %v6165_v49 = vadd.f32 %v5898_v58, %v10855_v9  ;;  %v7581_v48 = vpop.f32.mrb[213].mxu0  ;;  %v6045_v20 = vpop.f32.mrb[250].mxu1  ;;  %7631 = vmatprep.mubr.msk.bf16.mxu0 %vm613_vm5, %v6249_v62  ;;  %v5130_v9 = vadd.f32 %v10881_v44, %v10862_v31 }
 0x768   :  { %v6235_v32 = vmul.f32 %v8088_v12, %v6171_v52  ;;  %v6172_v23 = vadd.f32 %v10875_v36, %v6045_v20  ;;  %v5901_v13 = vpop.f32.mrb[214].mxu0  ;;  %v7600_v37 = vpop.f32.mrb[251].mxu1  ;;  %7632 = vmatmul.mubr.msk.bf16.gmra.mrb[128].mxu0 %vm613_vm5, %v6250_v19 }
 0x769   :  { %v8092_v51 = vpop.eup %8091  ;;  %v6166_v35 = vadd.f32 %v5901_v13, %v10860_v43  ;;  %v7582_v34 = vpop.f32.mrb[215].mxu0  ;;  %8103 = vrcp.f32 %v5130_v9 }
 0x76a   :  { %v8094_v22 = vpop.eup %8093  ;;  %v6236_v38 = vmul.f32 %v8090_v39, %v6172_v23  ;;  %8105 = vrcp.f32 %v5129_v25 }
 0x76b   :  { %v6229_v5 = vmul.f32 %v8094_v22, %v6165_v49  ;;  %v6230_v47 = vmul.f32 %v8092_v51, %v6166_v35  ;;  %v8096_v1 = vpop.eup %8095 }
 0x76c   :  { %v6254_v0 = vpack.c.bf16 %v6236_v38, %v6235_v32  ;;  %v8098_v31 = vpop.eup %8097 }
 0x76d   :  { %v6251_v36 = vpack.c.bf16 %v6230_v47, %v6229_v5  ;;  %v6138_v21 = vpop.f32.mrb[252].mxu1 }
 0x76e   :  { %v6175_v33 = vadd.f32 %v10889_v59, %v6138_v21  ;;  %v5994_v19 = vpop.f32.mrb[216].mxu0  ;;  %v7611_v4 = vpop.f32.mrb[253].mxu1 }
 0x76f   :  { %v6169_v43 = vadd.f32 %v5994_v19, %v10872_v7  ;;  %v7593_v29 = vpop.f32.mrb[217].mxu0  ;;  %v6141_v15 = vpop.f32.mrb[254].mxu1  ;;  %7635 = vmatprep.mubr.msk.bf16.mxu0 %vm613_vm5, %v6251_v36 }
 0x770   :  { %v6239_v44 = vmul.f32 %v8096_v1, %v6175_v33  ;;  %v6176_v54 = vadd.f32 %v10894_v41, %v6141_v15  ;;  %v5997_v3 = vpop.f32.mrb[218].mxu0  ;;  %v7612_v11 = vpop.f32.mrb[255].mxu1  ;;  %7636 = vmatmul.mubr.msk.bf16.gmra.mrb[132].mxu0 %vm613_vm5, %v6252_v61 }
 0x771   :  { %v8100_v59 = vpop.eup %8099  ;;  %v6170_v8 = vadd.f32 %v5997_v3, %v10877_v18  ;;  %v7594_v46 = vpop.f32.mrb[219].mxu0 }
 0x772   :  { %v8102_v14 = vpop.eup %8101  ;;  %v6240_v42 = vmul.f32 %v8100_v59, %v6176_v54 }
 0x773   :  { %v6233_v7 = vmul.f32 %v8102_v14, %v6169_v43  ;;  %v6234_v60 = vmul.f32 %v8098_v31, %v6170_v8  ;;  %v8104_v56 = vpop.eup %8103 }
 0x774   :  { %v6256_v26 = vpack.c.bf16 %v6240_v42, %v6239_v44  ;;  %v8106_v24 = vpop.eup %8105 }
 0x775   :  { %v6253_v63 = vpack.c.bf16 %v6234_v60, %v6233_v7 }
 0x776   :  { %v6090_v53 = vpop.f32.mrb[220].mxu0 }
 0x777   :  { %v6173_v55 = vadd.f32 %v6090_v53, %v10892_v10  ;;  %v7605_v40 = vpop.f32.mrb[221].mxu0  ;;  %7639 = vmatprep.mubr.msk.bf16.mxu0 %vm613_vm5, %v6253_v63  ;;  %v10942_v10 = vld [vmem:[%s11111_s5] ss:$0 sm:$0xff] }
 0x778   :  { %v6093_v41 = vpop.f32.mrb[222].mxu0  ;;  %7640 = vmatmul.mubr.msk.bf16.gmra.mrb[136].mxu0 %vm613_vm5, %v6254_v0 }
 0x779   :  { %v6174_v45 = vadd.f32 %v6093_v41, %v10896_v17  ;;  %v7606_v18 = vpop.f32.mrb[223].mxu0  ;;  %v6237_v30 = vmul.f32 %v8106_v24, %v6173_v55 }
 0x77b   :  { %v6238_v57 = vmul.f32 %v8104_v56, %v6174_v45 }
 0x77d   :  { %v6255_v6 = vpack.c.bf16 %v6238_v57, %v6237_v30 }
 0x77f   :  { %7643 = vmatprep.mubr.msk.bf16.mxu0 %vm613_vm5, %v6255_v6 }
 0x780   :  { %7644 = vmatmul.mubr.msk.bf16.gmra.mrb[140].mxu0 %vm613_vm5, %v6256_v26 }
 0x7ec   :  { %v7617_v27 = vpop.f32.mrb[112].mxu0 }
 0x7ed   :  { %v7649_v16 = vadd.f32 %v7617_v27, %v10942_v10  ;;  %v6339_v28 = vpop.f32.mrb[113].mxu0 }
 0x7ee   :  { %v7650_v17 = vadd.f32 %v10942_v10, %v6339_v28  ;;  %v7618_v61 = vpop.f32.mrb[114].mxu0 }
 0x7ef   :  { %6500 = vst.msk [vmem:[%s11112_s8 + $0x10] sm:$0xff] %vm360_vm3, %v7649_v16  ;;  %v7651_v62 = vadd.f32 %v7618_v61, %v10942_v10  ;;  %v6342_v2 = vpop.f32.mrb[115].mxu0 }
 0x7f0   :  { %6498 = vst.msk [vmem:[%s11112_s8] sm:$0xff] %vm360_vm3, %v7650_v17  ;;  %v7652_v52 = vadd.f32 %v10942_v10, %v6342_v2 }
 0x7f1   :  { %6501 = vst.msk [vmem:[%s11112_s8 + $0x18] sm:$0xff] %vm360_vm3, %v7651_v62 }
 0x7f2   :  { %6499 = vst.msk [vmem:[%s11112_s8 + $0x8] sm:$0xff] %vm360_vm3, %v7652_v52 }
 0x7f4   :  { %v7621_v58 = vpop.f32.mrb[116].mxu0 }
 0x7f5   :  { %v7653_v50 = vadd.f32 %v7621_v58, %v10942_v10  ;;  %v6355_v12 = vpop.f32.mrb[117].mxu0 }
 0x7f6   :  { %v7654_v49 = vadd.f32 %v10942_v10, %v6355_v12  ;;  %v7622_v48 = vpop.f32.mrb[118].mxu0 }
 0x7f7   :  { %6504 = vst.msk [vmem:[%s11112_s8 + $0x30] sm:$0xff] %vm360_vm3, %v7653_v50  ;;  %v7655_v20 = vadd.f32 %v7622_v48, %v10942_v10  ;;  %v6358_v39 = vpop.f32.mrb[119].mxu0 }
 0x7f8   :  { %6502 = vst.msk [vmem:[%s11112_s8 + $0x20] sm:$0xff] %vm360_vm3, %v7654_v49  ;;  %v7656_v32 = vadd.f32 %v10942_v10, %v6358_v39 }
 0x7f9   :  { %6505 = vst.msk [vmem:[%s11112_s8 + $0x38] sm:$0xff] %vm360_vm3, %v7655_v20 }
 0x7fa   :  { %6503 = vst.msk [vmem:[%s11112_s8 + $0x28] sm:$0xff] %vm360_vm3, %v7656_v32 }
 0x811   :  { %v7625_v23 = vpop.f32.mrb[120].mxu0 }
 0x812   :  { %v7657_v13 = vadd.f32 %v7625_v23, %v10942_v10  ;;  %v6371_v37 = vpop.f32.mrb[121].mxu0 }
 0x813   :  { %v7658_v51 = vadd.f32 %v10942_v10, %v6371_v37  ;;  %v7626_v35 = vpop.f32.mrb[122].mxu0 }
 0x814   :  { %6508 = vst.msk [vmem:[%s11112_s8 + $0x50] sm:$0xff] %vm360_vm3, %v7657_v13  ;;  %v7659_v34 = vadd.f32 %v7626_v35, %v10942_v10  ;;  %v6374_v22 = vpop.f32.mrb[123].mxu0 }
 0x815   :  { %6506 = vst.msk [vmem:[%s11112_s8 + $0x40] sm:$0xff] %vm360_vm3, %v7658_v51  ;;  %v7660_v38 = vadd.f32 %v10942_v10, %v6374_v22 }
 0x816   :  { %6509 = vst.msk [vmem:[%s11112_s8 + $0x58] sm:$0xff] %vm360_vm3, %v7659_v34 }
 0x817   :  { %6507 = vst.msk [vmem:[%s11112_s8 + $0x48] sm:$0xff] %vm360_vm3, %v7660_v38 }
 0x829   :  { %v7629_v9 = vpop.f32.mrb[124].mxu0 }
 0x82a   :  { %v7661_v5 = vadd.f32 %v7629_v9, %v10942_v10  ;;  %v6387_v47 = vpop.f32.mrb[125].mxu0 }
 0x82b   :  { %v7662_v25 = vadd.f32 %v10942_v10, %v6387_v47  ;;  %v7630_v0 = vpop.f32.mrb[126].mxu0 }
 0x82c   :  { %6512 = vst.msk [vmem:[%s11112_s8 + $0x70] sm:$0xff] %vm360_vm3, %v7661_v5  ;;  %v7663_v36 = vadd.f32 %v7630_v0, %v10942_v10  ;;  %v6390_v21 = vpop.f32.mrb[127].mxu0 }
 0x82d   :  { %6510 = vst.msk [vmem:[%s11112_s8 + $0x60] sm:$0xff] %vm360_vm3, %v7662_v25  ;;  %v7664_v33 = vadd.f32 %v10942_v10, %v6390_v21 }
 0x82e   :  { %6513 = vst.msk [vmem:[%s11112_s8 + $0x78] sm:$0xff] %vm360_vm3, %v7663_v36 }
 0x82f   :  { %6511 = vst.msk [vmem:[%s11112_s8 + $0x68] sm:$0xff] %vm360_vm3, %v7664_v33 }
 0x83b   :  { %v7633_v19 = vpop.f32.mrb[128].mxu0 }
 0x83c   :  { %v7665_v4 = vadd.f32 %v7633_v19, %v10942_v10  ;;  %v6403_v1 = vpop.f32.mrb[129].mxu0 }
 0x83d   :  { %v7666_v43 = vadd.f32 %v10942_v10, %v6403_v1  ;;  %v7634_v29 = vpop.f32.mrb[130].mxu0 }
 0x83e   :  { %6516 = vst.msk [vmem:[%s11112_s8 + $0x90] sm:$0xff] %vm360_vm3, %v7665_v4  ;;  %v7667_v15 = vadd.f32 %v7634_v29, %v10942_v10  ;;  %v6406_v31 = vpop.f32.mrb[131].mxu0 }
 0x83f   :  { %6514 = vst.msk [vmem:[%s11112_s8 + $0x80] sm:$0xff] %vm360_vm3, %v7666_v43  ;;  %v7668_v44 = vadd.f32 %v10942_v10, %v6406_v31 }
 0x840   :  { %6517 = vst.msk [vmem:[%s11112_s8 + $0x98] sm:$0xff] %vm360_vm3, %v7667_v15 }
 0x841   :  { %6515 = vst.msk [vmem:[%s11112_s8 + $0x88] sm:$0xff] %vm360_vm3, %v7668_v44 }
 0x843   :  { %v7637_v54 = vpop.f32.mrb[132].mxu0 }
 0x844   :  { %v7669_v3 = vadd.f32 %v7637_v54, %v10942_v10  ;;  %v6419_v11 = vpop.f32.mrb[133].mxu0 }
 0x845   :  { %v7670_v59 = vadd.f32 %v10942_v10, %v6419_v11  ;;  %v7638_v8 = vpop.f32.mrb[134].mxu0 }
 0x846   :  { %6520 = vst.msk [vmem:[%s11112_s8 + $0xb0] sm:$0xff] %vm360_vm3, %v7669_v3  ;;  %v7671_v46 = vadd.f32 %v7638_v8, %v10942_v10  ;;  %v6422_v14 = vpop.f32.mrb[135].mxu0 }
 0x847   :  { %6518 = vst.msk [vmem:[%s11112_s8 + $0xa0] sm:$0xff] %vm360_vm3, %v7670_v59  ;;  %v7672_v42 = vadd.f32 %v10942_v10, %v6422_v14 }
 0x848   :  { %6521 = vst.msk [vmem:[%s11112_s8 + $0xb8] sm:$0xff] %vm360_vm3, %v7671_v46 }
 0x849   :  { %6519 = vst.msk [vmem:[%s11112_s8 + $0xa8] sm:$0xff] %vm360_vm3, %v7672_v42 }
 0x84b   :  { %v7641_v7 = vpop.f32.mrb[136].mxu0 }
 0x84c   :  { %v7673_v60 = vadd.f32 %v7641_v7, %v10942_v10  ;;  %v6435_v26 = vpop.f32.mrb[137].mxu0 }
 0x84d   :  { %v7674_v63 = vadd.f32 %v10942_v10, %v6435_v26  ;;  %v7642_v53 = vpop.f32.mrb[138].mxu0 }
 0x84e   :  { %6524 = vst.msk [vmem:[%s11112_s8 + $0xd0] sm:$0xff] %vm360_vm3, %v7673_v60  ;;  %v7675_v55 = vadd.f32 %v7642_v53, %v10942_v10  ;;  %v6438_v40 = vpop.f32.mrb[139].mxu0 }
 0x84f   :  { %6522 = vst.msk [vmem:[%s11112_s8 + $0xc0] sm:$0xff] %vm360_vm3, %v7674_v63  ;;  %v7676_v41 = vadd.f32 %v10942_v10, %v6438_v40 }
 0x850   :  { %6525 = vst.msk [vmem:[%s11112_s8 + $0xd8] sm:$0xff] %vm360_vm3, %v7675_v55 }
 0x851   :  { %6523 = vst.msk [vmem:[%s11112_s8 + $0xc8] sm:$0xff] %vm360_vm3, %v7676_v41 }
 0x853   :  { %v7645_v56 = vpop.f32.mrb[140].mxu0 }
 0x854   :  { %v7677_v45 = vadd.f32 %v7645_v56, %v10942_v10  ;;  %v6451_v18 = vpop.f32.mrb[141].mxu0 }
 0x855   :  { %v7678_v24 = vadd.f32 %v10942_v10, %v6451_v18  ;;  %v7646_v30 = vpop.f32.mrb[142].mxu0 }
 0x856   :  { %6528 = vst.msk [vmem:[%s11112_s8 + $0xf0] sm:$0xff] %vm360_vm3, %v7677_v45  ;;  %v7679_v57 = vadd.f32 %v7646_v30, %v10942_v10  ;;  %v6454_v6 = vpop.f32.mrb[143].mxu0 }
 0x857   :  { %6526 = vst.msk [vmem:[%s11112_s8 + $0xe0] sm:$0xff] %vm360_vm3, %v7678_v24  ;;  %v7680_v27 = vadd.f32 %v10942_v10, %v6454_v6 }
 0x858   :  { %6529 = vst.msk [vmem:[%s11112_s8 + $0xf8] sm:$0xff] %vm360_vm3, %v7679_v57 }
 0x859   :  { %6527 = vst.msk [vmem:[%s11112_s8 + $0xe8] sm:$0xff] %vm360_vm3, %v7680_v27 }

</bundles_post_ra>
